<compile_context>
chip_gen: v7x
topology: tpu7x:2x2x1
jax: 0.10.0
libtpu: 0.0.40
codegen_flags: <defaults>
</compile_context>

<pallas_src>
import functools

import numpy as np
import jax
import jax.numpy as jnp
from jax.experimental import pallas as pl
from jax.experimental.pallas import tpu as pltpu


# ---------------- configuration (mirrors cfg in the PyTorch module) ----------------
class Cfg:
    max_length = 8          # L
    feature_dim = 32        # F
    num_classes = 10        # C
    is_scaled_dot_product = True


DEPTH = 128
HEAD_NUM = 8
HEAD_DIM = DEPTH // HEAD_NUM   # 16
C_PAD = 128                    # lane-dense padded class dim
MAX_BB = 64                    # max batch elements per grid step


# ---------------- positional encoding (exact port of the numpy code) ----------------
def positional_encoding(length, embed_dim):
    dim = embed_dim // 2
    position = np.arange(length)[:, np.newaxis]
    dim = np.arange(dim)[np.newaxis, :] / dim
    angle = 1 / 10000 ** dim
    angle = position * angle
    pos_embed = np.concatenate([np.sin(angle), np.cos(angle)], axis=-1)
    return jnp.asarray(pos_embed, dtype=jnp.float32)


# ---------------- fused Pallas kernel: BB batch elements per grid step ----------------
def fused_mha_kernel(x_ref, bpos_ref, wqkv_ref, r_ref, s_ref, st_ref, w_ref,
                     hm_ref, blast_ref, o_ref, acc_ref, *, L):
    # x_ref: (BB*L, F) — BB batch elements, rows = (batch, position).
    # Fused Q/K/V projection; pos-embed and 1/sqrt(depth) already folded into wqkv / bpos.
    qkv = jnp.dot(x_ref[...], wqkv_ref[...],
                  preferred_element_type=jnp.float32) + bpos_ref[...]        # (R, 384)
    q = qkv[:, 0:DEPTH]                 # lane-aligned slices (offsets are multiples of 128)
    k = qkv[:, DEPTH:2 * DEPTH]
    v = qkv[:, 2 * DEPTH:3 * DEPTH]

    acc_ref[...] = jnp.zeros_like(acc_ref)
    for i in range(L):                  # query position i (static unroll, L == 8)
        # Replicate q's chunk i across all 8 chunks on the MXU: qt[r, j*16+d] = q[r, i*16+d].
        qt = jnp.dot(q, r_ref[i], preferred_element_type=jnp.float32)        # (R, 128)
        # logit[r, j] = sum_d q[r, i*16+d] * k[r, j*16+d]   (all batches x heads at once)
        logit = jnp.dot(qt * k, s_ref[...],
                        preferred_element_type=jnp.float32)                  # (R, L)
        m = jnp.max(logit, axis=-1, keepdims=True)
        e = jnp.exp(logit - m)
        p = e * pl.reciprocal(jnp.sum(e, axis=-1, keepdims=True))            # softmax over keys
        # Expand the 8 key weights across their 16-lane chunks, weight V, and fold the
        # chunk gather + last-linear columns for query position i into one matmul.
        p_exp = jnp.dot(p, st_ref[...], preferred_element_type=jnp.float32)  # (R, 128)
        acc_ref[...] += jnp.dot(p_exp * v, w_ref[i],
                                preferred_element_type=jnp.float32)          # (R, C_PAD)

    # Per-batch head mean (the module's post-view "sequence" mean; 1/L folded into hm) + bias.
    o_ref[...] = jnp.dot(hm_ref[...], acc_ref[...],
                         preferred_element_type=jnp.float32) + blast_ref[...]


# ---------------- host-side static selector / gather constants ----------------
def _build_constants(L, BB):
    lane = np.arange(DEPTH)
    chunk = lane // HEAD_DIM            # which 16-lane chunk each lane belongs to
    within = lane % HEAD_DIM            # position within the chunk
    # S[c, j] = 1 iff lane c is in chunk j  (chunk-sum selector).
    S = (chunk[:, None] == np.arange(L)[None, :]).astype(np.float32)         # (128, L)
    ST = np.ascontiguousarray(S.T)                                           # (L, 128)
    # R_all[i][c, c'] = 1 iff chunk(c) == i and within(c) == within(c')  (chunk-i replication).
    R_all = ((chunk[None, :, None] == np.arange(L)[:, None, None])
             & (within[:, None] == within[None, :])[None, :, :]).astype(np.float32)  # (L,128,128)
    # Head-mean selector: out row b averages the L rows of batch element b (1/L folded in).
    hm = np.kron(np.eye(BB, dtype=np.float32),
                 np.full((1, L), 1.0 / L, dtype=np.float32))                 # (BB, BB*L)
    return S, ST, R_all, hm, within


# ---------------- wrapper ----------------
def simple_mha_forward(x, params, pos_embed, attention_mask=None, cfg=Cfg):
    # TODO(synk): attention_mask path (masked_fill_ with -finfo.max before softmax) not implemented; None path only.
    assert attention_mask is None
    B, L, F = x.shape
    C = cfg.num_classes
    assert L * HEAD_DIM == DEPTH, "contiguous-view head split requires max_length == 8"

    # ----- fold pos-embed, scale and QKV fusion into weights (one-time, host side) -----
    scale = (1.0 / DEPTH ** 0.5) if cfg.is_scaled_dot_product else 1.0
    wqkv = jnp.concatenate([params["wq"] * scale, params["wk"], params["wv"]], axis=1)  # (F, 384)
    bqkv = jnp.concatenate([params["bq"] * scale, params["bk"], params["bv"]], axis=1)  # (1, 384)
    bpos = pos_embed.astype(jnp.float32) @ wqkv + bqkv                                  # (L, 384)

    # ----- batch blocking -----
    BB = min(MAX_BB, pl.cdiv(B, 2))           # aim for >=2 grid steps (v7x: 2 TensorCores)
    BB = max(8, ((BB + 7) // 8) * 8)          # sublane-aligned output block
    B_pad = pl.cdiv(B, BB) * BB
    ROWS = BB * L

    x_pad = jnp.pad(x.astype(jnp.float32), ((0, B_pad - B), (0, 0), (0, 0)))
    x2d = x_pad.reshape(B_pad * L, F)
    bpos_tiled = jnp.tile(bpos, (BB, 1))                                                # (ROWS, 384)

    # ----- static selector constants + padded last linear -----
    S, ST, R_all, hm, within = _build_constants(L, BB)
    wlast_pad = np.zeros((DEPTH, C_PAD), np.float32)
    wlast_pad[:, :C] = np.asarray(params["wlast"], np.float32)
    # W_all[i][j*16+d, c] = wlast[i*16+d, c]  (chunk-gather fused with the last linear).
    W_all = wlast_pad[np.arange(L)[:, None] * HEAD_DIM + within[None, :], :]            # (L,128,C_PAD)
    blast_pad = np.zeros((1, C_PAD), np.float32)
    blast_pad[:, :C] = np.asarray(params["blast"], np.float32).reshape(1, C)

    S_j, ST_j = jnp.asarray(S), jnp.asarray(ST)
    R_j, W_j = jnp.asarray(R_all), jnp.asarray(W_all)
    hm_j, bl_j = jnp.asarray(hm), jnp.asarray(blast_pad)

    kernel = functools.partial(fused_mha_kernel, L=L)
    full = lambda a: pl.BlockSpec(a.shape, lambda b: (0,) * a.ndim)   # resident constant

    out_pad = pl.pallas_call(
        kernel,
        out_shape=jax.ShapeDtypeStruct((B_pad, C_PAD), jnp.float32),
        grid=(B_pad // BB,),
        in_specs=[
            pl.BlockSpec((ROWS, F), lambda b: (b, 0)),   # x rows for this batch block
            full(bpos_tiled),                            # per-position QKV bias (pos folded in)
            full(wqkv),                                  # fused, pre-scaled QKV weight
            full(R_j), full(S_j), full(ST_j), full(W_j), # static selector / gather matrices
            full(hm_j), full(bl_j),                      # head-mean selector, padded bias
        ],
        out_specs=pl.BlockSpec((BB, C_PAD), lambda b: (b, 0)),
        scratch_shapes=[pltpu.VMEM((ROWS, C_PAD), jnp.float32)],
        compiler_params=pltpu.CompilerParams(dimension_semantics=("parallel",)),
    )(x2d, bpos_tiled, wqkv, R_j, S_j, ST_j, W_j, hm_j, bl_j)

    return out_pad[:B, :C]


# ---------------- plain-JAX reference (for correctness check) ----------------
def reference_forward(x, params, pos_embed, cfg=Cfg):
    B, L, F = x.shape
    xp = x + pos_embed
    q = xp @ params["wq"] + params["bq"]
    k = xp @ params["wk"] + params["bk"]
    v = xp @ params["wv"] + params["bv"]
    q = q.reshape(B, HEAD_NUM, L, HEAD_DIM)
    k = k.reshape(B, HEAD_NUM, L, HEAD_DIM)
    v = v.reshape(B, HEAD_NUM, L, HEAD_DIM)
    if cfg.is_scaled_dot_product:
        q = q / DEPTH ** 0.5
    logit = jnp.einsum("bhqd,bhkd->bhqk", q, k)
    attn = jax.nn.softmax(logit, axis=3)
    ao = jnp.einsum("bhqk,bhkd->bhqd", attn, v).reshape(B, L, DEPTH)
    out = ao @ params["wlast"] + params["blast"]
    return out.mean(axis=1)


# ---------------- deterministic parameter init ----------------
def init_params(key):
    def linear(kw, kb, fan_in, fan_out):
        bound = 1.0 / np.sqrt(fan_in)
        w = jax.random.uniform(kw, (fan_in, fan_out), jnp.float32, -bound, bound)
        b = jax.random.uniform(kb, (1, fan_out), jnp.float32, -bound, bound)
        return w, b

    ks = jax.random.split(key, 8)
    wq, bq = linear(ks[0], ks[1], Cfg.feature_dim, DEPTH)
    wk, bk = linear(ks[2], ks[3], Cfg.feature_dim, DEPTH)
    wv, bv = linear(ks[4], ks[5], Cfg.feature_dim, DEPTH)
    wl, bl = linear(ks[6], ks[7], DEPTH, Cfg.num_classes)
    return dict(wq=wq, bq=bq, wk=wk, bk=bk, wv=wv, bv=bv, wlast=wl, blast=bl)


if __name__ == "__main__":
    key = jax.random.PRNGKey(0)
    kx, kp = jax.random.split(key)
    B, L, F = 16, Cfg.max_length, Cfg.feature_dim   # small shapes; B=16 -> 2 grid steps

    x = jax.random.normal(kx, (B, L, F), dtype=jnp.float32)
    params = init_params(kp)
    pos = positional_encoding(Cfg.max_length, Cfg.feature_dim)

    out = simple_mha_forward(x, params, pos, attention_mask=None)
    out = jax.block_until_ready(out)

    ref = reference_forward(x, params, pos)
    assert out.shape == (B, Cfg.num_classes)
    np.testing.assert_allclose(np.asarray(out), np.asarray(ref), rtol=2e-5, atol=2e-5)
    print("KERNEL_OK")
</pallas_src>

<mosaic_0001>
module attributes {stable_mosaic.version = 11 : i64} {
  func.func @fused_mha_kernel(%arg0: i32, %arg1: memref<64x32xf32, #tpu.memory_space<vmem>>, %arg2: memref<64x384xf32, #tpu.memory_space<vmem>>, %arg3: memref<32x384xf32, #tpu.memory_space<vmem>>, %arg4: memref<8x128x128xf32, #tpu.memory_space<vmem>>, %arg5: memref<128x8xf32, #tpu.memory_space<vmem>>, %arg6: memref<8x128xf32, #tpu.memory_space<vmem>>, %arg7: memref<8x128x128xf32, #tpu.memory_space<vmem>>, %arg8: memref<8x64xf32, #tpu.memory_space<vmem>>, %arg9: memref<1x128xf32, #tpu.memory_space<vmem>>, %arg10: memref<8x128xf32, #tpu.memory_space<vmem>>, %arg11: memref<64x128xf32, #tpu.memory_space<vmem>>) attributes {dimension_semantics = [#tpu.dimension_semantics<parallel>], iteration_bounds = array<i64: 2>, scalar_prefetch = 0 : i64, scratch_operands = 1 : i64, tpu.core_type = #tpu.core_type<tc>, window_params = [{transform_indices = @transform_0, window_bounds = array<i64: 64, 32>}, {pipeline_mode = #tpu.pipeline_mode<synchronous>, transform_indices = @transform_1, window_bounds = array<i64: 64, 384>}, {pipeline_mode = #tpu.pipeline_mode<synchronous>, transform_indices = @transform_2, window_bounds = array<i64: 32, 384>}, {pipeline_mode = #tpu.pipeline_mode<synchronous>, transform_indices = @transform_3, window_bounds = array<i64: 8, 128, 128>}, {pipeline_mode = #tpu.pipeline_mode<synchronous>, transform_indices = @transform_4, window_bounds = array<i64: 128, 8>}, {pipeline_mode = #tpu.pipeline_mode<synchronous>, transform_indices = @transform_5, window_bounds = array<i64: 8, 128>}, {pipeline_mode = #tpu.pipeline_mode<synchronous>, transform_indices = @transform_6, window_bounds = array<i64: 8, 128, 128>}, {pipeline_mode = #tpu.pipeline_mode<synchronous>, transform_indices = @transform_7, window_bounds = array<i64: 8, 64>}, {pipeline_mode = #tpu.pipeline_mode<synchronous>, transform_indices = @transform_8, window_bounds = array<i64: 1, 128>}, {transform_indices = @transform_9, window_bounds = array<i64: 8, 128>}]} {
    %c0 = arith.constant 0 : index
    %c0_0 = arith.constant 0 : index
    %0 = vector.load %arg1[%c0, %c0_0] : memref<64x32xf32, #tpu.memory_space<vmem>>, vector<64x32xf32>
    %c0_1 = arith.constant 0 : index
    %c0_2 = arith.constant 0 : index
    %1 = vector.load %arg3[%c0_1, %c0_2] : memref<32x384xf32, #tpu.memory_space<vmem>>, vector<32x384xf32>
    %cst = arith.constant dense<0.000000e+00> : vector<64x384xf32>
    %2 = tpu.matmul %0, %1, %cst {dimension_numbers = #tpu.dot_dimension_numbers<[1], [0], [0], [1], [0, 0, 1, 1], [], []>} : vector<64x32xf32>, vector<32x384xf32>, vector<64x384xf32> -> vector<64x384xf32>
    %c0_3 = arith.constant 0 : index
    %c0_4 = arith.constant 0 : index
    %3 = vector.load %arg2[%c0_3, %c0_4] : memref<64x384xf32, #tpu.memory_space<vmem>>, vector<64x384xf32>
    %4 = arith.addf %2, %3 : vector<64x384xf32>
    %5 = vector.extract_strided_slice %4 {offsets = [0, 0], sizes = [64, 128], strides = [1, 1]} : vector<64x384xf32> to vector<64x128xf32>
    %6 = vector.extract_strided_slice %4 {offsets = [0, 128], sizes = [64, 128], strides = [1, 1]} : vector<64x384xf32> to vector<64x128xf32>
    %7 = vector.extract_strided_slice %4 {offsets = [0, 256], sizes = [64, 128], strides = [1, 1]} : vector<64x384xf32> to vector<64x128xf32>
    %cst_5 = arith.constant 0.000000e+00 : f32
    %8 = vector.broadcast %cst_5 : f32 to vector<64x128xf32>
    %c0_6 = arith.constant 0 : index
    %c0_7 = arith.constant 0 : index
    %9 = vector.load %arg11[%c0_6, %c0_7] : memref<64x128xf32, #tpu.memory_space<vmem>>, vector<64x128xf32>
    tpu.vector_store %arg11[%c0_6, %c0_7], %8 {strides = array<i32>} : memref<64x128xf32, #tpu.memory_space<vmem>>, vector<64x128xf32>,
    %c0_8 = arith.constant 0 : index
    %c0_9 = arith.constant 0 : index
    %c0_10 = arith.constant 0 : index
    %10 = vector.load %arg4[%c0_8, %c0_9, %c0_10] : memref<8x128x128xf32, #tpu.memory_space<vmem>>, vector<1x128x128xf32>
    %11 = vector.shape_cast %10 : vector<1x128x128xf32> to vector<128x128xf32>
    %cst_11 = arith.constant dense<0.000000e+00> : vector<64x128xf32>
    %12 = tpu.matmul %5, %11, %cst_11 {dimension_numbers = #tpu.dot_dimension_numbers<[1], [0], [0], [1], [0, 0, 1, 1], [], []>} : vector<64x128xf32>, vector<128x128xf32>, vector<64x128xf32> -> vector<64x128xf32>
    %13 = arith.mulf %12, %6 : vector<64x128xf32>
    %c0_12 = arith.constant 0 : index
    %c0_13 = arith.constant 0 : index
    %14 = vector.load %arg5[%c0_12, %c0_13] : memref<128x8xf32, #tpu.memory_space<vmem>>, vector<128x8xf32>
    %cst_14 = arith.constant dense<0.000000e+00> : vector<64x8xf32>
    %15 = tpu.matmul %13, %14, %cst_14 {dimension_numbers = #tpu.dot_dimension_numbers<[1], [0], [0], [1], [0, 0, 1, 1], [], []>} : vector<64x128xf32>, vector<128x8xf32>, vector<64x8xf32> -> vector<64x8xf32>
    %cst_15 = arith.constant dense<0xFF800000> : vector<64xf32>
    %16 = vector.multi_reduction <maximumf>, %15, %cst_15 [1] : vector<64x8xf32> to vector<64xf32>
    %17 = vector.shape_cast %16 : vector<64xf32> to vector<64x1xf32>
    %18 = vector.broadcast %17 : vector<64x1xf32> to vector<64x8xf32>
    %19 = arith.subf %15, %18 : vector<64x8xf32>
    %20 = math.exp %19 : vector<64x8xf32>
    %cst_16 = arith.constant dense<0.000000e+00> : vector<64xf32>
    %21 = vector.multi_reduction <add>, %20, %cst_16 [1] : vector<64x8xf32> to vector<64xf32>
    %22 = vector.shape_cast %21 : vector<64xf32> to vector<64x1xf32>
    %23 = tpu.reciprocal %22 : vector<64x1xf32> -> vector<64x1xf32>
    %24 = vector.broadcast %23 : vector<64x1xf32> to vector<64x8xf32>
    %25 = arith.mulf %20, %24 : vector<64x8xf32>
    %c0_17 = arith.constant 0 : index
    %c0_18 = arith.constant 0 : index
    %26 = vector.load %arg6[%c0_17, %c0_18] : memref<8x128xf32, #tpu.memory_space<vmem>>, vector<8x128xf32>
    %cst_19 = arith.constant dense<0.000000e+00> : vector<64x128xf32>
    %27 = tpu.matmul %25, %26, %cst_19 {dimension_numbers = #tpu.dot_dimension_numbers<[1], [0], [0], [1], [0, 0, 1, 1], [], []>} : vector<64x8xf32>, vector<8x128xf32>, vector<64x128xf32> -> vector<64x128xf32>
    %c0_20 = arith.constant 0 : index
    %c0_21 = arith.constant 0 : index
    %28 = vector.load %arg11[%c0_20, %c0_21] : memref<64x128xf32, #tpu.memory_space<vmem>>, vector<64x128xf32>
    %29 = arith.mulf %27, %7 : vector<64x128xf32>
    %c0_22 = arith.constant 0 : index
    %c0_23 = arith.constant 0 : index
    %c0_24 = arith.constant 0 : index
    %30 = vector.load %arg7[%c0_22, %c0_23, %c0_24] : memref<8x128x128xf32, #tpu.memory_space<vmem>>, vector<1x128x128xf32>
    %31 = vector.shape_cast %30 : vector<1x128x128xf32> to vector<128x128xf32>
    %cst_25 = arith.constant dense<0.000000e+00> : vector<64x128xf32>
    %32 = tpu.matmul %29, %31, %cst_25 {dimension_numbers = #tpu.dot_dimension_numbers<[1], [0], [0], [1], [0, 0, 1, 1], [], []>} : vector<64x128xf32>, vector<128x128xf32>, vector<64x128xf32> -> vector<64x128xf32>
    %33 = arith.addf %28, %32 : vector<64x128xf32>
    %c0_26 = arith.constant 0 : index
    %c0_27 = arith.constant 0 : index
    %34 = vector.load %arg11[%c0_26, %c0_27] : memref<64x128xf32, #tpu.memory_space<vmem>>, vector<64x128xf32>
    tpu.vector_store %arg11[%c0_26, %c0_27], %33 {strides = array<i32>} : memref<64x128xf32, #tpu.memory_space<vmem>>, vector<64x128xf32>,
    %c1 = arith.constant 1 : index
    %c0_28 = arith.constant 0 : index
    %c0_29 = arith.constant 0 : index
    %35 = vector.load %arg4[%c1, %c0_28, %c0_29] : memref<8x128x128xf32, #tpu.memory_space<vmem>>, vector<1x128x128xf32>
    %36 = vector.shape_cast %35 : vector<1x128x128xf32> to vector<128x128xf32>
    %cst_30 = arith.constant dense<0.000000e+00> : vector<64x128xf32>
    %37 = tpu.matmul %5, %36, %cst_30 {dimension_numbers = #tpu.dot_dimension_numbers<[1], [0], [0], [1], [0, 0, 1, 1], [], []>} : vector<64x128xf32>, vector<128x128xf32>, vector<64x128xf32> -> vector<64x128xf32>
    %38 = arith.mulf %37, %6 : vector<64x128xf32>
    %c0_31 = arith.constant 0 : index
    %c0_32 = arith.constant 0 : index
    %39 = vector.load %arg5[%c0_31, %c0_32] : memref<128x8xf32, #tpu.memory_space<vmem>>, vector<128x8xf32>
    %cst_33 = arith.constant dense<0.000000e+00> : vector<64x8xf32>
    %40 = tpu.matmul %38, %39, %cst_33 {dimension_numbers = #tpu.dot_dimension_numbers<[1], [0], [0], [1], [0, 0, 1, 1], [], []>} : vector<64x128xf32>, vector<128x8xf32>, vector<64x8xf32> -> vector<64x8xf32>
    %cst_34 = arith.constant dense<0xFF800000> : vector<64xf32>
    %41 = vector.multi_reduction <maximumf>, %40, %cst_34 [1] : vector<64x8xf32> to vector<64xf32>
    %42 = vector.shape_cast %41 : vector<64xf32> to vector<64x1xf32>
    %43 = vector.broadcast %42 : vector<64x1xf32> to vector<64x8xf32>
    %44 = arith.subf %40, %43 : vector<64x8xf32>
    %45 = math.exp %44 : vector<64x8xf32>
    %cst_35 = arith.constant dense<0.000000e+00> : vector<64xf32>
    %46 = vector.multi_reduction <add>, %45, %cst_35 [1] : vector<64x8xf32> to vector<64xf32>
    %47 = vector.shape_cast %46 : vector<64xf32> to vector<64x1xf32>
    %48 = tpu.reciprocal %47 : vector<64x1xf32> -> vector<64x1xf32>
    %49 = vector.broadcast %48 : vector<64x1xf32> to vector<64x8xf32>
    %50 = arith.mulf %45, %49 : vector<64x8xf32>
    %c0_36 = arith.constant 0 : index
    %c0_37 = arith.constant 0 : index
    %51 = vector.load %arg6[%c0_36, %c0_37] : memref<8x128xf32, #tpu.memory_space<vmem>>, vector<8x128xf32>
    %cst_38 = arith.constant dense<0.000000e+00> : vector<64x128xf32>
    %52 = tpu.matmul %50, %51, %cst_38 {dimension_numbers = #tpu.dot_dimension_numbers<[1], [0], [0], [1], [0, 0, 1, 1], [], []>} : vector<64x8xf32>, vector<8x128xf32>, vector<64x128xf32> -> vector<64x128xf32>
    %c0_39 = arith.constant 0 : index
    %c0_40 = arith.constant 0 : index
    %53 = vector.load %arg11[%c0_39, %c0_40] : memref<64x128xf32, #tpu.memory_space<vmem>>, vector<64x128xf32>
    %54 = arith.mulf %52, %7 : vector<64x128xf32>
    %c1_41 = arith.constant 1 : index
    %c0_42 = arith.constant 0 : index
    %c0_43 = arith.constant 0 : index
    %55 = vector.load %arg7[%c1_41, %c0_42, %c0_43] : memref<8x128x128xf32, #tpu.memory_space<vmem>>, vector<1x128x128xf32>
    %56 = vector.shape_cast %55 : vector<1x128x128xf32> to vector<128x128xf32>
    %cst_44 = arith.constant dense<0.000000e+00> : vector<64x128xf32>
    %57 = tpu.matmul %54, %56, %cst_44 {dimension_numbers = #tpu.dot_dimension_numbers<[1], [0], [0], [1], [0, 0, 1, 1], [], []>} : vector<64x128xf32>, vector<128x128xf32>, vector<64x128xf32> -> vector<64x128xf32>
    %58 = arith.addf %53, %57 : vector<64x128xf32>
    %c0_45 = arith.constant 0 : index
    %c0_46 = arith.constant 0 : index
    %59 = vector.load %arg11[%c0_45, %c0_46] : memref<64x128xf32, #tpu.memory_space<vmem>>, vector<64x128xf32>
    tpu.vector_store %arg11[%c0_45, %c0_46], %58 {strides = array<i32>} : memref<64x128xf32, #tpu.memory_space<vmem>>, vector<64x128xf32>,
    %c2 = arith.constant 2 : index
    %c0_47 = arith.constant 0 : index
    %c0_48 = arith.constant 0 : index
    %60 = vector.load %arg4[%c2, %c0_47, %c0_48] : memref<8x128x128xf32, #tpu.memory_space<vmem>>, vector<1x128x128xf32>
    %61 = vector.shape_cast %60 : vector<1x128x128xf32> to vector<128x128xf32>
    %cst_49 = arith.constant dense<0.000000e+00> : vector<64x128xf32>
    %62 = tpu.matmul %5, %61, %cst_49 {dimension_numbers = #tpu.dot_dimension_numbers<[1], [0], [0], [1], [0, 0, 1, 1], [], []>} : vector<64x128xf32>, vector<128x128xf32>, vector<64x128xf32> -> vector<64x128xf32>
    %63 = arith.mulf %62, %6 : vector<64x128xf32>
    %c0_50 = arith.constant 0 : index
    %c0_51 = arith.constant 0 : index
    %64 = vector.load %arg5[%c0_50, %c0_51] : memref<128x8xf32, #tpu.memory_space<vmem>>, vector<128x8xf32>
    %cst_52 = arith.constant dense<0.000000e+00> : vector<64x8xf32>
    %65 = tpu.matmul %63, %64, %cst_52 {dimension_numbers = #tpu.dot_dimension_numbers<[1], [0], [0], [1], [0, 0, 1, 1], [], []>} : vector<64x128xf32>, vector<128x8xf32>, vector<64x8xf32> -> vector<64x8xf32>
    %cst_53 = arith.constant dense<0xFF800000> : vector<64xf32>
    %66 = vector.multi_reduction <maximumf>, %65, %cst_53 [1] : vector<64x8xf32> to vector<64xf32>
    %67 = vector.shape_cast %66 : vector<64xf32> to vector<64x1xf32>
    %68 = vector.broadcast %67 : vector<64x1xf32> to vector<64x8xf32>
    %69 = arith.subf %65, %68 : vector<64x8xf32>
    %70 = math.exp %69 : vector<64x8xf32>
    %cst_54 = arith.constant dense<0.000000e+00> : vector<64xf32>
    %71 = vector.multi_reduction <add>, %70, %cst_54 [1] : vector<64x8xf32> to vector<64xf32>
    %72 = vector.shape_cast %71 : vector<64xf32> to vector<64x1xf32>
    %73 = tpu.reciprocal %72 : vector<64x1xf32> -> vector<64x1xf32>
    %74 = vector.broadcast %73 : vector<64x1xf32> to vector<64x8xf32>
    %75 = arith.mulf %70, %74 : vector<64x8xf32>
    %c0_55 = arith.constant 0 : index
    %c0_56 = arith.constant 0 : index
    %76 = vector.load %arg6[%c0_55, %c0_56] : memref<8x128xf32, #tpu.memory_space<vmem>>, vector<8x128xf32>
    %cst_57 = arith.constant dense<0.000000e+00> : vector<64x128xf32>
    %77 = tpu.matmul %75, %76, %cst_57 {dimension_numbers = #tpu.dot_dimension_numbers<[1], [0], [0], [1], [0, 0, 1, 1], [], []>} : vector<64x8xf32>, vector<8x128xf32>, vector<64x128xf32> -> vector<64x128xf32>
    %c0_58 = arith.constant 0 : index
    %c0_59 = arith.constant 0 : index
    %78 = vector.load %arg11[%c0_58, %c0_59] : memref<64x128xf32, #tpu.memory_space<vmem>>, vector<64x128xf32>
    %79 = arith.mulf %77, %7 : vector<64x128xf32>
    %c2_60 = arith.constant 2 : index
    %c0_61 = arith.constant 0 : index
    %c0_62 = arith.constant 0 : index
    %80 = vector.load %arg7[%c2_60, %c0_61, %c0_62] : memref<8x128x128xf32, #tpu.memory_space<vmem>>, vector<1x128x128xf32>
    %81 = vector.shape_cast %80 : vector<1x128x128xf32> to vector<128x128xf32>
    %cst_63 = arith.constant dense<0.000000e+00> : vector<64x128xf32>
    %82 = tpu.matmul %79, %81, %cst_63 {dimension_numbers = #tpu.dot_dimension_numbers<[1], [0], [0], [1], [0, 0, 1, 1], [], []>} : vector<64x128xf32>, vector<128x128xf32>, vector<64x128xf32> -> vector<64x128xf32>
    %83 = arith.addf %78, %82 : vector<64x128xf32>
    %c0_64 = arith.constant 0 : index
    %c0_65 = arith.constant 0 : index
    %84 = vector.load %arg11[%c0_64, %c0_65] : memref<64x128xf32, #tpu.memory_space<vmem>>, vector<64x128xf32>
    tpu.vector_store %arg11[%c0_64, %c0_65], %83 {strides = array<i32>} : memref<64x128xf32, #tpu.memory_space<vmem>>, vector<64x128xf32>,
    %c3 = arith.constant 3 : index
    %c0_66 = arith.constant 0 : index
    %c0_67 = arith.constant 0 : index
    %85 = vector.load %arg4[%c3, %c0_66, %c0_67] : memref<8x128x128xf32, #tpu.memory_space<vmem>>, vector<1x128x128xf32>
    %86 = vector.shape_cast %85 : vector<1x128x128xf32> to vector<128x128xf32>
    %cst_68 = arith.constant dense<0.000000e+00> : vector<64x128xf32>
    %87 = tpu.matmul %5, %86, %cst_68 {dimension_numbers = #tpu.dot_dimension_numbers<[1], [0], [0], [1], [0, 0, 1, 1], [], []>} : vector<64x128xf32>, vector<128x128xf32>, vector<64x128xf32> -> vector<64x128xf32>
    %88 = arith.mulf %87, %6 : vector<64x128xf32>
    %c0_69 = arith.constant 0 : index
    %c0_70 = arith.constant 0 : index
    %89 = vector.load %arg5[%c0_69, %c0_70] : memref<128x8xf32, #tpu.memory_space<vmem>>, vector<128x8xf32>
    %cst_71 = arith.constant dense<0.000000e+00> : vector<64x8xf32>
    %90 = tpu.matmul %88, %89, %cst_71 {dimension_numbers = #tpu.dot_dimension_numbers<[1], [0], [0], [1], [0, 0, 1, 1], [], []>} : vector<64x128xf32>, vector<128x8xf32>, vector<64x8xf32> -> vector<64x8xf32>
    %cst_72 = arith.constant dense<0xFF800000> : vector<64xf32>
    %91 = vector.multi_reduction <maximumf>, %90, %cst_72 [1] : vector<64x8xf32> to vector<64xf32>
    %92 = vector.shape_cast %91 : vector<64xf32> to vector<64x1xf32>
    %93 = vector.broadcast %92 : vector<64x1xf32> to vector<64x8xf32>
    %94 = arith.subf %90, %93 : vector<64x8xf32>
    %95 = math.exp %94 : vector<64x8xf32>
    %cst_73 = arith.constant dense<0.000000e+00> : vector<64xf32>
    %96 = vector.multi_reduction <add>, %95, %cst_73 [1] : vector<64x8xf32> to vector<64xf32>
    %97 = vector.shape_cast %96 : vector<64xf32> to vector<64x1xf32>
    %98 = tpu.reciprocal %97 : vector<64x1xf32> -> vector<64x1xf32>
    %99 = vector.broadcast %98 : vector<64x1xf32> to vector<64x8xf32>
    %100 = arith.mulf %95, %99 : vector<64x8xf32>
    %c0_74 = arith.constant 0 : index
    %c0_75 = arith.constant 0 : index
    %101 = vector.load %arg6[%c0_74, %c0_75] : memref<8x128xf32, #tpu.memory_space<vmem>>, vector<8x128xf32>
    %cst_76 = arith.constant dense<0.000000e+00> : vector<64x128xf32>
    %102 = tpu.matmul %100, %101, %cst_76 {dimension_numbers = #tpu.dot_dimension_numbers<[1], [0], [0], [1], [0, 0, 1, 1], [], []>} : vector<64x8xf32>, vector<8x128xf32>, vector<64x128xf32> -> vector<64x128xf32>
    %c0_77 = arith.constant 0 : index
    %c0_78 = arith.constant 0 : index
    %103 = vector.load %arg11[%c0_77, %c0_78] : memref<64x128xf32, #tpu.memory_space<vmem>>, vector<64x128xf32>
    %104 = arith.mulf %102, %7 : vector<64x128xf32>
    %c3_79 = arith.constant 3 : index
    %c0_80 = arith.constant 0 : index
    %c0_81 = arith.constant 0 : index
    %105 = vector.load %arg7[%c3_79, %c0_80, %c0_81] : memref<8x128x128xf32, #tpu.memory_space<vmem>>, vector<1x128x128xf32>
    %106 = vector.shape_cast %105 : vector<1x128x128xf32> to vector<128x128xf32>
    %cst_82 = arith.constant dense<0.000000e+00> : vector<64x128xf32>
    %107 = tpu.matmul %104, %106, %cst_82 {dimension_numbers = #tpu.dot_dimension_numbers<[1], [0], [0], [1], [0, 0, 1, 1], [], []>} : vector<64x128xf32>, vector<128x128xf32>, vector<64x128xf32> -> vector<64x128xf32>
    %108 = arith.addf %103, %107 : vector<64x128xf32>
    %c0_83 = arith.constant 0 : index
    %c0_84 = arith.constant 0 : index
    %109 = vector.load %arg11[%c0_83, %c0_84] : memref<64x128xf32, #tpu.memory_space<vmem>>, vector<64x128xf32>
    tpu.vector_store %arg11[%c0_83, %c0_84], %108 {strides = array<i32>} : memref<64x128xf32, #tpu.memory_space<vmem>>, vector<64x128xf32>,
    %c4 = arith.constant 4 : index
    %c0_85 = arith.constant 0 : index
    %c0_86 = arith.constant 0 : index
    %110 = vector.load %arg4[%c4, %c0_85, %c0_86] : memref<8x128x128xf32, #tpu.memory_space<vmem>>, vector<1x128x128xf32>
    %111 = vector.shape_cast %110 : vector<1x128x128xf32> to vector<128x128xf32>
    %cst_87 = arith.constant dense<0.000000e+00> : vector<64x128xf32>
    %112 = tpu.matmul %5, %111, %cst_87 {dimension_numbers = #tpu.dot_dimension_numbers<[1], [0], [0], [1], [0, 0, 1, 1], [], []>} : vector<64x128xf32>, vector<128x128xf32>, vector<64x128xf32> -> vector<64x128xf32>
    %113 = arith.mulf %112, %6 : vector<64x128xf32>
    %c0_88 = arith.constant 0 : index
    %c0_89 = arith.constant 0 : index
    %114 = vector.load %arg5[%c0_88, %c0_89] : memref<128x8xf32, #tpu.memory_space<vmem>>, vector<128x8xf32>
    %cst_90 = arith.constant dense<0.000000e+00> : vector<64x8xf32>
    %115 = tpu.matmul %113, %114, %cst_90 {dimension_numbers = #tpu.dot_dimension_numbers<[1], [0], [0], [1], [0, 0, 1, 1], [], []>} : vector<64x128xf32>, vector<128x8xf32>, vector<64x8xf32> -> vector<64x8xf32>
    %cst_91 = arith.constant dense<0xFF800000> : vector<64xf32>
    %116 = vector.multi_reduction <maximumf>, %115, %cst_91 [1] : vector<64x8xf32> to vector<64xf32>
    %117 = vector.shape_cast %116 : vector<64xf32> to vector<64x1xf32>
    %118 = vector.broadcast %117 : vector<64x1xf32> to vector<64x8xf32>
    %119 = arith.subf %115, %118 : vector<64x8xf32>
    %120 = math.exp %119 : vector<64x8xf32>
    %cst_92 = arith.constant dense<0.000000e+00> : vector<64xf32>
    %121 = vector.multi_reduction <add>, %120, %cst_92 [1] : vector<64x8xf32> to vector<64xf32>
    %122 = vector.shape_cast %121 : vector<64xf32> to vector<64x1xf32>
    %123 = tpu.reciprocal %122 : vector<64x1xf32> -> vector<64x1xf32>
    %124 = vector.broadcast %123 : vector<64x1xf32> to vector<64x8xf32>
    %125 = arith.mulf %120, %124 : vector<64x8xf32>
    %c0_93 = arith.constant 0 : index
    %c0_94 = arith.constant 0 : index
    %126 = vector.load %arg6[%c0_93, %c0_94] : memref<8x128xf32, #tpu.memory_space<vmem>>, vector<8x128xf32>
    %cst_95 = arith.constant dense<0.000000e+00> : vector<64x128xf32>
    %127 = tpu.matmul %125, %126, %cst_95 {dimension_numbers = #tpu.dot_dimension_numbers<[1], [0], [0], [1], [0, 0, 1, 1], [], []>} : vector<64x8xf32>, vector<8x128xf32>, vector<64x128xf32> -> vector<64x128xf32>
    %c0_96 = arith.constant 0 : index
    %c0_97 = arith.constant 0 : index
    %128 = vector.load %arg11[%c0_96, %c0_97] : memref<64x128xf32, #tpu.memory_space<vmem>>, vector<64x128xf32>
    %129 = arith.mulf %127, %7 : vector<64x128xf32>
    %c4_98 = arith.constant 4 : index
    %c0_99 = arith.constant 0 : index
    %c0_100 = arith.constant 0 : index
    %130 = vector.load %arg7[%c4_98, %c0_99, %c0_100] : memref<8x128x128xf32, #tpu.memory_space<vmem>>, vector<1x128x128xf32>
    %131 = vector.shape_cast %130 : vector<1x128x128xf32> to vector<128x128xf32>
    %cst_101 = arith.constant dense<0.000000e+00> : vector<64x128xf32>
    %132 = tpu.matmul %129, %131, %cst_101 {dimension_numbers = #tpu.dot_dimension_numbers<[1], [0], [0], [1], [0, 0, 1, 1], [], []>} : vector<64x128xf32>, vector<128x128xf32>, vector<64x128xf32> -> vector<64x128xf32>
    %133 = arith.addf %128, %132 : vector<64x128xf32>
    %c0_102 = arith.constant 0 : index
    %c0_103 = arith.constant 0 : index
    %134 = vector.load %arg11[%c0_102, %c0_103] : memref<64x128xf32, #tpu.memory_space<vmem>>, vector<64x128xf32>
    tpu.vector_store %arg11[%c0_102, %c0_103], %133 {strides = array<i32>} : memref<64x128xf32, #tpu.memory_space<vmem>>, vector<64x128xf32>,
    %c5 = arith.constant 5 : index
    %c0_104 = arith.constant 0 : index
    %c0_105 = arith.constant 0 : index
    %135 = vector.load %arg4[%c5, %c0_104, %c0_105] : memref<8x128x128xf32, #tpu.memory_space<vmem>>, vector<1x128x128xf32>
    %136 = vector.shape_cast %135 : vector<1x128x128xf32> to vector<128x128xf32>
    %cst_106 = arith.constant dense<0.000000e+00> : vector<64x128xf32>
    %137 = tpu.matmul %5, %136, %cst_106 {dimension_numbers = #tpu.dot_dimension_numbers<[1], [0], [0], [1], [0, 0, 1, 1], [], []>} : vector<64x128xf32>, vector<128x128xf32>, vector<64x128xf32> -> vector<64x128xf32>
    %138 = arith.mulf %137, %6 : vector<64x128xf32>
    %c0_107 = arith.constant 0 : index
    %c0_108 = arith.constant 0 : index
    %139 = vector.load %arg5[%c0_107, %c0_108] : memref<128x8xf32, #tpu.memory_space<vmem>>, vector<128x8xf32>
    %cst_109 = arith.constant dense<0.000000e+00> : vector<64x8xf32>
    %140 = tpu.matmul %138, %139, %cst_109 {dimension_numbers = #tpu.dot_dimension_numbers<[1], [0], [0], [1], [0, 0, 1, 1], [], []>} : vector<64x128xf32>, vector<128x8xf32>, vector<64x8xf32> -> vector<64x8xf32>
    %cst_110 = arith.constant dense<0xFF800000> : vector<64xf32>
    %141 = vector.multi_reduction <maximumf>, %140, %cst_110 [1] : vector<64x8xf32> to vector<64xf32>
    %142 = vector.shape_cast %141 : vector<64xf32> to vector<64x1xf32>
    %143 = vector.broadcast %142 : vector<64x1xf32> to vector<64x8xf32>
    %144 = arith.subf %140, %143 : vector<64x8xf32>
    %145 = math.exp %144 : vector<64x8xf32>
    %cst_111 = arith.constant dense<0.000000e+00> : vector<64xf32>
    %146 = vector.multi_reduction <add>, %145, %cst_111 [1] : vector<64x8xf32> to vector<64xf32>
    %147 = vector.shape_cast %146 : vector<64xf32> to vector<64x1xf32>
    %148 = tpu.reciprocal %147 : vector<64x1xf32> -> vector<64x1xf32>
    %149 = vector.broadcast %148 : vector<64x1xf32> to vector<64x8xf32>
    %150 = arith.mulf %145, %149 : vector<64x8xf32>
    %c0_112 = arith.constant 0 : index
    %c0_113 = arith.constant 0 : index
    %151 = vector.load %arg6[%c0_112, %c0_113] : memref<8x128xf32, #tpu.memory_space<vmem>>, vector<8x128xf32>
    %cst_114 = arith.constant dense<0.000000e+00> : vector<64x128xf32>
    %152 = tpu.matmul %150, %151, %cst_114 {dimension_numbers = #tpu.dot_dimension_numbers<[1], [0], [0], [1], [0, 0, 1, 1], [], []>} : vector<64x8xf32>, vector<8x128xf32>, vector<64x128xf32> -> vector<64x128xf32>
    %c0_115 = arith.constant 0 : index
    %c0_116 = arith.constant 0 : index
    %153 = vector.load %arg11[%c0_115, %c0_116] : memref<64x128xf32, #tpu.memory_space<vmem>>, vector<64x128xf32>
    %154 = arith.mulf %152, %7 : vector<64x128xf32>
    %c5_117 = arith.constant 5 : index
    %c0_118 = arith.constant 0 : index
    %c0_119 = arith.constant 0 : index
    %155 = vector.load %arg7[%c5_117, %c0_118, %c0_119] : memref<8x128x128xf32, #tpu.memory_space<vmem>>, vector<1x128x128xf32>
    %156 = vector.shape_cast %155 : vector<1x128x128xf32> to vector<128x128xf32>
    %cst_120 = arith.constant dense<0.000000e+00> : vector<64x128xf32>
    %157 = tpu.matmul %154, %156, %cst_120 {dimension_numbers = #tpu.dot_dimension_numbers<[1], [0], [0], [1], [0, 0, 1, 1], [], []>} : vector<64x128xf32>, vector<128x128xf32>, vector<64x128xf32> -> vector<64x128xf32>
    %158 = arith.addf %153, %157 : vector<64x128xf32>
    %c0_121 = arith.constant 0 : index
    %c0_122 = arith.constant 0 : index
    %159 = vector.load %arg11[%c0_121, %c0_122] : memref<64x128xf32, #tpu.memory_space<vmem>>, vector<64x128xf32>
    tpu.vector_store %arg11[%c0_121, %c0_122], %158 {strides = array<i32>} : memref<64x128xf32, #tpu.memory_space<vmem>>, vector<64x128xf32>,
    %c6 = arith.constant 6 : index
    %c0_123 = arith.constant 0 : index
    %c0_124 = arith.constant 0 : index
    %160 = vector.load %arg4[%c6, %c0_123, %c0_124] : memref<8x128x128xf32, #tpu.memory_space<vmem>>, vector<1x128x128xf32>
    %161 = vector.shape_cast %160 : vector<1x128x128xf32> to vector<128x128xf32>
    %cst_125 = arith.constant dense<0.000000e+00> : vector<64x128xf32>
    %162 = tpu.matmul %5, %161, %cst_125 {dimension_numbers = #tpu.dot_dimension_numbers<[1], [0], [0], [1], [0, 0, 1, 1], [], []>} : vector<64x128xf32>, vector<128x128xf32>, vector<64x128xf32> -> vector<64x128xf32>
    %163 = arith.mulf %162, %6 : vector<64x128xf32>
    %c0_126 = arith.constant 0 : index
    %c0_127 = arith.constant 0 : index
    %164 = vector.load %arg5[%c0_126, %c0_127] : memref<128x8xf32, #tpu.memory_space<vmem>>, vector<128x8xf32>
    %cst_128 = arith.constant dense<0.000000e+00> : vector<64x8xf32>
    %165 = tpu.matmul %163, %164, %cst_128 {dimension_numbers = #tpu.dot_dimension_numbers<[1], [0], [0], [1], [0, 0, 1, 1], [], []>} : vector<64x128xf32>, vector<128x8xf32>, vector<64x8xf32> -> vector<64x8xf32>
    %cst_129 = arith.constant dense<0xFF800000> : vector<64xf32>
    %166 = vector.multi_reduction <maximumf>, %165, %cst_129 [1] : vector<64x8xf32> to vector<64xf32>
    %167 = vector.shape_cast %166 : vector<64xf32> to vector<64x1xf32>
    %168 = vector.broadcast %167 : vector<64x1xf32> to vector<64x8xf32>
    %169 = arith.subf %165, %168 : vector<64x8xf32>
    %170 = math.exp %169 : vector<64x8xf32>
    %cst_130 = arith.constant dense<0.000000e+00> : vector<64xf32>
    %171 = vector.multi_reduction <add>, %170, %cst_130 [1] : vector<64x8xf32> to vector<64xf32>
    %172 = vector.shape_cast %171 : vector<64xf32> to vector<64x1xf32>
    %173 = tpu.reciprocal %172 : vector<64x1xf32> -> vector<64x1xf32>
    %174 = vector.broadcast %173 : vector<64x1xf32> to vector<64x8xf32>
    %175 = arith.mulf %170, %174 : vector<64x8xf32>
    %c0_131 = arith.constant 0 : index
    %c0_132 = arith.constant 0 : index
    %176 = vector.load %arg6[%c0_131, %c0_132] : memref<8x128xf32, #tpu.memory_space<vmem>>, vector<8x128xf32>
    %cst_133 = arith.constant dense<0.000000e+00> : vector<64x128xf32>
    %177 = tpu.matmul %175, %176, %cst_133 {dimension_numbers = #tpu.dot_dimension_numbers<[1], [0], [0], [1], [0, 0, 1, 1], [], []>} : vector<64x8xf32>, vector<8x128xf32>, vector<64x128xf32> -> vector<64x128xf32>
    %c0_134 = arith.constant 0 : index
    %c0_135 = arith.constant 0 : index
    %178 = vector.load %arg11[%c0_134, %c0_135] : memref<64x128xf32, #tpu.memory_space<vmem>>, vector<64x128xf32>
    %179 = arith.mulf %177, %7 : vector<64x128xf32>
    %c6_136 = arith.constant 6 : index
    %c0_137 = arith.constant 0 : index
    %c0_138 = arith.constant 0 : index
    %180 = vector.load %arg7[%c6_136, %c0_137, %c0_138] : memref<8x128x128xf32, #tpu.memory_space<vmem>>, vector<1x128x128xf32>
    %181 = vector.shape_cast %180 : vector<1x128x128xf32> to vector<128x128xf32>
    %cst_139 = arith.constant dense<0.000000e+00> : vector<64x128xf32>
    %182 = tpu.matmul %179, %181, %cst_139 {dimension_numbers = #tpu.dot_dimension_numbers<[1], [0], [0], [1], [0, 0, 1, 1], [], []>} : vector<64x128xf32>, vector<128x128xf32>, vector<64x128xf32> -> vector<64x128xf32>
    %183 = arith.addf %178, %182 : vector<64x128xf32>
    %c0_140 = arith.constant 0 : index
    %c0_141 = arith.constant 0 : index
    %184 = vector.load %arg11[%c0_140, %c0_141] : memref<64x128xf32, #tpu.memory_space<vmem>>, vector<64x128xf32>
    tpu.vector_store %arg11[%c0_140, %c0_141], %183 {strides = array<i32>} : memref<64x128xf32, #tpu.memory_space<vmem>>, vector<64x128xf32>,
    %c7 = arith.constant 7 : index
    %c0_142 = arith.constant 0 : index
    %c0_143 = arith.constant 0 : index
    %185 = vector.load %arg4[%c7, %c0_142, %c0_143] : memref<8x128x128xf32, #tpu.memory_space<vmem>>, vector<1x128x128xf32>
    %186 = vector.shape_cast %185 : vector<1x128x128xf32> to vector<128x128xf32>
    %cst_144 = arith.constant dense<0.000000e+00> : vector<64x128xf32>
    %187 = tpu.matmul %5, %186, %cst_144 {dimension_numbers = #tpu.dot_dimension_numbers<[1], [0], [0], [1], [0, 0, 1, 1], [], []>} : vector<64x128xf32>, vector<128x128xf32>, vector<64x128xf32> -> vector<64x128xf32>
    %188 = arith.mulf %187, %6 : vector<64x128xf32>
    %c0_145 = arith.constant 0 : index
    %c0_146 = arith.constant 0 : index
    %189 = vector.load %arg5[%c0_145, %c0_146] : memref<128x8xf32, #tpu.memory_space<vmem>>, vector<128x8xf32>
    %cst_147 = arith.constant dense<0.000000e+00> : vector<64x8xf32>
    %190 = tpu.matmul %188, %189, %cst_147 {dimension_numbers = #tpu.dot_dimension_numbers<[1], [0], [0], [1], [0, 0, 1, 1], [], []>} : vector<64x128xf32>, vector<128x8xf32>, vector<64x8xf32> -> vector<64x8xf32>
    %cst_148 = arith.constant dense<0xFF800000> : vector<64xf32>
    %191 = vector.multi_reduction <maximumf>, %190, %cst_148 [1] : vector<64x8xf32> to vector<64xf32>
    %192 = vector.shape_cast %191 : vector<64xf32> to vector<64x1xf32>
    %193 = vector.broadcast %192 : vector<64x1xf32> to vector<64x8xf32>
    %194 = arith.subf %190, %193 : vector<64x8xf32>
    %195 = math.exp %194 : vector<64x8xf32>
    %cst_149 = arith.constant dense<0.000000e+00> : vector<64xf32>
    %196 = vector.multi_reduction <add>, %195, %cst_149 [1] : vector<64x8xf32> to vector<64xf32>
    %197 = vector.shape_cast %196 : vector<64xf32> to vector<64x1xf32>
    %198 = tpu.reciprocal %197 : vector<64x1xf32> -> vector<64x1xf32>
    %199 = vector.broadcast %198 : vector<64x1xf32> to vector<64x8xf32>
    %200 = arith.mulf %195, %199 : vector<64x8xf32>
    %c0_150 = arith.constant 0 : index
    %c0_151 = arith.constant 0 : index
    %201 = vector.load %arg6[%c0_150, %c0_151] : memref<8x128xf32, #tpu.memory_space<vmem>>, vector<8x128xf32>
    %cst_152 = arith.constant dense<0.000000e+00> : vector<64x128xf32>
    %202 = tpu.matmul %200, %201, %cst_152 {dimension_numbers = #tpu.dot_dimension_numbers<[1], [0], [0], [1], [0, 0, 1, 1], [], []>} : vector<64x8xf32>, vector<8x128xf32>, vector<64x128xf32> -> vector<64x128xf32>
    %c0_153 = arith.constant 0 : index
    %c0_154 = arith.constant 0 : index
    %203 = vector.load %arg11[%c0_153, %c0_154] : memref<64x128xf32, #tpu.memory_space<vmem>>, vector<64x128xf32>
    %204 = arith.mulf %202, %7 : vector<64x128xf32>
    %c7_155 = arith.constant 7 : index
    %c0_156 = arith.constant 0 : index
    %c0_157 = arith.constant 0 : index
    %205 = vector.load %arg7[%c7_155, %c0_156, %c0_157] : memref<8x128x128xf32, #tpu.memory_space<vmem>>, vector<1x128x128xf32>
    %206 = vector.shape_cast %205 : vector<1x128x128xf32> to vector<128x128xf32>
    %cst_158 = arith.constant dense<0.000000e+00> : vector<64x128xf32>
    %207 = tpu.matmul %204, %206, %cst_158 {dimension_numbers = #tpu.dot_dimension_numbers<[1], [0], [0], [1], [0, 0, 1, 1], [], []>} : vector<64x128xf32>, vector<128x128xf32>, vector<64x128xf32> -> vector<64x128xf32>
    %208 = arith.addf %203, %207 : vector<64x128xf32>
    %c0_159 = arith.constant 0 : index
    %c0_160 = arith.constant 0 : index
    %209 = vector.load %arg11[%c0_159, %c0_160] : memref<64x128xf32, #tpu.memory_space<vmem>>, vector<64x128xf32>
    tpu.vector_store %arg11[%c0_159, %c0_160], %208 {strides = array<i32>} : memref<64x128xf32, #tpu.memory_space<vmem>>, vector<64x128xf32>,
    %c0_161 = arith.constant 0 : index
    %c0_162 = arith.constant 0 : index
    %210 = vector.load %arg8[%c0_161, %c0_162] : memref<8x64xf32, #tpu.memory_space<vmem>>, vector<8x64xf32>
    %c0_163 = arith.constant 0 : index
    %c0_164 = arith.constant 0 : index
    %211 = vector.load %arg11[%c0_163, %c0_164] : memref<64x128xf32, #tpu.memory_space<vmem>>, vector<64x128xf32>
    %cst_165 = arith.constant dense<0.000000e+00> : vector<8x128xf32>
    %212 = tpu.matmul %210, %211, %cst_165 {dimension_numbers = #tpu.dot_dimension_numbers<[1], [0], [0], [1], [0, 0, 1, 1], [], []>} : vector<8x64xf32>, vector<64x128xf32>, vector<8x128xf32> -> vector<8x128xf32>
    %c0_166 = arith.constant 0 : index
    %c0_167 = arith.constant 0 : index
    %213 = vector.load %arg9[%c0_166, %c0_167] : memref<1x128xf32, #tpu.memory_space<vmem>>, vector<1x128xf32>
    %214 = vector.broadcast %213 : vector<1x128xf32> to vector<8x128xf32>
    %215 = arith.addf %212, %214 : vector<8x128xf32>
    %c0_168 = arith.constant 0 : index
    %c0_169 = arith.constant 0 : index
    %216 = vector.load %arg10[%c0_168, %c0_169] : memref<8x128xf32, #tpu.memory_space<vmem>>, vector<8x128xf32>
    tpu.vector_store %arg10[%c0_168, %c0_169], %215 {strides = array<i32>} : memref<8x128xf32, #tpu.memory_space<vmem>>, vector<8x128xf32>,
    return
  }
  func.func @transform_0(%arg0: i32) -> (i32, i32) {
    %c0_i32 = arith.constant 0 : i32
    %c0_i32_0 = arith.constant 0 : i32
    return %arg0, %c0_i32 : i32, i32
  }
  func.func @transform_1(%arg0: i32) -> (i32, i32) {
    %c0_i32 = arith.constant 0 : i32
    %c0_i32_0 = arith.constant 0 : i32
    %c0_i32_1 = arith.constant 0 : i32
    return %c0_i32, %c0_i32_0 : i32, i32
  }
  func.func @transform_2(%arg0: i32) -> (i32, i32) {
    %c0_i32 = arith.constant 0 : i32
    %c0_i32_0 = arith.constant 0 : i32
    %c0_i32_1 = arith.constant 0 : i32
    return %c0_i32, %c0_i32_0 : i32, i32
  }
  func.func @transform_3(%arg0: i32) -> (i32, i32, i32) {
    %c0_i32 = arith.constant 0 : i32
    %c0_i32_0 = arith.constant 0 : i32
    %c0_i32_1 = arith.constant 0 : i32
    %c0_i32_2 = arith.constant 0 : i32
    return %c0_i32, %c0_i32_0, %c0_i32_1 : i32, i32, i32
  }
  func.func @transform_4(%arg0: i32) -> (i32, i32) {
    %c0_i32 = arith.constant 0 : i32
    %c0_i32_0 = arith.constant 0 : i32
    %c0_i32_1 = arith.constant 0 : i32
    return %c0_i32, %c0_i32_0 : i32, i32
  }
  func.func @transform_5(%arg0: i32) -> (i32, i32) {
    %c0_i32 = arith.constant 0 : i32
    %c0_i32_0 = arith.constant 0 : i32
    %c0_i32_1 = arith.constant 0 : i32
    return %c0_i32, %c0_i32_0 : i32, i32
  }
  func.func @transform_6(%arg0: i32) -> (i32, i32, i32) {
    %c0_i32 = arith.constant 0 : i32
    %c0_i32_0 = arith.constant 0 : i32
    %c0_i32_1 = arith.constant 0 : i32
    %c0_i32_2 = arith.constant 0 : i32
    return %c0_i32, %c0_i32_0, %c0_i32_1 : i32, i32, i32
  }
  func.func @transform_7(%arg0: i32) -> (i32, i32) {
    %c0_i32 = arith.constant 0 : i32
    %c0_i32_0 = arith.constant 0 : i32
    %c0_i32_1 = arith.constant 0 : i32
    return %c0_i32, %c0_i32_0 : i32, i32
  }
  func.func @transform_8(%arg0: i32) -> (i32, i32) {
    %c0_i32 = arith.constant 0 : i32
    %c0_i32_0 = arith.constant 0 : i32
    %c0_i32_1 = arith.constant 0 : i32
    return %c0_i32, %c0_i32_0 : i32, i32
  }
  func.func @transform_9(%arg0: i32) -> (i32, i32) {
    %c0_i32 = arith.constant 0 : i32
    %c0_i32_0 = arith.constant 0 : i32
    return %arg0, %c0_i32 : i32, i32
  }
}

</mosaic_0001>

<bundles_post_ra>
// kernel: tpu_custom_call.1
= control target key start
LH: loop header
LB: loop body
LE: loop exit
PB: predicated region body
PF: predicated region fallthrough
CT: control target
= control target key end

     0   :  { %14 = vsyncpa [#allocation4], 0  ;;  %s10615_s0 = inlined_call_operand.vmem [shape: f32[128,32], index: 0, kind: input, shape index: {}]   ;;  %s10616_s1 = inlined_call_operand.vmem [shape: f32[64,384], index: 1, kind: input, shape index: {}]   ;;  %s10617_s2 = inlined_call_operand.vmem [shape: f32[32,384], index: 2, kind: input, shape index: {}]   ;;  %s10618_s3 = inlined_call_operand.hbm [shape: f32[8,128,128], index: 3, kind: input, shape index: {}]   ;;  %s10619_s4 = inlined_call_operand.vmem [shape: f32[128,8], index: 4, kind: input, shape index: {}]   ;;  %s10620_s5 = inlined_call_operand.vmem [shape: f32[8,128], index: 5, kind: input, shape index: {}]   ;;  %s10621_s6 = inlined_call_operand.hbm [shape: f32[8,128,128], index: 6, kind: input, shape index: {}]   ;;  %s10622_s7 = inlined_call_operand.vmem [shape: f32[8,64], index: 7, kind: input, shape index: {}]   ;;  %s10623_s8 = inlined_call_operand.vmem [shape: f32[1,128], index: 8, kind: input, shape index: {}]   ;;  %s10624_s9 = inlined_call_operand.hbm [shape: f32[16,128], index: 9, kind: output, shape index: {}]  }
   0x1   :  { %15 = vsyncpa [#allocation7], 0 }
   0x2   :  { %16 = vsyncpa [#allocation5], 0 }
   0x3   :  { %18 = vsyncpa [#allocation5 + $0x1], 0  ;;  %s9159_s30 = smov 0   ;;  %s9161_s10 = smov 0  }
   0x4   :  { %s9163_s11 = smov 0   ;;  %s9165_s12 = smov 0  }
   0x5 LB: > { %10636 = sst [smem:[#allocation12_spill]] %s9095_s11  ;;  %s9180_s13 = sadd.s32 4294967295, %s9099_s12   ;;  %s9099_s12 = sphi %s9165_s12, %s10655_s12   ;;  %s9095_s11 = sphi %s9163_s11, %s10660_s11   ;;  %s9091_s10 = sphi %s9161_s10, %s10659_s10   ;;  %s9087_s30 = sphi %s9159_s30, %s10658_s30  }
   0x6   : > { %s5827_s14 = sadd.s32 4294967294, %s9099_s12   ;;  %s9184_s15 = sadd.s32 1, %s9099_s12  }
   0x7   : > { %10637 = sst [smem:[#allocation13_spill]] %s9184_s15  ;;  %s225_s16 = sadd.s32 1, %s9095_s11 }
   0x8   : > { %s222_s17 = ssub.s32 %s9099_s12, %s9184_s15  ;;  %p235_p0 = scmp.ne.s32.totalorder %s9095_s11, %s9091_s10 }
   0x9   : > { %p223_p1 = scmp.eq.s32.totalorder %s222_s17, 0  ;;  %p236_p2 = scmp.eq.s32.totalorder %s9180_s13, 1 }
   0xa   : > { %p241_p3 = scmp.ne.s32.totalorder %s9091_s10, %s9087_s30  ;;  %p242_p4 = scmp.eq.s32.totalorder %s5827_s14, 1 }
   0xb   : > { %s9195_s18 = scalar_select %p223_p1, %s9095_s11, %s225_s16  }
   0xc   : > { %p9197_p5 = por %p236_p2, %p235_p0  ;;  %p9201_p6 = por %p242_p4, %p241_p3 }
   0xd   : > { %10638 = sst [smem:[#allocation14_spill]] %s9195_s18  ;;  %p5828_p7 = scmp.ge.s32.totalorder %s9099_s12, 1 }
   0xe   : > { %s10639_s19 = scalar_select %p9197_p5, 1, 0 }
   0xf   : > { %s10640_s20 = scalar_select %p9201_p6, 1, 0 }
  0x10   : > { %p249_p8 = scmp.lt.s32.totalorder %s9099_s12, 3  ;;  %p10625_p9 = scmp.eq.s32.totalorder %s9180_s13, 0 }
  0x11   : > { %s9101_s22 = smov [#allocation3]   ;;  %s9102_s25 = smov [#allocation6]  }
  0x12   : > { %p9208_p10 = pnand %p5828_p7, %p249_p8  ;;  %s267_s23 = sshll.u32 %s9101_s22, 4  ;;  %s268_s23 = int_to_ptr.vmem [resolvable:$true] %s267_s23 }
  0x13   : > { %s286_s26 = sshll.u32 %s9102_s25, 4  ;;  %s8973_s29 = scalar_lea.hbm %s10618_s3, 16384  ;;  %s9220_s26 = int_to_ptr.vmem [resolvable:$true] %s286_s26 }
  0x14   : > { %s10641_s21 = scalar_select %p9208_p10, 1, 0 }
  0x15   : > { %p8662_p11 = pneg %p9208_p10  ;;  %p8974_p13 = scmp.ne.s32.totalorder %s10618_s3, %s8973_s29 }
  0x16   : > { %p8980_p3 = scmp.lt.u32.totalorder %s8973_s29, %s10618_s3 }
  0x17   : > { %p9216_p12 = pnand %p10625_p9, %p8662_p11 }
  0x19   : > { %p8975_p0 = pneg %p9216_p12 }
  0x1b   : > { %p8976_p1 = pnand %p8975_p0, %p8974_p13 }
  0x1d   : > { %p8977_p2 = pneg %p8976_p1 }
  0x1f   : > { %p8982_p4 = pnand %p8980_p3, %p8977_p2 }
  0x21   : > { %8985 = shalt.err (!%p8982_p4)
}
  0x22   : > { %s8986_s25 = scalar_lea.vmem %s268_s23, 16384  ;;  %p8994_p9 = scmp.lt.s32.totalorder %s268_s23, %s268_s23 }
  0x23   : > { %p8987_p7 = scmp.ne.s32.totalorder %s268_s23, %s8986_s25  ;;  %p8995_p6 = scmp.lt.s32.totalorder %s8986_s25, %s8986_s25 }
  0x25   : > { %p8989_p8 = pnand %p8987_p7, %p8975_p0  ;;  %p8996_p5 = por %p8995_p6, %p8994_p9 }
  0x27   : > { %p8990_p11 = pneg %p8989_p8 }
  0x29   : > { %p8997_p10 = pnand %p8996_p5, %p8990_p11 }
  0x2b   : > { %9000 = shalt.err (!%p8997_p10)
}
  0x2c   : > { %s9103_s27 = smov 128   ;;  %s9104_s28 = smov 8  }
  0x2d   : > { %8665 = dma.hbm_to_vmem [thread:$0]  (!%p9216_p12), %s10618_s3, 16384, %s268_s23, [#allocation4], %s9103_s27, %s9103_s27, %s9104_s28  }
  0x2e   : > { %s9001_s22 = scalar_lea.hbm %s10621_s6, 16384 }
  0x2f   : > { %p9002_p13 = scmp.ne.s32.totalorder %s10621_s6, %s9001_s22  ;;  %p9008_p9 = scmp.lt.u32.totalorder %s9001_s22, %s10621_s6 }
  0x31   : > { %p9004_p5 = pnand %p9002_p13, %p8975_p0 }
  0x33   : > { %p9005_p6 = pneg %p9004_p5 }
  0x35   : > { %p9010_p10 = pnand %p9008_p9, %p9005_p6 }
  0x37   : > { %9013 = shalt.err (!%p9010_p10)
}
  0x38   : > { %s9014_s23 = scalar_lea.vmem %s9220_s26, 16384  ;;  %p9022_p4 = scmp.lt.s32.totalorder %s9220_s26, %s9220_s26 }
  0x39   : > { %p9015_p1 = scmp.ne.s32.totalorder %s9220_s26, %s9014_s23  ;;  %p9023_p7 = scmp.lt.s32.totalorder %s9014_s23, %s9014_s23 }
  0x3b   : > { %p9017_p2 = pnand %p9015_p1, %p8975_p0  ;;  %p9024_p8 = por %p9023_p7, %p9022_p4 }
  0x3d   : > { %p9018_p3 = pneg %p9017_p2 }
  0x3f   : > { %p9025_p11 = pnand %p9024_p8, %p9018_p3 }
  0x41   : > { %9028 = shalt.err (!%p9025_p11)
}
  0x42   : > { %8668 = dma.hbm_to_vmem [thread:$0]  (!%p9216_p12), %s10621_s6, 16384, %s9220_s26, [#allocation7], %s9103_s27, %s9103_s27, %s9104_s28  }
  0x43   : > { %p10643_p13 = scmp.ne.s32.totalorder %s10641_s21, 0 }
  0x45   : > { %317 = sbr.rel (%p10643_p13) target bundleno = 7165 (0x1bfd), region = 56 }
  0x4c   : > { %p10644_p5 = scmp.eq.s32.totalorder %s9180_s13, 0 }
  0x4e   : > { %9074 = dma.done.wait (%p10644_p5), [#allocation4], 16384   ;;  %p10645_p0 = pmov %p10644_p5 }
  0x50   : > { %9076 = vsyncadd (%p10645_p0), [#allocation4], 4294950912  ;;  %p10646_p6 = pmov %p10645_p0 }
  0x51   : > { %p10647_p9 = pmov %p10645_p0 }
  0x52   : > { %9078 = dma.done.wait (%p10646_p6), [#allocation7], 16384  }
  0x53   : > { %9080 = vsyncadd (%p10647_p9), [#allocation7], 4294950912  ;;  %s5836_s18 = sshll.u32 %s9180_s13, 3  ;;  %v10631_v0 = vmov 0.0   ;;  %v372_v1 = vld [vmem:[%s10617_s2 + $0x8] sm:$0xff]  ;;  %v375_v2 = vld [vmem:[%s10617_s2 + $0x20] sm:$0xff] }
  0x54   : > { %496 = vmatprep.mubr.f32.mxu0 %v10631_v0  ;;  %p358_p12 = scmp.lt.s32.totalorder %s5836_s18, 15  ;;  %v371_v3 = vld [vmem:[%s10617_s2] sm:$0xff]  ;;  %v7800_v4 = vpack.c.bf16 %v375_v2, %v372_v1  ;;  %v374_v5 = vld [vmem:[%s10617_s2 + $0x18] sm:$0xff]  ;;  %v381_v7 = vld [vmem:[%s10617_s2 + $0x50] sm:$0xff]  ;;  %vm407_vm0 = vcmask 261120   ;;  %vm908_vm1 = vcmask 64512  }
  0x55   : > { %v378_v6 = vld [vmem:[%s10617_s2 + $0x38] sm:$0xff]  ;;  %v7802_v8 = vpack.c.bf16 %v374_v5, %v371_v3  ;;  %v377_v10 = vld [vmem:[%s10617_s2 + $0x30] sm:$0xff]  ;;  %v380_v11 = vld [vmem:[%s10617_s2 + $0x48] sm:$0xff]  ;;  %vm9107_vm2 = vmmov 0   ;;  %vm5657_vm3 = vcmask 523264   ;;  %s354_s29 = sand.u32 1, %s9091_s10  }
  0x56   : > { %s10662_s18 = smov (!%p358_p12, %s5836_s18), 15  ;;  %v7804_v9 = vpack.c.bf16 %v381_v7, %v378_v6  ;;  %7801 = vmatprep.subr.bf16.mxu0 %v7800_v4  ;;  %v7806_v13 = vpack.c.bf16 %v380_v11, %v377_v10  ;;  %v658_v14 = vld [vmem:[#allocation3] sm:$0xff]  ;;  %v659_v15 = vld [vmem:[#allocation3 + $0x8] sm:$0xff]  ;;  %v660_v17 = vld [vmem:[#allocation3 + $0x10] sm:$0xff]  ;;  %s5835_s14 = sshll.u32 %s354_s29, 3 }
  0x57   : > { %s5837_s21 = sshll.u32 %s10662_s18, 3  ;;  %7803 = vmatpush1.bf16.msra.mxu0 %v7802_v8  ;;  %v7816_v16 = vpack.c.bf16 %v659_v15, %v658_v14  ;;  %v661_v18 = vld [vmem:[#allocation3 + $0x18] sm:$0xff]  ;;  %v662_v20 = vld [vmem:[#allocation3 + $0x20] sm:$0xff]  ;;  %v663_v21 = vld [vmem:[#allocation3 + $0x28] sm:$0xff]  ;;  %s5921_s22 = sshll.u32 %s9180_s13, 7 }
  0x58   : > { %s9284_s27 = scalar_lea.vmem %s10615_s0, %s5837_s21  ;;  %7805 = vmatprep.subr.bf16.mxu0 %v7804_v9  ;;  %v7820_v19 = vpack.c.bf16 %v661_v18, %v660_v17  ;;  %v7824_v23 = vpack.c.bf16 %v663_v21, %v662_v20  ;;  %v664_v24 = vld [vmem:[#allocation3 + $0x30] sm:$0xff]  ;;  %v665_v25 = vld [vmem:[#allocation3 + $0x38] sm:$0xff]  ;;  %v666_v28 = vld [vmem:[#allocation3 + $0x40] sm:$0xff]  ;;  %s356_s25 = scalar_lea.vmem [#allocation8], %s5835_s14 }
  0x59   : > { %v363_v12 = vld [vmem:[%s9284_s27] sm:$0xff]  ;;  %v9315_v22 = vld [vmem:[%s9284_s27 + $0x8] sm:$0xff]  ;;  %v9321_v26 = vld [vmem:[%s9284_s27 + $0x10] sm:$0xff]  ;;  %v7828_v27 = vpack.c.bf16 %v665_v25, %v664_v24  ;;  %s5746_s23 = sshll.u32 %s356_s25, 4  ;;  %s10573_s15 = scalar_lea.hbm %s10624_s9, %s5921_s22  ;;  %s10575_s23 = int_to_ptr.vmem [resolvable:$true] %s5746_s23 }
  0x5a   : > { %6601 = vmatprep.mubr.msk.f32.mxu1 %vm407_vm0, %v363_v12  ;;  %v667_v29 = vld [vmem:[#allocation3 + $0x48] sm:$0xff]  ;;  %v366_v30 = vld [vmem:[%s9284_s27 + $0x18] sm:$0xff]  ;;  %v668_v32 = vld [vmem:[#allocation3 + $0x50] sm:$0xff]  ;;  %s5733_s18 = scalar_lea.sflag [#allocation5], %s354_s29  ;;  %s9029_s21 = scalar_lea.vmem %s10575_s23, 128 }
  0x5b   : > { %7807 = vmatpush1.bf16.msra.mxu0 %v7806_v13  ;;  %v7832_v31 = vpack.c.bf16 %v667_v29, %v666_v28  ;;  %v669_v33 = vld [vmem:[#allocation3 + $0x58] sm:$0xff]  ;;  %v367_v34 = vld [vmem:[%s9284_s27 + $0x20] sm:$0xff]  ;;  %v671_v37 = vld [vmem:[#allocation3 + $0x68] sm:$0xff]  ;;  %p9030_p10 = scmp.ne.s32.totalorder %s10575_s23, %s9029_s21  ;;  %p10653_p1 = scmp.ne.s32.totalorder %s10639_s19, 0 }
  0x5c   : > { %7817 = vmatprep.subr.bf16.mxu0 %v7816_v16  ;;  %v7836_v35 = vpack.c.bf16 %v669_v33, %v668_v32  ;;  %v670_v36 = vld [vmem:[#allocation3 + $0x60] sm:$0xff]  ;;  %v368_v38 = vld [vmem:[%s9284_s27 + $0x28] sm:$0xff]  ;;  %v369_v40 = vld [vmem:[%s9284_s27 + $0x30] sm:$0xff]  ;;  %s9108_s13 = smov [#allocation8]  }
  0x5d   : > { %v7840_v39 = vpack.c.bf16 %v671_v37, %v670_v36  ;;  %v370_v41 = vld [vmem:[%s9284_s27 + $0x38] sm:$0xff]  ;;  %v672_v42 = vld [vmem:[#allocation3 + $0x70] sm:$0xff]  ;;  %v376_v46 = vld [vmem:[%s10617_s2 + $0x28] sm:$0xff]  ;;  %p9031_p2 = pnand %p9030_p10, %p10653_p1  ;;  %s9033_s24 = sshll.u32 %s9108_s13, 4  ;;  %s9034_s24 = int_to_ptr.vmem [resolvable:$false] %s9033_s24 }
  0x5e   : > { %5838 = vmatmul.mubr.msk.f32.vlgmr.msra.gmra.mrb[0].mxu0 %vm407_vm0, %v363_v12  ;;  %v673_v43 = vld [vmem:[#allocation3 + $0x78] sm:$0xff]  ;;  %v373_v45 = vld [vmem:[%s10617_s2 + $0x10] sm:$0xff]  ;;  %v379_v48 = vld [vmem:[%s10617_s2 + $0x40] sm:$0xff]  ;;  %s9035_s26 = scalar_lea.vmem %s9034_s24, 256  ;;  %p9036_p4 = scmp.lt.s32.totalorder %s10575_s23, %s9034_s24 }
  0x5f   : > { %502 = vmatprep.mubr.f32.mxu0 %v10631_v0  ;;  %7819 = vmatpush3.bf16.msra.mxu0 %v7816_v16  ;;  %v7844_v44 = vpack.c.bf16 %v673_v43, %v672_v42  ;;  %v7808_v47 = vpack.c.bf16 %v376_v46, %v373_v45  ;;  %v382_v49 = vld [vmem:[%s10617_s2 + $0x58] sm:$0xff]  ;;  %v787_v51 = vld [vmem:[%s10619_s4] sm:$0xff]  ;;  %v788_v52 = vld [vmem:[%s10619_s4 + $0x8] sm:$0xff]  ;;  %p9032_p3 = pneg %p9031_p2  ;;  %p9037_p7 = scmp.lt.s32.totalorder %s9035_s26, %s9029_s21 }
  0x60   : > { %7821 = vmatprep.subr.bf16.mxu0 %v7820_v19  ;;  %v7812_v50 = vpack.c.bf16 %v382_v49, %v379_v48  ;;  %v9358_v53 = vpack.c.bf16 %v788_v52, %v787_v51  ;;  %v789_v54 = vld [vmem:[%s10619_s4 + $0x10] sm:$0xff]  ;;  %v790_v55 = vld [vmem:[%s10619_s4 + $0x18] sm:$0xff]  ;;  %v791_v57 = vld [vmem:[%s10619_s4 + $0x20] sm:$0xff] }
  0x61   : > { %7809 = vmatprep.subr.bf16.mxu1 %v7808_v47  ;;  %v9367_v56 = vpack.c.bf16 %v790_v55, %v789_v54  ;;  %v792_v58 = vld [vmem:[%s10619_s4 + $0x28] sm:$0xff]  ;;  %v793_v60 = vld [vmem:[%s10619_s4 + $0x30] sm:$0xff]  ;;  %v794_v61 = vld [vmem:[%s10619_s4 + $0x38] sm:$0xff]  ;;  %p9038_p8 = por %p9037_p7, %p9036_p4 }
  0x62   : > { %5839 = vmatmul.mubr.msk.f32.gmra.mrb[2].mxu0 %vm407_vm0, %v9315_v22  ;;  %7811 = vmatpush3.bf16.msra.mxu1 %v7808_v47  ;;  %v9381_v59 = vpack.c.bf16 %v792_v58, %v791_v57  ;;  %v9393_v62 = vpack.c.bf16 %v794_v61, %v793_v60  ;;  %v795_v63 = vld [vmem:[%s10619_s4 + $0x40] sm:$0xff]  ;;  %v796_v1 = vld [vmem:[%s10619_s4 + $0x48] sm:$0xff]  ;;  %v797_v3 = vld [vmem:[%s10619_s4 + $0x50] sm:$0xff] }
  0x63   : > { %508 = vmatprep.mubr.f32.mxu0 %v10631_v0  ;;  %7823 = vmatpush3.bf16.msra.mxu0 %v7820_v19  ;;  %v9405_v2 = vpack.c.bf16 %v796_v1, %v795_v63  ;;  %v798_v4 = vld [vmem:[%s10619_s4 + $0x58] sm:$0xff]  ;;  %v799_v6 = vld [vmem:[%s10619_s4 + $0x60] sm:$0xff]  ;;  %v800_v7 = vld [vmem:[%s10619_s4 + $0x68] sm:$0xff]  ;;  %p9039_p11 = pnand %p9038_p8, %p9032_p3 }
  0x64   : > { %7825 = vmatprep.subr.bf16.mxu0 %v7824_v23  ;;  %7813 = vmatprep.subr.bf16.mxu1 %v7812_v50  ;;  %v9416_v5 = vpack.c.bf16 %v798_v4, %v797_v3  ;;  %v9426_v8 = vpack.c.bf16 %v800_v7, %v799_v6  ;;  %v383_v9 = vld [vmem:[%s10616_s1] sm:$0xff]  ;;  %v386_v13 = vld [vmem:[%s10616_s1 + $0x18] sm:$0xff]  ;;  %v389_v17 = vld [vmem:[%s10616_s1 + $0x30] sm:$0xff] }
  0x65   : > { %v392_v21 = vld [vmem:[%s10616_s1 + $0x48] sm:$0xff]  ;;  %v395_v25 = vld [vmem:[%s10616_s1 + $0x60] sm:$0xff]  ;;  %v398_v29 = vld [vmem:[%s10616_s1 + $0x78] sm:$0xff] }
  0x66   : > { %5840 = vmatmul.mubr.msk.f32.gmra.mrb[4].mxu0 %vm407_vm0, %v9321_v26  ;;  %7815 = vmatpush3.bf16.msra.mxu1 %v7812_v50  ;;  %v401_v33 = vld [vmem:[%s10616_s1 + $0x90] sm:$0xff]  ;;  %v404_v37 = vld [vmem:[%s10616_s1 + $0xa8] sm:$0xff]  ;;  %v802_v42 = vld [vmem:[%s10619_s4 + $0x78] sm:$0xff] }
  0x67   : > { %514 = vmatprep.mubr.f32.mxu0 %v10631_v0  ;;  %7827 = vmatpush3.bf16.msra.mxu0 %v7824_v23  ;;  %v384_v52 = vld [vmem:[%s10616_s1 + $0x8] sm:$0xff]  ;;  %v387_v54 = vld [vmem:[%s10616_s1 + $0x20] sm:$0xff]  ;;  %v390_v1 = vld [vmem:[%s10616_s1 + $0x38] sm:$0xff] }
  0x68   : > { %7829 = vmatprep.subr.bf16.mxu0 %v7828_v27  ;;  %7849 = vmatprep.subr.bf16.mxu1 %v9358_v53  ;;  %v393_v3 = vld [vmem:[%s10616_s1 + $0x50] sm:$0xff] }
  0x69   : > { %6602 = vmatmul.mubr.msk.f32.vlgmr.msra.gmra.mrb[0].mxu1 %vm407_vm0, %v9315_v22 }
  0x6a   : > { %5841 = vmatmul.mubr.msk.f32.gmra.mrb[6].mxu0 %vm407_vm0, %v366_v30  ;;  %7851 = vmatpush3.bf16.msra.mxu1 %v9358_v53 }
  0x6b   : > { %520 = vmatprep.mubr.f32.mxu0 %v10631_v0  ;;  %7831 = vmatpush3.bf16.msra.mxu0 %v7828_v27 }
  0x6c   : > { %7833 = vmatprep.subr.bf16.mxu0 %v7832_v31  ;;  %6604 = vmatprep.mubr.msk.f32.mxu1 %vm407_vm0, %v9321_v26 }
  0x6d   : > { %7853 = vmatprep.subr.bf16.mxu1 %v9367_v56  ;;  %6605 = vmatmul.mubr.msk.f32.gmra.mrb[2].mxu1 %vm407_vm0, %v366_v30 }
  0x6e   : > { %5842 = vmatmul.mubr.msk.f32.gmra.mrb[8].mxu0 %vm407_vm0, %v367_v34  ;;  %7855 = vmatpush3.bf16.msra.mxu1 %v9367_v56 }
  0x6f   : > { %526 = vmatprep.mubr.f32.mxu0 %v10631_v0  ;;  %7835 = vmatpush3.bf16.msra.mxu0 %v7832_v31 }
  0x70   : > { %7837 = vmatprep.subr.bf16.mxu0 %v7836_v35  ;;  %6607 = vmatprep.mubr.msk.f32.mxu1 %vm407_vm0, %v367_v34 }
  0x71   : > { %7857 = vmatprep.subr.bf16.mxu1 %v9381_v59  ;;  %6608 = vmatmul.mubr.msk.f32.gmra.mrb[4].mxu1 %vm407_vm0, %v368_v38 }
  0x72   : > { %5843 = vmatmul.mubr.msk.f32.gmra.mrb[10].mxu0 %vm407_vm0, %v368_v38  ;;  %7859 = vmatpush3.bf16.msra.mxu1 %v9381_v59 }
  0x73   : > { %532 = vmatprep.mubr.f32.mxu0 %v10631_v0  ;;  %7839 = vmatpush3.bf16.msra.mxu0 %v7836_v35 }
  0x74   : > { %7841 = vmatprep.subr.bf16.mxu0 %v7840_v39  ;;  %6610 = vmatprep.mubr.msk.f32.mxu1 %vm407_vm0, %v369_v40 }
  0x75   : > { %7861 = vmatprep.subr.bf16.mxu1 %v9393_v62  ;;  %6611 = vmatmul.mubr.msk.f32.gmra.mrb[6].mxu1 %vm407_vm0, %v370_v41 }
  0x76   : > { %5844 = vmatmul.mubr.msk.f32.gmra.mrb[12].mxu0 %vm407_vm0, %v369_v40  ;;  %7863 = vmatpush3.bf16.msra.mxu1 %v9393_v62 }
  0x77   : > { %538 = vmatprep.mubr.f32.mxu0 %v10631_v0  ;;  %7843 = vmatpush3.bf16.msra.mxu0 %v7840_v39 }
  0x78   : > { %7845 = vmatprep.subr.bf16.mxu0 %v7844_v44  ;;  %7865 = vmatprep.subr.bf16.mxu1 %v9405_v2 }
  0x7a   : > { %5845 = vmatmul.mubr.msk.f32.gmra.mrb[14].mxu0 %vm407_vm0, %v370_v41  ;;  %7867 = vmatpush3.bf16.msra.mxu1 %v9405_v2  ;;  %v801_v41 = vld [vmem:[%s10619_s4 + $0x70] sm:$0xff] }
  0x7b   : > { %7847 = vmatpush3.bf16.msra.mxu0 %v7844_v44  ;;  %7869 = vmatprep.subr.bf16.mxu1 %v9416_v5  ;;  %v9485_v43 = vpack.c.bf16 %v802_v42, %v801_v41 }
  0x7e   : > { %7871 = vmatpush3.bf16.msra.mxu1 %v9416_v5 }
  0x7f   : > { %7873 = vmatprep.subr.bf16.mxu1 %v9426_v8 }
  0x82   : > { %7875 = vmatpush3.bf16.msra.mxu1 %v9426_v8 }
  0x83   : > { %7877 = vmatprep.subr.bf16.mxu1 %v9485_v43 }
  0x86   : > { %7879 = vmatpush3.bf16.msra.mxu1 %v9485_v43 }
 0x131   : > { %v498_v10 = vpop.f32.mrb[0].mxu0 }
 0x132   : > { %v9434_v11 = vadd.f32 %v498_v10, %v383_v9  ;;  %v500_v12 = vpop.f32.mrb[1].mxu0 }
 0x133   : > { %v9511_v55 = vadd.f32 %v500_v12, %v384_v52 }
 0x134   : > { %6645 = vmatprep.mubr.f32.mxu0 %v9434_v11 }
 0x135   : > { %v504_v14 = vpop.f32.mrb[2].mxu0 }
 0x136   : > { %v9440_v15 = vadd.f32 %v504_v14, %v386_v13  ;;  %v506_v16 = vpop.f32.mrb[3].mxu0  ;;  %v396_v13 = vld [vmem:[%s10616_s1 + $0x68] sm:$0xff]  ;;  %v399_v14 = vld [vmem:[%s10616_s1 + $0x80] sm:$0xff] }
 0x137   : > { %v9513_v58 = vadd.f32 %v506_v16, %v387_v54 }
 0x138   : > { %6646 = vmatmul.mubr.f32.vlgmr.msra.gmra.mrb[16].mxu0 %v9440_v15 }
 0x139   : > { %v510_v18 = vpop.f32.mrb[4].mxu0 }
 0x13a   : > { %v9446_v19 = vadd.f32 %v510_v18, %v389_v17  ;;  %v512_v20 = vpop.f32.mrb[5].mxu0 }
 0x13b   : > { %v9523_v4 = vadd.f32 %v512_v20, %v390_v1 }
 0x13c   : > { %6648 = vmatprep.mubr.f32.mxu0 %v9446_v19  ;;  %v9489_v44 = vpop.f32.mrb[0].mxu1 }
 0x13d   : > { %v516_v22 = vpop.f32.mrb[6].mxu0  ;;  %v9491_v45 = vpop.f32.mrb[1].mxu1 }
 0x13e   : > { %v9452_v23 = vadd.f32 %v516_v22, %v392_v21  ;;  %v518_v24 = vpop.f32.mrb[7].mxu0 }
 0x13f   : > { %v9525_v7 = vadd.f32 %v518_v24, %v393_v3  ;;  %v402_v24 = vld [vmem:[%s10616_s1 + $0x98] sm:$0xff] }
 0x140   : > { %6649 = vmatmul.mubr.f32.gmra.mrb[18].mxu0 %v9452_v23  ;;  %v9493_v46 = vpop.f32.mrb[2].mxu1 }
 0x141   : > { %v522_v26 = vpop.f32.mrb[8].mxu0  ;;  %v9495_v47 = vpop.f32.mrb[3].mxu1 }
 0x142   : > { %v9458_v27 = vadd.f32 %v522_v26, %v395_v25  ;;  %v524_v28 = vpop.f32.mrb[9].mxu0  ;;  %v405_v25 = vld [vmem:[%s10616_s1 + $0xb0] sm:$0xff] }
 0x143   : > { %v9535_v16 = vadd.f32 %v524_v28, %v396_v13 }
 0x144   : > { %6651 = vmatprep.mubr.f32.mxu0 %v9458_v27  ;;  %v9497_v48 = vpop.f32.mrb[4].mxu1 }
 0x145   : > { %v528_v30 = vpop.f32.mrb[10].mxu0  ;;  %v9499_v49 = vpop.f32.mrb[5].mxu1 }
 0x146   : > { %v9464_v31 = vadd.f32 %v528_v30, %v398_v29  ;;  %v530_v32 = vpop.f32.mrb[11].mxu0 }
 0x147   : > { %v9537_v18 = vadd.f32 %v530_v32, %v399_v14 }
 0x148   : > { %6652 = vmatmul.mubr.f32.gmra.mrb[20].mxu0 %v9464_v31  ;;  %v9501_v50 = vpop.f32.mrb[6].mxu1 }
 0x149   : > { %v534_v34 = vpop.f32.mrb[12].mxu0  ;;  %v9503_v51 = vpop.f32.mrb[7].mxu1 }
 0x14a   : > { %v9470_v35 = vadd.f32 %v534_v34, %v401_v33  ;;  %v536_v36 = vpop.f32.mrb[13].mxu0 }
 0x14b   : > { %v9547_v26 = vadd.f32 %v536_v36, %v402_v24 }
 0x14c   : > { %10648 = vst [vmem:[#allocation15_spill] sm:$0xff] %v9470_v35  ;;  %6654 = vmatprep.mubr.f32.mxu0 %v9470_v35 }
 0x14d   : > { %v540_v38 = vpop.f32.mrb[14].mxu0 }
 0x14e   : > { %v9476_v39 = vadd.f32 %v540_v38, %v404_v37  ;;  %v542_v40 = vpop.f32.mrb[15].mxu0 }
 0x14f   : > { %v9549_v29 = vadd.f32 %v542_v40, %v405_v25 }
 0x150   : > { %10649 = vst [vmem:[#allocation16_spill] sm:$0xff] %v9476_v39  ;;  %6655 = vmatmul.mubr.f32.gmra.mrb[22].mxu0 %v9476_v39 }
 0x20b   : > { %v6647_v57 = vpop.f32.mrb[16].mxu0 }
 0x20c   : > { %v740_v60 = vpop.f32.mrb[17].mxu0  ;;  %v780_v63 = vmul.f32 %v6647_v57, %v9513_v58 }
 0x20d   : > { %v779_v61 = vmul.f32 %v740_v60, %v9511_v55 }
 0x20f   : > { %6689 = vmatprep.mubr.f32.mxu1 %v779_v61 }
 0x210   : > { %6690 = vmatmul.mubr.f32.vlgmr.msra.gmra.mrb[8].mxu1 %v780_v63 }
 0x213   : > { %v6650_v6 = vpop.f32.mrb[18].mxu0 }
 0x214   : > { %v750_v9 = vpop.f32.mrb[19].mxu0  ;;  %v782_v12 = vmul.f32 %v6650_v6, %v9525_v7 }
 0x215   : > { %v781_v10 = vmul.f32 %v750_v9, %v9523_v4 }
 0x217   : > { %6692 = vmatprep.mubr.f32.mxu1 %v781_v10 }
 0x218   : > { %6693 = vmatmul.mubr.f32.gmra.mrb[10].mxu1 %v782_v12 }
 0x21b   : > { %v6653_v17 = vpop.f32.mrb[20].mxu0 }
 0x21c   : > { %v760_v20 = vpop.f32.mrb[21].mxu0  ;;  %v784_v22 = vmul.f32 %v6653_v17, %v9537_v18 }
 0x21d   : > { %v783_v21 = vmul.f32 %v760_v20, %v9535_v16 }
 0x21f   : > { %6695 = vmatprep.mubr.f32.mxu1 %v783_v21 }
 0x220   : > { %6696 = vmatmul.mubr.f32.gmra.mrb[12].mxu1 %v784_v22 }
 0x223   : > { %v6656_v28 = vpop.f32.mrb[22].mxu0 }
 0x224   : > { %v770_v30 = vpop.f32.mrb[23].mxu0  ;;  %v786_v33 = vmul.f32 %v6656_v28, %v9549_v29 }
 0x225   : > { %v785_v32 = vmul.f32 %v770_v30, %v9547_v26 }
 0x227   : > { %6698 = vmatprep.mubr.f32.mxu1 %v785_v32 }
 0x228   : > { %6699 = vmatmul.mubr.f32.gmra.mrb[14].mxu1 %v786_v33 }
 0x2e3   : > { %v6691_v34 = vpop.f32.mrb[8].mxu1 }
 0x2e4   : > { %v869_v37 = vpop.f32.mrb[9].mxu1  ;;  %v912_v41 = vsel %vm908_vm1, %v6691_v34, -inf }
 0x2e5   : > { %v909_v38 = vsel %vm908_vm1, %v869_v37, -inf }
 0x2e6   : > { %910 = vmax.xlane.f32.xlu0 %v909_v38 }
 0x2ea   : > { %913 = vmax.xlane.f32.xlu0 %v912_v41 }
 0x2eb   : > { %v6694_v36 = vpop.f32.mrb[10].mxu1 }
 0x2ec   : > { %v879_v42 = vpop.f32.mrb[11].mxu1  ;;  %v918_v52 = vsel %vm908_vm1, %v6694_v36, -inf }
 0x2ed   : > { %v915_v40 = vsel %vm908_vm1, %v879_v42, -inf }
 0x2ee   : > { %916 = vmax.xlane.f32.xlu1 %v915_v40 }
 0x2f2   : > { %919 = vmax.xlane.f32.xlu1 %v918_v52 }
 0x2f3   : > { %v6697_v54 = vpop.f32.mrb[12].mxu1 }
 0x2f4   : > { %v889_v57 = vpop.f32.mrb[13].mxu1  ;;  %v924_v60 = vsel %vm908_vm1, %v6697_v54, -inf }
 0x2f5   : > { %v921_v61 = vsel %vm908_vm1, %v889_v57, -inf }
 0x2f6   : > { %925 = vmax.xlane.f32.xlu1 %v924_v60  ;;  %922 = vmax.xlane.f32.xlu0 %v921_v61 }
 0x2fb   : > { %v6700_v63 = vpop.f32.mrb[14].mxu1 }
 0x2fc   : > { %v899_v1 = vpop.f32.mrb[15].mxu1  ;;  %v930_v3 = vsel %vm908_vm1, %v6700_v63, -inf }
 0x2fd   : > { %931 = vmax.xlane.f32.xlu1 %v930_v3  ;;  %v927_v6 = vsel %vm908_vm1, %v899_v1, -inf }
 0x2fe   : > { %928 = vmax.xlane.f32.xlu0 %v927_v6 }
 0x373   : > { %v911_v9 = vpop.xlane.xlu0 %910 }
 0x374   : > { %v933_v10 = vsub.f32 %v869_v37, %v911_v9 }
 0x376   : > { %v941_v12 = vmul.f32 1.442695, %v933_v10 }
 0x377   : > { %v914_v13 = vpop.xlane.xlu0 %913 }
 0x378   : > { %8717 = vpow2.f32 %v941_v12  ;;  %v934_v14 = vsub.f32 %v6691_v34, %v914_v13 }
 0x37a   : > { %v943_v17 = vmul.f32 1.442695, %v934_v14 }
 0x37b   : > { %v917_v20 = vpop.xlane.xlu1 %916 }
 0x37c   : > { %8719 = vpow2.f32 %v943_v17  ;;  %v935_v21 = vsub.f32 %v879_v42, %v917_v20 }
 0x37e   : > { %v945_v22 = vmul.f32 1.442695, %v935_v21 }
 0x37f   : > { %v920_v24 = vpop.xlane.xlu1 %919 }
 0x380   : > { %8721 = vpow2.f32 %v945_v22  ;;  %v936_v25 = vsub.f32 %v6694_v36, %v920_v24 }
 0x382   : > { %v9561_v28 = vpop.eup %8717  ;;  %v947_v30 = vmul.f32 1.442695, %v936_v25  ;;  %v1281_v25 = vld [vmem:[#allocation3 + $0x80] sm:$0xff] }
 0x383   : > { %v926_v32 = vpop.xlane.xlu1 %925  ;;  %v923_v33 = vpop.xlane.xlu0 %922  ;;  %v957_v37 = vsel %vm908_vm1, %v9561_v28, 0.0 }
 0x384   : > { %8723 = vpow2.f32 %v947_v30  ;;  %v938_v38 = vsub.f32 %v6697_v54, %v926_v32  ;;  %v937_v41 = vsub.f32 %v889_v57, %v923_v33  ;;  %958 = vadd.xlane.f32.xlu0 %v957_v37  ;;  %v1282_v30 = vld [vmem:[#allocation3 + $0x88] sm:$0xff]  ;;  %v1143_v33 = vld [vmem:[#allocation6] sm:$0xff] }
 0x385   : > { %v7912_v32 = vpack.c.bf16 %v1282_v30, %v1281_v25  ;;  %v1144_v37 = vld [vmem:[#allocation6 + $0x8] sm:$0xff] }
 0x386   : > { %v9565_v34 = vpop.eup %8719  ;;  %v951_v40 = vmul.f32 1.442695, %v938_v38  ;;  %v949_v42 = vmul.f32 1.442695, %v937_v41  ;;  %v1145_v38 = vld [vmem:[#allocation6 + $0x10] sm:$0xff]  ;;  %v7880_v41 = vpack.c.bf16 %v1144_v37, %v1143_v33  ;;  %v1156_v25 = vld [vmem:[#allocation6 + $0x68] sm:$0xff] }
 0x387   : > { %v960_v52 = vsel %vm908_vm1, %v9565_v34, 0.0 }
 0x388   : > { %8725 = vpow2.f32 %v951_v40  ;;  %961 = vadd.xlane.f32.xlu1 %v960_v52  ;;  %v1146_v40 = vld [vmem:[#allocation6 + $0x18] sm:$0xff]  ;;  %v1147_v52 = vld [vmem:[#allocation6 + $0x20] sm:$0xff]  ;;  %7881 = vmatprep.subr.bf16.mxu1 %v7880_v41 }
 0x389   : > { %8727 = vpow2.f32 %v949_v42  ;;  %v7884_v42 = vpack.c.bf16 %v1146_v40, %v1145_v38  ;;  %7883 = vmatpush3.bf16.msra.mxu1 %v7880_v41 }
 0x38a   : > { %v9569_v36 = vpop.eup %8721  ;;  %v932_v60 = vpop.xlane.xlu1 %931 }
 0x38b   : > { %v940_v61 = vsub.f32 %v6700_v63, %v932_v60  ;;  %v929_v3 = vpop.xlane.xlu0 %928  ;;  %v963_v54 = vsel %vm908_vm1, %v9569_v36, 0.0  ;;  %v9582_v63 = vld [vmem:[%s10620_s5] sm:$0xff]  ;;  %v1148_v60 = vld [vmem:[#allocation6 + $0x28] sm:$0xff]  ;;  %7885 = vmatprep.subr.bf16.mxu1 %v7884_v42 }
 0x38c   : > { %v939_v57 = vsub.f32 %v899_v1, %v929_v3  ;;  %964 = vadd.xlane.f32.xlu0 %v963_v54  ;;  %6701 = vmatprep.subr.mxu0 %v9582_v63  ;;  %v1149_v3 = vld [vmem:[#allocation6 + $0x30] sm:$0xff]  ;;  %v1150_v54 = vld [vmem:[#allocation6 + $0x38] sm:$0xff] }
 0x38d   : > { %v955_v6 = vmul.f32 1.442695, %v940_v61  ;;  %6702 = vmatpush3.msra.mxu0 %v9582_v63  ;;  %v7888_v61 = vpack.c.bf16 %v1148_v60, %v1147_v52  ;;  %7887 = vmatpush3.bf16.msra.mxu1 %v7884_v42  ;;  %v1283_v52 = vld [vmem:[#allocation3 + $0x90] sm:$0xff]  ;;  %v1284_v60 = vld [vmem:[#allocation3 + $0x98] sm:$0xff] }
 0x38e   : > { %v9573_v9 = vpop.eup %8723  ;;  %v953_v10 = vmul.f32 1.442695, %v939_v57  ;;  %7913 = vmatprep.subr.bf16.mxu0 %v7912_v32  ;;  %v7892_v57 = vpack.c.bf16 %v1150_v54, %v1149_v3 }
 0x38f   : > { %8729 = vpow2.f32 %v955_v6  ;;  %v966_v12 = vsel %vm908_vm1, %v9573_v9, 0.0  ;;  %7889 = vmatprep.subr.bf16.mxu1 %v7888_v61  ;;  %v1151_v6 = vld [vmem:[#allocation6 + $0x40] sm:$0xff] }
 0x390   : > { %8731 = vpow2.f32 %v953_v10  ;;  %967 = vadd.xlane.f32.xlu1 %v966_v12  ;;  %v1152_v10 = vld [vmem:[#allocation6 + $0x48] sm:$0xff] }
 0x391   : > { %7891 = vmatpush3.bf16.msra.mxu1 %v7888_v61  ;;  %v7896_v12 = vpack.c.bf16 %v1152_v10, %v1151_v6  ;;  %v1285_v10 = vld [vmem:[#allocation3 + $0xa0] sm:$0xff] }
 0x392   : > { %v9577_v13 = vpop.eup %8725  ;;  %7893 = vmatprep.subr.bf16.mxu1 %v7892_v57 }
 0x393   : > { %v9584_v14 = vpop.eup %8727  ;;  %v972_v1 = vsel %vm908_vm1, %v9577_v13, 0.0 }
 0x394   : > { %973 = vadd.xlane.f32.xlu1 %v972_v1  ;;  %v969_v17 = vsel %vm908_vm1, %v9584_v14, 0.0  ;;  %v1153_v1 = vld [vmem:[#allocation6 + $0x50] sm:$0xff] }
 0x395   : > { %970 = vadd.xlane.f32.xlu0 %v969_v17  ;;  %v1154_v17 = vld [vmem:[#allocation6 + $0x58] sm:$0xff]  ;;  %7895 = vmatpush3.bf16.msra.mxu1 %v7892_v57  ;;  %v7916_v57 = vpack.c.bf16 %v1284_v60, %v1283_v52  ;;  %v1291_v60 = vld [vmem:[#allocation3 + $0xd0] sm:$0xff] }
 0x396   : > { %7897 = vmatprep.subr.bf16.mxu1 %v7896_v12 }
 0x399   : > { %v9592_v20 = vpop.eup %8729  ;;  %7899 = vmatpush3.bf16.msra.mxu1 %v7896_v12  ;;  %v1286_v12 = vld [vmem:[#allocation3 + $0xa8] sm:$0xff] }
 0x39a   : > { %v9594_v21 = vpop.eup %8731  ;;  %v978_v22 = vsel %vm908_vm1, %v9592_v20, 0.0 }
 0x39b   : > { %979 = vadd.xlane.f32.xlu1 %v978_v22  ;;  %v975_v24 = vsel %vm908_vm1, %v9594_v21, 0.0  ;;  %v7900_v22 = vpack.c.bf16 %v1154_v17, %v1153_v1  ;;  %v7920_v17 = vpack.c.bf16 %v1286_v12, %v1285_v10  ;;  %v1295_v12 = vld [vmem:[#allocation3 + $0xf0] sm:$0xff] }
 0x39c   : > { %976 = vadd.xlane.f32.xlu0 %v975_v24  ;;  %v1155_v24 = vld [vmem:[#allocation6 + $0x60] sm:$0xff] }
 0x39d   : > { %7901 = vmatprep.subr.bf16.mxu1 %v7900_v22  ;;  %v7904_v30 = vpack.c.bf16 %v1156_v25, %v1155_v24  ;;  %v1288_v24 = vld [vmem:[#allocation3 + $0xb8] sm:$0xff] }
 0x39e   : > { %7903 = vmatpush3.bf16.msra.mxu1 %v7900_v22  ;;  %v1287_v22 = vld [vmem:[#allocation3 + $0xb0] sm:$0xff] }
 0x39f   : > { %7905 = vmatprep.subr.bf16.mxu1 %v7904_v30 }
 0x3a2   : > { %7907 = vmatpush3.bf16.msra.mxu1 %v7904_v30 }
 0x411   : > { %v959_v33 = vpop.xlane.xlu0 %958 }
 0x412   : > { %8733 = vrcp.f32 %v959_v33 }
 0x415   : > { %v962_v37 = vpop.xlane.xlu1 %961 }
 0x416   : > { %8735 = vrcp.f32 %v962_v37  ;;  %v7924_v37 = vpack.c.bf16 %v1288_v24, %v1287_v22  ;;  %v388_v22 = vld [vmem:[%s10616_s1 + $0x28] sm:$0xff] }
 0x419   : > { %v965_v38 = vpop.xlane.xlu0 %964 }
 0x41a   : > { %8737 = vrcp.f32 %v965_v38  ;;  %v1289_v38 = vld [vmem:[#allocation3 + $0xc0] sm:$0xff] }
 0x41c   : > { %v8734_v41 = vpop.eup %8733 }
 0x41d   : > { %v968_v40 = vpop.xlane.xlu1 %967  ;;  %v989_v42 = vmul.f32 %v8734_v41, %v9561_v28 }
 0x41e   : > { %8739 = vrcp.f32 %v968_v40 }
 0x41f   : > { %6703 = vmatprep.mubr.msk.f32.mxu0 %vm908_vm1, %v989_v42 }
 0x420   : > { %v8736_v61 = vpop.eup %8735 }
 0x421   : > { %v990_v3 = vmul.f32 %v8736_v61, %v9565_v34  ;;  %v974_v54 = vpop.xlane.xlu1 %973  ;;  %v1292_v61 = vld [vmem:[#allocation3 + $0xd8] sm:$0xff] }
 0x422   : > { %8741 = vrcp.f32 %v974_v54  ;;  %v971_v6 = vpop.xlane.xlu0 %970  ;;  %v1294_v54 = vld [vmem:[#allocation3 + $0xe8] sm:$0xff] }
 0x423   : > { %8743 = vrcp.f32 %v971_v6  ;;  %6704 = vmatmul.mubr.msk.f32.vlgmr.msra.gmra.mrb[24].mxu0 %vm908_vm1, %v990_v3  ;;  %v1293_v3 = vld [vmem:[#allocation3 + $0xe0] sm:$0xff] }
 0x424   : > { %v8738_v1 = vpop.eup %8737  ;;  %7915 = vmatpush3.bf16.msra.mxu0 %v7912_v32  ;;  %v1290_v32 = vld [vmem:[#allocation3 + $0xc8] sm:$0xff]  ;;  %v7936_v10 = vpack.c.bf16 %v1294_v54, %v1293_v3 }
 0x425   : > { %7917 = vmatprep.subr.bf16.mxu0 %v7916_v57  ;;  %v991_v28 = vmul.f32 %v8738_v1, %v9569_v36  ;;  %v7928_v42 = vpack.c.bf16 %v1290_v32, %v1289_v38  ;;  %v391_v38 = vld [vmem:[%s10616_s1 + $0x40] sm:$0xff] }
 0x427   : > { %6706 = vmatprep.mubr.msk.f32.mxu0 %vm908_vm1, %v991_v28 }
 0x428   : > { %v8740_v34 = vpop.eup %8739  ;;  %7919 = vmatpush3.bf16.msra.mxu0 %v7916_v57  ;;  %v980_v25 = vpop.xlane.xlu1 %979 }
 0x429   : > { %8745 = vrcp.f32 %v980_v25  ;;  %v977_v30 = vpop.xlane.xlu0 %976  ;;  %7921 = vmatprep.subr.bf16.mxu0 %v7920_v17  ;;  %v992_v33 = vmul.f32 %v8740_v34, %v9573_v9  ;;  %v7932_v9 = vpack.c.bf16 %v1292_v61, %v1291_v60  ;;  %v9637_v25 = vadd.f32 %v9489_v44, %v388_v22 }
 0x42a   : > { %8747 = vrcp.f32 %v977_v30  ;;  %v9650_v44 = vadd.f32 %v9495_v47, %v391_v38  ;;  %v400_v47 = vld [vmem:[%s10616_s1 + $0x88] sm:$0xff] }
 0x42b   : > { %6707 = vmatmul.mubr.msk.f32.gmra.mrb[26].mxu0 %vm908_vm1, %v992_v33 }
 0x42c   : > { %v8742_v36 = vpop.eup %8741  ;;  %7923 = vmatpush3.bf16.msra.mxu0 %v7920_v17 }
 0x42d   : > { %v8744_v41 = vpop.eup %8743  ;;  %7925 = vmatprep.subr.bf16.mxu0 %v7924_v37  ;;  %v994_v40 = vmul.f32 %v8742_v36, %v9577_v13 }
 0x42e   : > { %v993_v52 = vmul.f32 %v8744_v41, %v9584_v14  ;;  %v1296_v14 = vld [vmem:[#allocation3 + $0xf8] sm:$0xff] }
 0x42f   : > { %v7940_v28 = vpack.c.bf16 %v1296_v14, %v1295_v12 }
 0x430   : > { %6709 = vmatprep.mubr.msk.f32.mxu0 %vm908_vm1, %v993_v52  ;;  %7927 = vmatpush3.bf16.msra.mxu0 %v7924_v37 }
 0x431   : > { %6710 = vmatmul.mubr.msk.f32.gmra.mrb[28].mxu0 %vm908_vm1, %v994_v40  ;;  %7929 = vmatprep.subr.bf16.mxu0 %v7928_v42 }
 0x433   : > { %v8746_v57 = vpop.eup %8745 }
 0x434   : > { %v8748_v6 = vpop.eup %8747  ;;  %7931 = vmatpush3.bf16.msra.mxu0 %v7928_v42  ;;  %v996_v1 = vmul.f32 %v8746_v57, %v9592_v20  ;;  %v1157_v20 = vld [vmem:[#allocation6 + $0x70] sm:$0xff] }
 0x435   : > { %7933 = vmatprep.subr.bf16.mxu0 %v7932_v9  ;;  %v995_v13 = vmul.f32 %v8748_v6, %v9594_v21  ;;  %v1158_v21 = vld [vmem:[#allocation6 + $0x78] sm:$0xff]  ;;  %v397_v42 = vld [vmem:[%s10616_s1 + $0x70] sm:$0xff] }
 0x436   : > { %v7908_v17 = vpack.c.bf16 %v1158_v21, %v1157_v20 }
 0x437   : > { %6712 = vmatprep.mubr.msk.f32.mxu0 %vm908_vm1, %v995_v13 }
 0x438   : > { %7935 = vmatpush3.bf16.msra.mxu0 %v7932_v9  ;;  %7909 = vmatprep.subr.bf16.mxu1 %v7908_v17 }
 0x439   : > { %6713 = vmatmul.mubr.msk.f32.gmra.mrb[30].mxu0 %vm908_vm1, %v996_v1  ;;  %7937 = vmatprep.subr.bf16.mxu0 %v7936_v10 }
 0x43a   : > { %6791 = vmatprep.mubr.f32.mxu0 %v9434_v11  ;;  %7911 = vmatpush3.bf16.msra.mxu1 %v7908_v17 }
 0x43b   : > { %7945 = vmatprep.subr.bf16.mxu1 %v9358_v53 }
 0x43c   : > { %7939 = vmatpush3.bf16.msra.mxu0 %v7936_v10 }
 0x43d   : > { %7941 = vmatprep.subr.bf16.mxu0 %v7940_v28 }
 0x440   : > { %7943 = vmatpush3.bf16.msra.mxu0 %v7940_v28 }
 0x441   : > { %6847 = vmatprep.subr.mxu0 %v9582_v63 }
 0x443   : > { %6792 = vmatmul.mubr.f32.vlgmr.msra.gmra.mrb[32].mxu0 %v9440_v15 }
 0x444   : > { %6794 = vmatprep.mubr.f32.mxu0 %v9446_v19  ;;  %6848 = vmatpush3.msra.mxu0 %v9582_v63  ;;  %v385_v63 = vld [vmem:[%s10616_s1 + $0x10] sm:$0xff] }
 0x445   : > { %v9634_v24 = vadd.f32 %v9491_v45, %v385_v63  ;;  %v394_v45 = vld [vmem:[%s10616_s1 + $0x58] sm:$0xff] }
 0x446   : > { %v9653_v36 = vadd.f32 %v9493_v46, %v394_v45  ;;  %v9666_v46 = vadd.f32 %v9499_v49, %v397_v42  ;;  %v403_v49 = vld [vmem:[%s10616_s1 + $0xa0] sm:$0xff] }
 0x447   : > { %6795 = vmatmul.mubr.f32.gmra.mrb[34].mxu0 %v9452_v23 }
 0x448   : > { %6797 = vmatprep.mubr.f32.mxu0 %v9458_v27 }
 0x44b   : > { %6798 = vmatmul.mubr.f32.gmra.mrb[36].mxu0 %v9464_v31 }
 0x44c   : > { %6800 = vmatprep.mubr.f32.mxu0 %v9470_v35 }
 0x44f   : > { %6801 = vmatmul.mubr.f32.gmra.mrb[38].mxu0 %v9476_v39 }
 0x4f6   : > { %v6705_v34 = vpop.f32.mrb[24].mxu0 }
 0x4f7   : > { %v1088_v30 = vpop.f32.mrb[25].mxu0  ;;  %v1136_v37 = vmul.f32 %v6705_v34, %v9637_v25 }
 0x4f8   : > { %v1135_v33 = vmul.f32 %v1088_v30, %v9634_v24 }
 0x4fa   : > { %6747 = vmatprep.mubr.f32.mxu1 %v1135_v33 }
 0x4fb   : > { %6748 = vmatmul.mubr.f32.vlgmr.msra.gmra.mrb[16].mxu1 %v1136_v37 }
 0x4fc   : > { %7947 = vmatpush3.bf16.msra.mxu1 %v9358_v53 }
 0x4fd   : > { %7949 = vmatprep.subr.bf16.mxu1 %v9367_v56 }
 0x4fe   : > { %v6708_v32 = vpop.f32.mrb[26].mxu0 }
 0x4ff   : > { %v1098_v41 = vpop.f32.mrb[27].mxu0  ;;  %v1138_v53 = vmul.f32 %v6708_v32, %v9653_v36 }
 0x500   : > { %v1137_v40 = vmul.f32 %v1098_v41, %v9650_v44  ;;  %7951 = vmatpush3.bf16.msra.mxu1 %v9367_v56  ;;  %v9670_v56 = vadd.f32 %v9497_v48, %v400_v47  ;;  %v9684_v48 = vadd.f32 %v9503_v51, %v403_v49 }
 0x501   : > { %7953 = vmatprep.subr.bf16.mxu1 %v9381_v59 }
 0x502   : > { %6750 = vmatprep.mubr.f32.mxu1 %v1137_v40 }
 0x503   : > { %6751 = vmatmul.mubr.f32.gmra.mrb[18].mxu1 %v1138_v53 }
 0x504   : > { %v6711_v52 = vpop.f32.mrb[28].mxu0  ;;  %7955 = vmatpush3.bf16.msra.mxu1 %v9381_v59  ;;  %v406_v59 = vld [vmem:[%s10616_s1 + $0xb8] sm:$0xff] }
 0x505   : > { %v1108_v60 = vpop.f32.mrb[29].mxu0  ;;  %7957 = vmatprep.subr.bf16.mxu1 %v9393_v62  ;;  %v1140_v9 = vmul.f32 %v6711_v52, %v9670_v56  ;;  %v9688_v54 = vadd.f32 %v9501_v50, %v406_v59 }
 0x506   : > { %v1139_v61 = vmul.f32 %v1108_v60, %v9666_v46 }
 0x508   : > { %6753 = vmatprep.mubr.f32.mxu1 %v1139_v61  ;;  %7959 = vmatpush3.bf16.msra.mxu1 %v9393_v62 }
 0x509   : > { %6754 = vmatmul.mubr.f32.gmra.mrb[20].mxu1 %v1140_v9  ;;  %7961 = vmatprep.subr.bf16.mxu1 %v9405_v2 }
 0x50c   : > { %v6714_v3 = vpop.f32.mrb[30].mxu0  ;;  %7963 = vmatpush3.bf16.msra.mxu1 %v9405_v2 }
 0x50d   : > { %v1118_v62 = vpop.f32.mrb[31].mxu0  ;;  %7965 = vmatprep.subr.bf16.mxu1 %v9416_v5  ;;  %v1142_v6 = vmul.f32 %v6714_v3, %v9688_v54 }
 0x50e   : > { %v1141_v57 = vmul.f32 %v1118_v62, %v9684_v48 }
 0x510   : > { %6756 = vmatprep.mubr.f32.mxu1 %v1141_v57  ;;  %7967 = vmatpush3.bf16.msra.mxu1 %v9416_v5 }
 0x511   : > { %6757 = vmatmul.mubr.f32.gmra.mrb[22].mxu1 %v1142_v6  ;;  %7969 = vmatprep.subr.bf16.mxu1 %v9426_v8 }
 0x514   : > { %7971 = vmatpush3.bf16.msra.mxu1 %v9426_v8 }
 0x515   : > { %7973 = vmatprep.subr.bf16.mxu1 %v9485_v43 }
 0x516   : > { %v6793_v2 = vpop.f32.mrb[32].mxu0 }
 0x517   : > { %v1363_v50 = vpop.f32.mrb[33].mxu0  ;;  %v1403_v13 = vmul.f32 %v6793_v2, %v9513_v58 }
 0x518   : > { %v1402_v51 = vmul.f32 %v1363_v50, %v9511_v55  ;;  %7975 = vmatpush3.bf16.msra.mxu1 %v9485_v43 }
 0x51a   : > { %v6796_v10 = vpop.f32.mrb[34].mxu0  ;;  %6835 = vmatprep.mubr.f32.mxu1 %v1402_v51 }
 0x51b   : > { %v1373_v12 = vpop.f32.mrb[35].mxu0  ;;  %6836 = vmatmul.mubr.f32.vlgmr.msra.gmra.mrb[24].mxu1 %v1403_v13  ;;  %v1405_v14 = vmul.f32 %v6796_v10, %v9525_v7 }
 0x51c   : > { %v1404_v5 = vmul.f32 %v1373_v12, %v9523_v4 }
 0x51e   : > { %v6799_v1 = vpop.f32.mrb[36].mxu0  ;;  %6838 = vmatprep.mubr.f32.mxu1 %v1404_v5 }
 0x51f   : > { %v1383_v8 = vpop.f32.mrb[37].mxu0  ;;  %6839 = vmatmul.mubr.f32.gmra.mrb[26].mxu1 %v1405_v14  ;;  %v1407_v20 = vmul.f32 %v6799_v1, %v9537_v18 }
 0x520   : > { %v1406_v28 = vmul.f32 %v1383_v8, %v9535_v16 }
 0x522   : > { %v6802_v21 = vpop.f32.mrb[38].mxu0  ;;  %6841 = vmatprep.mubr.f32.mxu1 %v1406_v28 }
 0x523   : > { %v1393_v43 = vpop.f32.mrb[39].mxu0  ;;  %6842 = vmatmul.mubr.f32.gmra.mrb[28].mxu1 %v1407_v20  ;;  %v1409_v63 = vmul.f32 %v6802_v21, %v9549_v29 }
 0x524   : > { %v1408_v17 = vmul.f32 %v1393_v43, %v9547_v26 }
 0x526   : > { %6844 = vmatprep.mubr.f32.mxu1 %v1408_v17 }
 0x527   : > { %6845 = vmatmul.mubr.f32.gmra.mrb[30].mxu1 %v1409_v63 }
 0x5ee   : > { %v6837_v22 = vpop.f32.mrb[24].mxu1 }
 0x5ef   : > { %v1492_v34 = vpop.f32.mrb[25].mxu1  ;;  %v1534_v30 = vsel %vm908_vm1, %v6837_v22, -inf }
 0x5f0   : > { %1535 = vmax.xlane.f32.xlu1 %v1534_v30  ;;  %v1531_v33 = vsel %vm908_vm1, %v1492_v34, -inf }
 0x5f1   : > { %1532 = vmax.xlane.f32.xlu0 %v1531_v33 }
 0x5f2   : > { %v6840_v37 = vpop.f32.mrb[26].mxu1 }
 0x5f3   : > { %v1502_v38 = vpop.f32.mrb[27].mxu1  ;;  %v1540_v45 = vsel %vm908_vm1, %v6840_v37, -inf }
 0x5f4   : > { %1541 = vmax.xlane.f32.xlu1 %v1540_v45  ;;  %v1537_v32 = vsel %vm908_vm1, %v1502_v38, -inf }
 0x5f5   : > { %1538 = vmax.xlane.f32.xlu0 %v1537_v32 }
 0x5f6   : > { %v6843_v41 = vpop.f32.mrb[28].mxu1 }
 0x5f7   : > { %v1512_v40 = vpop.f32.mrb[29].mxu1  ;;  %v1546_v42 = vsel %vm908_vm1, %v6843_v41, -inf }
 0x5f8   : > { %1547 = vmax.xlane.f32.xlu1 %v1546_v42  ;;  %v1543_v53 = vsel %vm908_vm1, %v1512_v40, -inf }
 0x5f9   : > { %1544 = vmax.xlane.f32.xlu0 %v1543_v53 }
 0x5fa   : > { %v6846_v47 = vpop.f32.mrb[30].mxu1 }
 0x5fb   : > { %v1522_v52 = vpop.f32.mrb[31].mxu1  ;;  %v1552_v60 = vsel %vm908_vm1, %v6846_v47, -inf }
 0x5fc   : > { %1553 = vmax.xlane.f32.xlu1 %v1552_v60  ;;  %v1549_v61 = vsel %vm908_vm1, %v1522_v52, -inf }
 0x5fd   : > { %1550 = vmax.xlane.f32.xlu0 %v1549_v61 }
 0x67d   : > { %v1536_v9 = vpop.xlane.xlu1 %1535 }
 0x67e   : > { %v1556_v49 = vsub.f32 %v6837_v22, %v1536_v9  ;;  %v1533_v59 = vpop.xlane.xlu0 %1532 }
 0x67f   : > { %v1555_v3 = vsub.f32 %v1492_v34, %v1533_v59  ;;  %v1905_v59 = vld [vmem:[#allocation3 + $0x108] sm:$0xff] }
 0x680   : > { %v1565_v62 = vmul.f32 1.442695, %v1556_v49  ;;  %v1904_v49 = vld [vmem:[#allocation3 + $0x100] sm:$0xff] }
 0x681   : > { %v1563_v57 = vmul.f32 1.442695, %v1555_v3  ;;  %v1542_v6 = vpop.xlane.xlu1 %1541  ;;  %v9746_v3 = vpack.c.bf16 %v1905_v59, %v1904_v49  ;;  %v1906_v49 = vld [vmem:[#allocation3 + $0x110] sm:$0xff]  ;;  %v1907_v59 = vld [vmem:[#allocation3 + $0x118] sm:$0xff] }
 0x682   : > { %8749 = vpow2.f32 %v1565_v62  ;;  %v1558_v2 = vsub.f32 %v6840_v37, %v1542_v6  ;;  %v1539_v50 = vpop.xlane.xlu0 %1538  ;;  %v1766_v62 = vld [vmem:[#allocation6 + $0x80] sm:$0xff]  ;;  %v1768_v6 = vld [vmem:[#allocation6 + $0x90] sm:$0xff] }
 0x683   : > { %8751 = vpow2.f32 %v1563_v57  ;;  %v1557_v51 = vsub.f32 %v1502_v38, %v1539_v50  ;;  %8009 = vmatprep.subr.bf16.mxu0 %v9746_v3  ;;  %v1767_v57 = vld [vmem:[#allocation6 + $0x88] sm:$0xff]  ;;  %v1769_v50 = vld [vmem:[#allocation6 + $0x98] sm:$0xff] }
 0x684   : > { %v1569_v13 = vmul.f32 1.442695, %v1558_v2  ;;  %v7976_v2 = vpack.c.bf16 %v1767_v57, %v1766_v62 }
 0x685   : > { %v1567_v10 = vmul.f32 1.442695, %v1557_v51  ;;  %v1548_v12 = vpop.xlane.xlu1 %1547  ;;  %v7980_v51 = vpack.c.bf16 %v1769_v50, %v1768_v6 }
 0x686   : > { %8753 = vpow2.f32 %v1569_v13  ;;  %v1560_v5 = vsub.f32 %v6843_v41, %v1548_v12  ;;  %v1545_v14 = vpop.xlane.xlu0 %1544  ;;  %v1770_v13 = vld [vmem:[#allocation6 + $0xa0] sm:$0xff]  ;;  %7977 = vmatprep.subr.bf16.mxu1 %v7976_v2 }
 0x687   : > { %8755 = vpow2.f32 %v1567_v10  ;;  %v1559_v1 = vsub.f32 %v1512_v40, %v1545_v14  ;;  %v1771_v10 = vld [vmem:[#allocation6 + $0xa8] sm:$0xff]  ;;  %7979 = vmatpush3.bf16.msra.mxu1 %v7976_v2  ;;  %v1773_v14 = vld [vmem:[#allocation6 + $0xb8] sm:$0xff] }
 0x688   : > { %v1573_v8 = vmul.f32 1.442695, %v1560_v5  ;;  %7981 = vmatprep.subr.bf16.mxu1 %v7980_v51  ;;  %v7984_v12 = vpack.c.bf16 %v1771_v10, %v1770_v13  ;;  %v1772_v5 = vld [vmem:[#allocation6 + $0xb0] sm:$0xff]  ;;  %v1908_v10 = vld [vmem:[#allocation3 + $0x120] sm:$0xff] }
 0x689   : > { %v1571_v28 = vmul.f32 1.442695, %v1559_v1  ;;  %v1554_v20 = vpop.xlane.xlu1 %1553  ;;  %v7988_v1 = vpack.c.bf16 %v1773_v14, %v1772_v5 }
 0x68a   : > { %8757 = vpow2.f32 %v1573_v8  ;;  %v1562_v21 = vsub.f32 %v6846_v47, %v1554_v20  ;;  %v1551_v43 = vpop.xlane.xlu0 %1550  ;;  %v1774_v8 = vld [vmem:[#allocation6 + $0xc0] sm:$0xff] }
 0x68b   : > { %8759 = vpow2.f32 %v1571_v28  ;;  %v1561_v17 = vsub.f32 %v1522_v52, %v1551_v43  ;;  %7983 = vmatpush3.bf16.msra.mxu1 %v7980_v51  ;;  %v1775_v28 = vld [vmem:[#allocation6 + $0xc8] sm:$0xff]  ;;  %v1777_v43 = vld [vmem:[#allocation6 + $0xd8] sm:$0xff]  ;;  %v8012_v51 = vpack.c.bf16 %v1907_v59, %v1906_v49 }
 0x68c   : > { %v9714_v63 = vpop.eup %8749  ;;  %v1577_v22 = vmul.f32 1.442695, %v1562_v21  ;;  %7985 = vmatprep.subr.bf16.mxu1 %v7984_v12  ;;  %v7992_v20 = vpack.c.bf16 %v1775_v28, %v1774_v8  ;;  %v1776_v21 = vld [vmem:[#allocation6 + $0xd0] sm:$0xff]  ;;  %v1911_v28 = vld [vmem:[#allocation3 + $0x138] sm:$0xff] }
 0x68d   : > { %v9716_v34 = vpop.eup %8751  ;;  %v1575_v30 = vmul.f32 1.442695, %v1561_v17  ;;  %v1582_v33 = vsel %vm908_vm1, %v9714_v63, 0.0  ;;  %v7996_v17 = vpack.c.bf16 %v1777_v43, %v1776_v21  ;;  %v1781_v49 = vld [vmem:[#allocation6 + $0xf8] sm:$0xff] }
 0x68e   : > { %8761 = vpow2.f32 %v1577_v22  ;;  %1583 = vadd.xlane.f32.xlu1 %v1582_v33  ;;  %v1579_v37 = vsel %vm908_vm1, %v9716_v34, 0.0  ;;  %v1778_v22 = vld [vmem:[#allocation6 + $0xe0] sm:$0xff] }
 0x68f   : > { %8763 = vpow2.f32 %v1575_v30  ;;  %1580 = vadd.xlane.f32.xlu0 %v1579_v37  ;;  %7987 = vmatpush3.bf16.msra.mxu1 %v7984_v12  ;;  %v1779_v30 = vld [vmem:[#allocation6 + $0xe8] sm:$0xff] }
 0x690   : > { %v9722_v38 = vpop.eup %8753  ;;  %7989 = vmatprep.subr.bf16.mxu1 %v7988_v1  ;;  %v8000_v33 = vpack.c.bf16 %v1779_v30, %v1778_v22  ;;  %v1909_v12 = vld [vmem:[#allocation3 + $0x128] sm:$0xff] }
 0x691   : > { %v9724_v45 = vpop.eup %8755  ;;  %v1588_v32 = vsel %vm908_vm1, %v9722_v38, 0.0 }
 0x692   : > { %1589 = vadd.xlane.f32.xlu1 %v1588_v32  ;;  %v1585_v41 = vsel %vm908_vm1, %v9724_v45, 0.0 }
 0x693   : > { %1586 = vadd.xlane.f32.xlu0 %v1585_v41  ;;  %7991 = vmatpush3.bf16.msra.mxu1 %v7988_v1 }
 0x694   : > { %v9730_v40 = vpop.eup %8757  ;;  %7993 = vmatprep.subr.bf16.mxu1 %v7992_v20 }
 0x695   : > { %v9732_v42 = vpop.eup %8759  ;;  %v1594_v53 = vsel %vm908_vm1, %v9730_v40, 0.0 }
 0x696   : > { %1595 = vadd.xlane.f32.xlu1 %v1594_v53  ;;  %v1591_v47 = vsel %vm908_vm1, %v9732_v42, 0.0 }
 0x697   : > { %1592 = vadd.xlane.f32.xlu0 %v1591_v47  ;;  %7995 = vmatpush3.bf16.msra.mxu1 %v7992_v20 }
 0x698   : > { %v9738_v52 = vpop.eup %8761  ;;  %7997 = vmatprep.subr.bf16.mxu1 %v7996_v17 }
 0x699   : > { %v9740_v60 = vpop.eup %8763  ;;  %v1600_v61 = vsel %vm908_vm1, %v9738_v52, 0.0 }
 0x69a   : > { %1601 = vadd.xlane.f32.xlu1 %v1600_v61  ;;  %v1597_v9 = vsel %vm908_vm1, %v9740_v60, 0.0 }
 0x69b   : > { %1598 = vadd.xlane.f32.xlu0 %v1597_v9  ;;  %7999 = vmatpush3.bf16.msra.mxu1 %v7996_v17  ;;  %v1913_v17 = vld [vmem:[#allocation3 + $0x148] sm:$0xff] }
 0x69c   : > { %8001 = vmatprep.subr.bf16.mxu1 %v8000_v33 }
 0x69f   : > { %8003 = vmatpush3.bf16.msra.mxu1 %v8000_v33 }
 0x71b   : > { %v1584_v37 = vpop.xlane.xlu1 %1583 }
 0x71c   : > { %8765 = vrcp.f32 %v1584_v37  ;;  %v1581_v32 = vpop.xlane.xlu0 %1580 }
 0x71d   : > { %8767 = vrcp.f32 %v1581_v32 }
 0x71f   : > { %v1590_v41 = vpop.xlane.xlu1 %1589 }
 0x720   : > { %8769 = vrcp.f32 %v1590_v41  ;;  %v1587_v53 = vpop.xlane.xlu0 %1586  ;;  %v1916_v41 = vld [vmem:[#allocation3 + $0x160] sm:$0xff] }
 0x721   : > { %8771 = vrcp.f32 %v1587_v53  ;;  %v1917_v53 = vld [vmem:[#allocation3 + $0x168] sm:$0xff] }
 0x723   : > { %v1596_v47 = vpop.xlane.xlu1 %1595 }
 0x724   : > { %8773 = vrcp.f32 %v1596_v47  ;;  %v1593_v61 = vpop.xlane.xlu0 %1592  ;;  %v1918_v47 = vld [vmem:[#allocation3 + $0x170] sm:$0xff] }
 0x725   : > { %8775 = vrcp.f32 %v1593_v61  ;;  %v1919_v61 = vld [vmem:[#allocation3 + $0x178] sm:$0xff] }
 0x726   : > { %v8766_v9 = vpop.eup %8765 }
 0x727   : > { %v8768_v62 = vpop.eup %8767  ;;  %v1602_v57 = vpop.xlane.xlu1 %1601  ;;  %v1612_v50 = vmul.f32 %v8766_v9, %v9714_v63  ;;  %v1910_v63 = vld [vmem:[#allocation3 + $0x130] sm:$0xff] }
 0x728   : > { %8777 = vrcp.f32 %v1602_v57  ;;  %v1599_v6 = vpop.xlane.xlu0 %1598  ;;  %v1611_v2 = vmul.f32 %v8768_v62, %v9716_v34  ;;  %v8016_v34 = vpack.c.bf16 %v1909_v12, %v1908_v10  ;;  %v8020_v43 = vpack.c.bf16 %v1911_v28, %v1910_v63  ;;  %v1780_v9 = vld [vmem:[#allocation6 + $0xf0] sm:$0xff]  ;;  %v2033_v62 = vld [vmem:[%s10619_s4] sm:$0xff]  ;;  %v2034_v57 = vld [vmem:[%s10619_s4 + $0x8] sm:$0xff] }
 0x729   : > { %8779 = vrcp.f32 %v1599_v6  ;;  %v8004_v59 = vpack.c.bf16 %v1781_v49, %v1780_v9  ;;  %v9780_v6 = vpack.c.bf16 %v2034_v57, %v2033_v62  ;;  %v2038_v10 = vld [vmem:[%s10619_s4 + $0x28] sm:$0xff]  ;;  %v2043_v63 = vld [vmem:[%s10619_s4 + $0x50] sm:$0xff] }
 0x72a   : > { %v8770_v13 = vpop.eup %8769  ;;  %6849 = vmatprep.mubr.msk.f32.mxu0 %vm908_vm1, %v1611_v2  ;;  %v2035_v2 = vld [vmem:[%s10619_s4 + $0x10] sm:$0xff] }
 0x72b   : > { %v8772_v5 = vpop.eup %8771  ;;  %6850 = vmatmul.mubr.msk.f32.vlgmr.msra.gmra.mrb[40].mxu0 %vm908_vm1, %v1612_v50  ;;  %v1614_v1 = vmul.f32 %v8770_v13, %v9722_v38  ;;  %v1912_v38 = vld [vmem:[#allocation3 + $0x140] sm:$0xff]  ;;  %8005 = vmatprep.subr.bf16.mxu1 %v8004_v59  ;;  %v2036_v50 = vld [vmem:[%s10619_s4 + $0x18] sm:$0xff] }
 0x72c   : > { %8011 = vmatpush3.bf16.msra.mxu0 %v9746_v3  ;;  %v1613_v14 = vmul.f32 %v8772_v5, %v9724_v45  ;;  %v8024_v37 = vpack.c.bf16 %v1913_v17, %v1912_v38  ;;  %8007 = vmatpush3.bf16.msra.mxu1 %v8004_v59  ;;  %v2037_v13 = vld [vmem:[%s10619_s4 + $0x20] sm:$0xff]  ;;  %v2039_v5 = vld [vmem:[%s10619_s4 + $0x30] sm:$0xff]  ;;  %v2048_v17 = vld [vmem:[%s10619_s4 + $0x78] sm:$0xff] }
 0x72d   : > { %8013 = vmatprep.subr.bf16.mxu0 %v8012_v51  ;;  %v9800_v12 = vpack.c.bf16 %v2038_v10, %v2037_v13  ;;  %v2047_v38 = vld [vmem:[%s10619_s4 + $0x70] sm:$0xff] }
 0x72e   : > { %v8774_v8 = vpop.eup %8773  ;;  %6852 = vmatprep.mubr.msk.f32.mxu0 %vm908_vm1, %v1613_v14  ;;  %v2040_v14 = vld [vmem:[%s10619_s4 + $0x38] sm:$0xff] }
 0x72f   : > { %v8776_v20 = vpop.eup %8775  ;;  %6853 = vmatmul.mubr.msk.f32.gmra.mrb[42].mxu0 %vm908_vm1, %v1614_v1  ;;  %v1616_v3 = vmul.f32 %v8774_v8, %v9730_v40  ;;  %v1915_v40 = vld [vmem:[#allocation3 + $0x158] sm:$0xff]  ;;  %v9810_v1 = vpack.c.bf16 %v2040_v14, %v2039_v5  ;;  %v2042_v8 = vld [vmem:[%s10619_s4 + $0x48] sm:$0xff] }
 0x730   : > { %8015 = vmatpush3.bf16.msra.mxu0 %v8012_v51  ;;  %v1615_v21 = vmul.f32 %v8776_v20, %v9732_v42  ;;  %v1914_v42 = vld [vmem:[#allocation3 + $0x150] sm:$0xff]  ;;  %v9790_v51 = vpack.c.bf16 %v2036_v50, %v2035_v2  ;;  %v2044_v20 = vld [vmem:[%s10619_s4 + $0x58] sm:$0xff] }
 0x731   : > { %8017 = vmatprep.subr.bf16.mxu0 %v8016_v34  ;;  %v8028_v32 = vpack.c.bf16 %v1915_v40, %v1914_v42 }
 0x732   : > { %v8778_v45 = vpop.eup %8777  ;;  %6855 = vmatprep.mubr.msk.f32.mxu0 %vm908_vm1, %v1615_v21  ;;  %v9828_v21 = vpack.c.bf16 %v2044_v20, %v2043_v63 }
 0x733   : > { %v8780_v22 = vpop.eup %8779  ;;  %6856 = vmatmul.mubr.msk.f32.gmra.mrb[44].mxu0 %vm908_vm1, %v1616_v3  ;;  %v1618_v33 = vmul.f32 %v8778_v45, %v9738_v52  ;;  %v8036_v52 = vpack.c.bf16 %v1919_v61, %v1918_v47  ;;  %v2045_v3 = vld [vmem:[%s10619_s4 + $0x60] sm:$0xff] }
 0x734   : > { %8019 = vmatpush3.bf16.msra.mxu0 %v8016_v34  ;;  %v1617_v30 = vmul.f32 %v8780_v22, %v9740_v60  ;;  %v8032_v60 = vpack.c.bf16 %v1917_v53, %v1916_v41  ;;  %v2041_v34 = vld [vmem:[%s10619_s4 + $0x40] sm:$0xff]  ;;  %v9850_v22 = vpack.c.bf16 %v2048_v17, %v2047_v38 }
 0x735   : > { %8021 = vmatprep.subr.bf16.mxu0 %v8020_v43  ;;  %v9823_v28 = vpack.c.bf16 %v2042_v8, %v2041_v34 }
 0x736   : > { %6858 = vmatprep.mubr.msk.f32.mxu0 %vm908_vm1, %v1617_v30 }
 0x737   : > { %6859 = vmatmul.mubr.msk.f32.gmra.mrb[46].mxu0 %vm908_vm1, %v1618_v33 }
 0x738   : > { %8023 = vmatpush3.bf16.msra.mxu0 %v8020_v43  ;;  %6937 = vmatprep.mubr.f32.mxu0 %v9434_v11  ;;  %v2046_v43 = vld [vmem:[%s10619_s4 + $0x68] sm:$0xff] }
 0x739   : > { %8025 = vmatprep.subr.bf16.mxu0 %v8024_v37  ;;  %v9839_v45 = vpack.c.bf16 %v2046_v43, %v2045_v3 }
 0x73c   : > { %8027 = vmatpush3.bf16.msra.mxu0 %v8024_v37 }
 0x73d   : > { %8029 = vmatprep.subr.bf16.mxu0 %v8028_v32 }
 0x740   : > { %8031 = vmatpush3.bf16.msra.mxu0 %v8028_v32 }
 0x741   : > { %8033 = vmatprep.subr.bf16.mxu0 %v8032_v60 }
 0x744   : > { %8035 = vmatpush3.bf16.msra.mxu0 %v8032_v60 }
 0x745   : > { %8037 = vmatprep.subr.bf16.mxu0 %v8036_v52 }
 0x748   : > { %8039 = vmatpush3.bf16.msra.mxu0 %v8036_v52 }
 0x749   : > { %8041 = vmatprep.subr.bf16.mxu0 %v9780_v6 }
 0x74b   : > { %6938 = vmatmul.mubr.f32.vlgmr.msra.gmra.mrb[48].mxu0 %v9440_v15 }
 0x74c   : > { %6940 = vmatprep.mubr.f32.mxu0 %v9446_v19  ;;  %8043 = vmatpush3.bf16.msra.mxu0 %v9780_v6 }
 0x74d   : > { %8045 = vmatprep.subr.bf16.mxu0 %v9790_v51 }
 0x74f   : > { %6941 = vmatmul.mubr.f32.gmra.mrb[50].mxu0 %v9452_v23 }
 0x750   : > { %6943 = vmatprep.mubr.f32.mxu0 %v9458_v27  ;;  %8047 = vmatpush3.bf16.msra.mxu0 %v9790_v51 }
 0x751   : > { %8049 = vmatprep.subr.bf16.mxu0 %v9800_v12 }
 0x753   : > { %6944 = vmatmul.mubr.f32.gmra.mrb[52].mxu0 %v9464_v31 }
 0x754   : > { %6946 = vmatprep.mubr.f32.mxu0 %v9470_v35  ;;  %8051 = vmatpush3.bf16.msra.mxu0 %v9800_v12 }
 0x755   : > { %8053 = vmatprep.subr.bf16.mxu0 %v9810_v1 }
 0x757   : > { %6947 = vmatmul.mubr.f32.gmra.mrb[54].mxu0 %v9476_v39 }
 0x758   : > { %8055 = vmatpush3.bf16.msra.mxu0 %v9810_v1 }
 0x759   : > { %8057 = vmatprep.subr.bf16.mxu0 %v9823_v28 }
 0x75c   : > { %8059 = vmatpush3.bf16.msra.mxu0 %v9823_v28 }
 0x75d   : > { %8061 = vmatprep.subr.bf16.mxu0 %v9828_v21 }
 0x760   : > { %8063 = vmatpush3.bf16.msra.mxu0 %v9828_v21 }
 0x761   : > { %8065 = vmatprep.subr.bf16.mxu0 %v9839_v45 }
 0x764   : > { %8067 = vmatpush3.bf16.msra.mxu0 %v9839_v45 }
 0x765   : > { %8069 = vmatprep.subr.bf16.mxu0 %v9850_v22 }
 0x768   : > { %8071 = vmatpush3.bf16.msra.mxu0 %v9850_v22 }
 0x7fe   : > { %v6851_v30 = vpop.f32.mrb[40].mxu0 }
 0x7ff   : > { %v1710_v33 = vpop.f32.mrb[41].mxu0  ;;  %v1758_v42 = vmul.f32 %v6851_v30, %v9637_v25 }
 0x800   : > { %v1757_v37 = vmul.f32 %v1710_v33, %v9634_v24 }
 0x802   : > { %v6854_v40 = vpop.f32.mrb[42].mxu0  ;;  %6893 = vmatprep.mubr.f32.mxu1 %v1757_v37 }
 0x803   : > { %v1720_v32 = vpop.f32.mrb[43].mxu0  ;;  %6894 = vmatmul.mubr.f32.vlgmr.msra.gmra.mrb[16].mxu1 %v1758_v42  ;;  %v1760_v53 = vmul.f32 %v6854_v40, %v9653_v36 }
 0x804   : > { %v1759_v41 = vmul.f32 %v1720_v32, %v9650_v44 }
 0x806   : > { %v6857_v60 = vpop.f32.mrb[44].mxu0  ;;  %6896 = vmatprep.mubr.f32.mxu1 %v1759_v41 }
 0x807   : > { %v1730_v47 = vpop.f32.mrb[45].mxu0  ;;  %6897 = vmatmul.mubr.f32.gmra.mrb[18].mxu1 %v1760_v53  ;;  %v1762_v52 = vmul.f32 %v6857_v60, %v9670_v56 }
 0x808   : > { %v1761_v61 = vmul.f32 %v1730_v47, %v9666_v46 }
 0x80a   : > { %v6860_v9 = vpop.f32.mrb[46].mxu0  ;;  %6899 = vmatprep.mubr.f32.mxu1 %v1761_v61 }
 0x80b   : > { %v1740_v49 = vpop.f32.mrb[47].mxu0  ;;  %6900 = vmatmul.mubr.f32.gmra.mrb[20].mxu1 %v1762_v52  ;;  %v1764_v62 = vmul.f32 %v6860_v9, %v9688_v54 }
 0x80c   : > { %v1763_v59 = vmul.f32 %v1740_v49, %v9684_v48 }
 0x80e   : > { %6902 = vmatprep.mubr.f32.mxu1 %v1763_v59 }
 0x80f   : > { %6903 = vmatmul.mubr.f32.gmra.mrb[22].mxu1 %v1764_v62 }
 0x81e   : > { %v6939_v57 = vpop.f32.mrb[48].mxu0 }
 0x81f   : > { %v1986_v2 = vpop.f32.mrb[49].mxu0  ;;  %v2026_v13 = vmul.f32 %v6939_v57, %v9513_v58 }
 0x820   : > { %v2025_v50 = vmul.f32 %v1986_v2, %v9511_v55  ;;  %v9881_v2 = vld [vmem:[%s10620_s5] sm:$0xff] }
 0x821   : > { %6993 = vmatprep.subr.mxu0 %v9881_v2 }
 0x822   : > { %v6942_v10 = vpop.f32.mrb[50].mxu0  ;;  %6981 = vmatprep.mubr.f32.mxu0 %v2025_v50 }
 0x823   : > { %v1996_v5 = vpop.f32.mrb[51].mxu0  ;;  %6982 = vmatmul.mubr.f32.vlgmr.msra.gmra.mrb[56].mxu0 %v2026_v13  ;;  %v2028_v34 = vmul.f32 %v6942_v10, %v9525_v7 }
 0x824   : > { %v2027_v14 = vmul.f32 %v1996_v5, %v9523_v4  ;;  %6994 = vmatpush3.msra.mxu0 %v9881_v2 }
 0x826   : > { %v6945_v8 = vpop.f32.mrb[52].mxu0  ;;  %6984 = vmatprep.mubr.f32.mxu0 %v2027_v14 }
 0x827   : > { %v2006_v63 = vpop.f32.mrb[53].mxu0  ;;  %6985 = vmatmul.mubr.f32.gmra.mrb[58].mxu0 %v2028_v34  ;;  %v2030_v3 = vmul.f32 %v6945_v8, %v9537_v18 }
 0x828   : > { %v2029_v20 = vmul.f32 %v2006_v63, %v9535_v16 }
 0x82a   : > { %v6948_v43 = vpop.f32.mrb[54].mxu0  ;;  %6987 = vmatprep.mubr.f32.mxu0 %v2029_v20 }
 0x82b   : > { %v2016_v38 = vpop.f32.mrb[55].mxu0  ;;  %6988 = vmatmul.mubr.f32.gmra.mrb[60].mxu0 %v2030_v3  ;;  %v2032_v30 = vmul.f32 %v6948_v43, %v9549_v29 }
 0x82c   : > { %v2031_v17 = vmul.f32 %v2016_v38, %v9547_v26 }
 0x82e   : > { %6990 = vmatprep.mubr.f32.mxu0 %v2031_v17 }
 0x82f   : > { %6991 = vmatmul.mubr.f32.gmra.mrb[62].mxu0 %v2032_v30 }
 0x8f6   : > { %v6983_v33 = vpop.f32.mrb[56].mxu0 }
 0x8f7   : > { %v2115_v37 = vpop.f32.mrb[57].mxu0  ;;  %v2157_v42 = vsel %vm908_vm1, %v6983_v33, -inf }
 0x8f8   : > { %2158 = vmax.xlane.f32.xlu1 %v2157_v42  ;;  %v2154_v40 = vsel %vm908_vm1, %v2115_v37, -inf }
 0x8f9   : > { %2155 = vmax.xlane.f32.xlu0 %v2154_v40 }
 0x8fa   : > { %v6986_v32 = vpop.f32.mrb[58].mxu0 }
 0x8fb   : > { %v2125_v41 = vpop.f32.mrb[59].mxu0  ;;  %v2163_v53 = vsel %vm908_vm1, %v6986_v32, -inf }
 0x8fc   : > { %2164 = vmax.xlane.f32.xlu1 %v2163_v53  ;;  %v2160_v60 = vsel %vm908_vm1, %v2125_v41, -inf }
 0x8fd   : > { %2161 = vmax.xlane.f32.xlu0 %v2160_v60 }
 0x8fe   : > { %v6989_v47 = vpop.f32.mrb[60].mxu0 }
 0x8ff   : > { %v2135_v61 = vpop.f32.mrb[61].mxu0  ;;  %v2169_v52 = vsel %vm908_vm1, %v6989_v47, -inf }
 0x900   : > { %2170 = vmax.xlane.f32.xlu1 %v2169_v52  ;;  %v2166_v9 = vsel %vm908_vm1, %v2135_v61, -inf }
 0x901   : > { %2167 = vmax.xlane.f32.xlu0 %v2166_v9 }
 0x902   : > { %v6992_v49 = vpop.f32.mrb[62].mxu0 }
 0x903   : > { %v2145_v59 = vpop.f32.mrb[63].mxu0  ;;  %v2175_v62 = vsel %vm908_vm1, %v6992_v49, -inf }
 0x904   : > { %2176 = vmax.xlane.f32.xlu1 %v2175_v62  ;;  %v2172_v57 = vsel %vm908_vm1, %v2145_v59, -inf }
 0x905   : > { %2173 = vmax.xlane.f32.xlu0 %v2172_v57 }
 0x985   : > { %v2159_v50 = vpop.xlane.xlu1 %2158 }
 0x986   : > { %v2179_v13 = vsub.f32 %v6983_v33, %v2159_v50  ;;  %v2156_v10 = vpop.xlane.xlu0 %2155 }
 0x987   : > { %v2178_v5 = vsub.f32 %v2115_v37, %v2156_v10 }
 0x988   : > { %v2188_v14 = vmul.f32 1.442695, %v2179_v13 }
 0x989   : > { %v2186_v34 = vmul.f32 1.442695, %v2178_v5  ;;  %v2165_v8 = vpop.xlane.xlu1 %2164 }
 0x98a   : > { %8781 = vpow2.f32 %v2188_v14  ;;  %v2181_v63 = vsub.f32 %v6986_v32, %v2165_v8  ;;  %v2162_v20 = vpop.xlane.xlu0 %2161 }
 0x98b   : > { %8783 = vpow2.f32 %v2186_v34  ;;  %v2180_v3 = vsub.f32 %v2125_v41, %v2162_v20 }
 0x98c   : > { %v2192_v43 = vmul.f32 1.442695, %v2181_v63 }
 0x98d   : > { %v2190_v38 = vmul.f32 1.442695, %v2180_v3  ;;  %v2171_v17 = vpop.xlane.xlu1 %2170 }
 0x98e   : > { %8785 = vpow2.f32 %v2192_v43  ;;  %v2183_v30 = vsub.f32 %v6989_v47, %v2171_v17  ;;  %v2168_v42 = vpop.xlane.xlu0 %2167  ;;  %v2527_v43 = vld [vmem:[#allocation3 + $0x180] sm:$0xff] }
 0x98f   : > { %8787 = vpow2.f32 %v2190_v38  ;;  %v2182_v40 = vsub.f32 %v2135_v61, %v2168_v42  ;;  %v2528_v38 = vld [vmem:[#allocation3 + $0x188] sm:$0xff] }
 0x990   : > { %v2196_v53 = vmul.f32 1.442695, %v2183_v30  ;;  %v9917_v17 = vpack.c.bf16 %v2528_v38, %v2527_v43  ;;  %v2389_v30 = vld [vmem:[#allocation6 + $0x100] sm:$0xff]  ;;  %v2390_v42 = vld [vmem:[#allocation6 + $0x108] sm:$0xff] }
 0x991   : > { %v2194_v33 = vmul.f32 1.442695, %v2182_v40  ;;  %v2177_v60 = vpop.xlane.xlu1 %2176  ;;  %v2391_v40 = vld [vmem:[#allocation6 + $0x110] sm:$0xff]  ;;  %v2402_v43 = vld [vmem:[#allocation6 + $0x168] sm:$0xff] }
 0x992   : > { %8789 = vpow2.f32 %v2196_v53  ;;  %v2185_v37 = vsub.f32 %v6992_v49, %v2177_v60  ;;  %v2174_v52 = vpop.xlane.xlu0 %2173  ;;  %8105 = vmatprep.subr.bf16.mxu0 %v9917_v17  ;;  %v8072_v53 = vpack.c.bf16 %v2390_v42, %v2389_v30 }
 0x993   : > { %8791 = vpow2.f32 %v2194_v33  ;;  %v2184_v9 = vsub.f32 %v2145_v59, %v2174_v52  ;;  %v2392_v33 = vld [vmem:[#allocation6 + $0x118] sm:$0xff]  ;;  %v2394_v52 = vld [vmem:[#allocation6 + $0x128] sm:$0xff] }
 0x994   : > { %v9885_v32 = vpop.eup %8781  ;;  %v2200_v62 = vmul.f32 1.442695, %v2185_v37  ;;  %v8076_v60 = vpack.c.bf16 %v2392_v33, %v2391_v40  ;;  %v2393_v37 = vld [vmem:[#allocation6 + $0x120] sm:$0xff]  ;;  %8073 = vmatprep.subr.bf16.mxu1 %v8072_v53 }
 0x995   : > { %v9887_v41 = vpop.eup %8783  ;;  %v2198_v57 = vmul.f32 1.442695, %v2184_v9  ;;  %v2205_v47 = vsel %vm908_vm1, %v9885_v32, 0.0  ;;  %8075 = vmatpush3.bf16.msra.mxu1 %v8072_v53  ;;  %v8080_v9 = vpack.c.bf16 %v2394_v52, %v2393_v37  ;;  %v2529_v52 = vld [vmem:[#allocation3 + $0x190] sm:$0xff] }
 0x996   : > { %8793 = vpow2.f32 %v2200_v62  ;;  %2206 = vadd.xlane.f32.xlu1 %v2205_v47  ;;  %v2202_v61 = vsel %vm908_vm1, %v9887_v41, 0.0  ;;  %8077 = vmatprep.subr.bf16.mxu1 %v8076_v60  ;;  %v2395_v62 = vld [vmem:[#allocation6 + $0x130] sm:$0xff] }
 0x997   : > { %8795 = vpow2.f32 %v2198_v57  ;;  %2203 = vadd.xlane.f32.xlu0 %v2202_v61  ;;  %v2396_v57 = vld [vmem:[#allocation6 + $0x138] sm:$0xff]  ;;  %v2397_v61 = vld [vmem:[#allocation6 + $0x140] sm:$0xff] }
 0x998   : > { %v9893_v49 = vpop.eup %8785  ;;  %v8084_v47 = vpack.c.bf16 %v2396_v57, %v2395_v62 }
 0x999   : > { %v9895_v50 = vpop.eup %8787  ;;  %v2211_v59 = vsel %vm908_vm1, %v9893_v49, 0.0  ;;  %8079 = vmatpush3.bf16.msra.mxu1 %v8076_v60 }
 0x99a   : > { %2212 = vadd.xlane.f32.xlu1 %v2211_v59  ;;  %v2208_v13 = vsel %vm908_vm1, %v9895_v50, 0.0  ;;  %8081 = vmatprep.subr.bf16.mxu1 %v8080_v9  ;;  %v2398_v59 = vld [vmem:[#allocation6 + $0x148] sm:$0xff] }
 0x99b   : > { %2209 = vadd.xlane.f32.xlu0 %v2208_v13  ;;  %v8088_v13 = vpack.c.bf16 %v2398_v59, %v2397_v61 }
 0x99c   : > { %v9901_v10 = vpop.eup %8789 }
 0x99d   : > { %v9903_v5 = vpop.eup %8791  ;;  %v2217_v14 = vsel %vm908_vm1, %v9901_v10, 0.0  ;;  %8083 = vmatpush3.bf16.msra.mxu1 %v8080_v9  ;;  %v2530_v9 = vld [vmem:[#allocation3 + $0x198] sm:$0xff] }
 0x99e   : > { %2218 = vadd.xlane.f32.xlu1 %v2217_v14  ;;  %v2214_v34 = vsel %vm908_vm1, %v9903_v5, 0.0  ;;  %8085 = vmatprep.subr.bf16.mxu1 %v8084_v47  ;;  %v2399_v14 = vld [vmem:[#allocation6 + $0x150] sm:$0xff] }
 0x99f   : > { %2215 = vadd.xlane.f32.xlu0 %v2214_v34  ;;  %v2400_v34 = vld [vmem:[#allocation6 + $0x158] sm:$0xff] }
 0x9a0   : > { %v9909_v8 = vpop.eup %8793 }
 0x9a1   : > { %v9911_v63 = vpop.eup %8795  ;;  %v2223_v20 = vsel %vm908_vm1, %v9909_v8, 0.0  ;;  %8087 = vmatpush3.bf16.msra.mxu1 %v8084_v47 }
 0x9a2   : > { %2224 = vadd.xlane.f32.xlu1 %v2223_v20  ;;  %v2220_v3 = vsel %vm908_vm1, %v9911_v63, 0.0  ;;  %8089 = vmatprep.subr.bf16.mxu1 %v8088_v13  ;;  %v8092_v20 = vpack.c.bf16 %v2400_v34, %v2399_v14  ;;  %v2531_v34 = vld [vmem:[#allocation3 + $0x1a0] sm:$0xff] }
 0x9a3   : > { %2221 = vadd.xlane.f32.xlu0 %v2220_v3  ;;  %v2401_v3 = vld [vmem:[#allocation6 + $0x160] sm:$0xff] }
 0x9a4   : > { %v8096_v38 = vpack.c.bf16 %v2402_v43, %v2401_v3 }
 0x9a5   : > { %8091 = vmatpush3.bf16.msra.mxu1 %v8088_v13  ;;  %v8108_v13 = vpack.c.bf16 %v2530_v9, %v2529_v52 }
 0x9a6   : > { %8093 = vmatprep.subr.bf16.mxu1 %v8092_v20 }
 0x9a9   : > { %8095 = vmatpush3.bf16.msra.mxu1 %v8092_v20  ;;  %v2532_v20 = vld [vmem:[#allocation3 + $0x1a8] sm:$0xff] }
 0x9aa   : > { %8097 = vmatprep.subr.bf16.mxu1 %v8096_v38 }
 0x9ad   : > { %8099 = vmatpush3.bf16.msra.mxu1 %v8096_v38 }
 0xa23   : > { %v2207_v30 = vpop.xlane.xlu1 %2206 }
 0xa24   : > { %8797 = vrcp.f32 %v2207_v30  ;;  %v2204_v42 = vpop.xlane.xlu0 %2203 }
 0xa25   : > { %8799 = vrcp.f32 %v2204_v42  ;;  %v2534_v42 = vld [vmem:[#allocation3 + $0x1b8] sm:$0xff] }
 0xa27   : > { %v2213_v40 = vpop.xlane.xlu1 %2212 }
 0xa28   : > { %8801 = vrcp.f32 %v2213_v40  ;;  %v2210_v53 = vpop.xlane.xlu0 %2209 }
 0xa29   : > { %8803 = vrcp.f32 %v2210_v53 }
 0xa2b   : > { %v2219_v33 = vpop.xlane.xlu1 %2218 }
 0xa2c   : > { %8805 = vrcp.f32 %v2219_v33  ;;  %v2216_v60 = vpop.xlane.xlu0 %2215 }
 0xa2d   : > { %8807 = vrcp.f32 %v2216_v60  ;;  %v2536_v60 = vld [vmem:[#allocation3 + $0x1c8] sm:$0xff] }
 0xa2e   : > { %v8798_v37 = vpop.eup %8797 }
 0xa2f   : > { %v8800_v62 = vpop.eup %8799  ;;  %v2225_v57 = vpop.xlane.xlu1 %2224  ;;  %v2235_v59 = vmul.f32 %v8798_v37, %v9885_v32  ;;  %v2533_v32 = vld [vmem:[#allocation3 + $0x1b0] sm:$0xff] }
 0xa30   : > { %8809 = vrcp.f32 %v2225_v57  ;;  %v2222_v47 = vpop.xlane.xlu0 %2221  ;;  %v2234_v61 = vmul.f32 %v8800_v62, %v9887_v41  ;;  %v8112_v41 = vpack.c.bf16 %v2532_v20, %v2531_v34  ;;  %v8116_v33 = vpack.c.bf16 %v2534_v42, %v2533_v32  ;;  %v2404_v34 = vld [vmem:[#allocation6 + $0x178] sm:$0xff] }
 0xa31   : > { %8811 = vrcp.f32 %v2222_v47  ;;  %v2539_v47 = vld [vmem:[#allocation3 + $0x1e0] sm:$0xff] }
 0xa32   : > { %v8802_v14 = vpop.eup %8801  ;;  %6995 = vmatprep.mubr.msk.f32.mxu0 %vm908_vm1, %v2234_v61  ;;  %v2540_v61 = vld [vmem:[#allocation3 + $0x1e8] sm:$0xff] }
 0xa33   : > { %v8804_v3 = vpop.eup %8803  ;;  %6996 = vmatmul.mubr.msk.f32.vlgmr.msra.gmra.mrb[64].mxu0 %vm908_vm1, %v2235_v59  ;;  %v2237_v38 = vmul.f32 %v8802_v14, %v9893_v49  ;;  %v2535_v49 = vld [vmem:[#allocation3 + $0x1c0] sm:$0xff]  ;;  %v2541_v59 = vld [vmem:[#allocation3 + $0x1f0] sm:$0xff] }
 0xa34   : > { %8107 = vmatpush3.bf16.msra.mxu0 %v9917_v17  ;;  %v2236_v43 = vmul.f32 %v8804_v3, %v9895_v50  ;;  %v8120_v62 = vpack.c.bf16 %v2536_v60, %v2535_v49  ;;  %v2403_v14 = vld [vmem:[#allocation6 + $0x170] sm:$0xff] }
 0xa35   : > { %8109 = vmatprep.subr.bf16.mxu0 %v8108_v13  ;;  %v8100_v20 = vpack.c.bf16 %v2404_v34, %v2403_v14 }
 0xa36   : > { %v8806_v30 = vpop.eup %8805  ;;  %6998 = vmatprep.mubr.msk.f32.mxu0 %vm908_vm1, %v2236_v43 }
 0xa37   : > { %v8808_v40 = vpop.eup %8807  ;;  %6999 = vmatmul.mubr.msk.f32.gmra.mrb[66].mxu0 %vm908_vm1, %v2237_v38  ;;  %v2239_v17 = vmul.f32 %v8806_v30, %v9901_v10  ;;  %v2538_v10 = vld [vmem:[#allocation3 + $0x1d8] sm:$0xff]  ;;  %8101 = vmatprep.subr.bf16.mxu1 %v8100_v20 }
 0xa38   : > { %8111 = vmatpush3.bf16.msra.mxu0 %v8108_v13  ;;  %v2238_v53 = vmul.f32 %v8808_v40, %v9903_v5  ;;  %v2537_v5 = vld [vmem:[#allocation3 + $0x1d0] sm:$0xff]  ;;  %v2542_v13 = vld [vmem:[#allocation3 + $0x1f8] sm:$0xff]  ;;  %8103 = vmatpush3.bf16.msra.mxu1 %v8100_v20 }
 0xa39   : > { %8113 = vmatprep.subr.bf16.mxu0 %v8112_v41  ;;  %v8124_v57 = vpack.c.bf16 %v2538_v10, %v2537_v5  ;;  %8137 = vmatprep.subr.bf16.mxu1 %v9780_v6 }
 0xa3a   : > { %v8810_v50 = vpop.eup %8809  ;;  %7001 = vmatprep.mubr.msk.f32.mxu0 %vm908_vm1, %v2238_v53 }
 0xa3b   : > { %v8812_v37 = vpop.eup %8811  ;;  %7002 = vmatmul.mubr.msk.f32.gmra.mrb[68].mxu0 %vm908_vm1, %v2239_v17  ;;  %v2241_v9 = vmul.f32 %v8810_v50, %v9909_v8  ;;  %v8132_v8 = vpack.c.bf16 %v2542_v13, %v2541_v59 }
 0xa3c   : > { %8115 = vmatpush3.bf16.msra.mxu0 %v8112_v41  ;;  %v2240_v52 = vmul.f32 %v8812_v37, %v9911_v63  ;;  %v8128_v63 = vpack.c.bf16 %v2540_v61, %v2539_v47 }
 0xa3d   : > { %8117 = vmatprep.subr.bf16.mxu0 %v8116_v33 }
 0xa3e   : > { %7004 = vmatprep.mubr.msk.f32.mxu0 %vm908_vm1, %v2240_v52 }
 0xa3f   : > { %7005 = vmatmul.mubr.msk.f32.gmra.mrb[70].mxu0 %vm908_vm1, %v2241_v9 }
 0xa40   : > { %8119 = vmatpush3.bf16.msra.mxu0 %v8116_v33  ;;  %7083 = vmatprep.mubr.f32.mxu0 %v9434_v11 }
 0xa41   : > { %8121 = vmatprep.subr.bf16.mxu0 %v8120_v62 }
 0xa44   : > { %8123 = vmatpush3.bf16.msra.mxu0 %v8120_v62 }
 0xa45   : > { %8125 = vmatprep.subr.bf16.mxu0 %v8124_v57 }
 0xa48   : > { %8127 = vmatpush3.bf16.msra.mxu0 %v8124_v57 }
 0xa49   : > { %8129 = vmatprep.subr.bf16.mxu0 %v8128_v63 }
 0xa4c   : > { %8131 = vmatpush3.bf16.msra.mxu0 %v8128_v63 }
 0xa4d   : > { %8133 = vmatprep.subr.bf16.mxu0 %v8132_v8 }
 0xa50   : > { %8135 = vmatpush3.bf16.msra.mxu0 %v8132_v8 }
 0xa51   : > { %7139 = vmatprep.subr.mxu0 %v9881_v2 }
 0xa53   : > { %7084 = vmatmul.mubr.f32.vlgmr.msra.gmra.mrb[72].mxu0 %v9440_v15 }
 0xa54   : > { %7086 = vmatprep.mubr.f32.mxu0 %v9446_v19  ;;  %7140 = vmatpush3.msra.mxu0 %v9881_v2 }
 0xa57   : > { %7087 = vmatmul.mubr.f32.gmra.mrb[74].mxu0 %v9452_v23 }
 0xa58   : > { %7089 = vmatprep.mubr.f32.mxu0 %v9458_v27 }
 0xa5b   : > { %7090 = vmatmul.mubr.f32.gmra.mrb[76].mxu0 %v9464_v31 }
 0xa5c   : > { %7092 = vmatprep.mubr.f32.mxu0 %v9470_v35 }
 0xa5f   : > { %7093 = vmatmul.mubr.f32.gmra.mrb[78].mxu0 %v9476_v39 }
 0xb06   : > { %v6997_v3 = vpop.f32.mrb[64].mxu0 }
 0xb07   : > { %v2333_v43 = vpop.f32.mrb[65].mxu0  ;;  %v2381_v38 = vmul.f32 %v6997_v3, %v9637_v25 }
 0xb08   : > { %v2380_v2 = vmul.f32 %v2333_v43, %v9634_v24 }
 0xb0a   : > { %v7000_v41 = vpop.f32.mrb[66].mxu0  ;;  %7039 = vmatprep.mubr.f32.mxu1 %v2380_v2 }
 0xb0b   : > { %v2343_v30 = vpop.f32.mrb[67].mxu0  ;;  %7040 = vmatmul.mubr.f32.vlgmr.msra.gmra.mrb[16].mxu1 %v2381_v38  ;;  %v2383_v42 = vmul.f32 %v7000_v41, %v9653_v36 }
 0xb0c   : > { %v2382_v32 = vmul.f32 %v2343_v30, %v9650_v44  ;;  %8139 = vmatpush3.bf16.msra.mxu1 %v9780_v6 }
 0xb0d   : > { %8141 = vmatprep.subr.bf16.mxu1 %v9790_v51 }
 0xb0e   : > { %v7003_v40 = vpop.f32.mrb[68].mxu0  ;;  %7042 = vmatprep.mubr.f32.mxu1 %v2382_v32 }
 0xb0f   : > { %v2353_v53 = vpop.f32.mrb[69].mxu0  ;;  %7043 = vmatmul.mubr.f32.gmra.mrb[18].mxu1 %v2383_v42  ;;  %v2385_v33 = vmul.f32 %v7003_v40, %v9670_v56 }
 0xb10   : > { %v2384_v17 = vmul.f32 %v2353_v53, %v9666_v46  ;;  %8143 = vmatpush3.bf16.msra.mxu1 %v9790_v51 }
 0xb11   : > { %8145 = vmatprep.subr.bf16.mxu1 %v9800_v12 }
 0xb12   : > { %v7006_v50 = vpop.f32.mrb[70].mxu0  ;;  %7045 = vmatprep.mubr.f32.mxu1 %v2384_v17 }
 0xb13   : > { %v2363_v49 = vpop.f32.mrb[71].mxu0  ;;  %7046 = vmatmul.mubr.f32.gmra.mrb[20].mxu1 %v2385_v33  ;;  %v2387_v60 = vmul.f32 %v7006_v50, %v9688_v54 }
 0xb14   : > { %v2386_v6 = vmul.f32 %v2363_v49, %v9684_v48  ;;  %8147 = vmatpush3.bf16.msra.mxu1 %v9800_v12 }
 0xb15   : > { %8149 = vmatprep.subr.bf16.mxu1 %v9810_v1 }
 0xb16   : > { %7048 = vmatprep.mubr.f32.mxu1 %v2386_v6 }
 0xb17   : > { %7049 = vmatmul.mubr.f32.gmra.mrb[22].mxu1 %v2387_v60 }
 0xb18   : > { %8151 = vmatpush3.bf16.msra.mxu1 %v9810_v1 }
 0xb19   : > { %8153 = vmatprep.subr.bf16.mxu1 %v9823_v28 }
 0xb1c   : > { %8155 = vmatpush3.bf16.msra.mxu1 %v9823_v28 }
 0xb1d   : > { %8157 = vmatprep.subr.bf16.mxu1 %v9828_v21 }
 0xb20   : > { %8159 = vmatpush3.bf16.msra.mxu1 %v9828_v21 }
 0xb21   : > { %8161 = vmatprep.subr.bf16.mxu1 %v9839_v45 }
 0xb24   : > { %8163 = vmatpush3.bf16.msra.mxu1 %v9839_v45 }
 0xb25   : > { %8165 = vmatprep.subr.bf16.mxu1 %v9850_v22 }
 0xb26   : > { %v7085_v51 = vpop.f32.mrb[72].mxu0 }
 0xb27   : > { %v2609_v12 = vpop.f32.mrb[73].mxu0  ;;  %v2649_v1 = vmul.f32 %v7085_v51, %v9513_v58 }
 0xb28   : > { %v2648_v37 = vmul.f32 %v2609_v12, %v9511_v55  ;;  %8167 = vmatpush3.bf16.msra.mxu1 %v9850_v22 }
 0xb2a   : > { %v7088_v52 = vpop.f32.mrb[74].mxu0  ;;  %7127 = vmatprep.mubr.f32.mxu1 %v2648_v37 }
 0xb2b   : > { %v2619_v28 = vpop.f32.mrb[75].mxu0  ;;  %7128 = vmatmul.mubr.f32.vlgmr.msra.gmra.mrb[32].mxu1 %v2649_v1  ;;  %v2651_v9 = vmul.f32 %v7088_v52, %v9525_v7 }
 0xb2c   : > { %v2650_v21 = vmul.f32 %v2619_v28, %v9523_v4 }
 0xb2e   : > { %v7091_v62 = vpop.f32.mrb[76].mxu0  ;;  %7130 = vmatprep.mubr.f32.mxu1 %v2650_v21 }
 0xb2f   : > { %v2629_v45 = vpop.f32.mrb[77].mxu0  ;;  %7131 = vmatmul.mubr.f32.gmra.mrb[34].mxu1 %v2651_v9  ;;  %v2653_v10 = vmul.f32 %v7091_v62, %v9537_v18 }
 0xb30   : > { %v2652_v5 = vmul.f32 %v2629_v45, %v9535_v16 }
 0xb32   : > { %v7094_v57 = vpop.f32.mrb[78].mxu0  ;;  %7133 = vmatprep.mubr.f32.mxu1 %v2652_v5 }
 0xb33   : > { %v2639_v22 = vpop.f32.mrb[79].mxu0  ;;  %7134 = vmatmul.mubr.f32.gmra.mrb[36].mxu1 %v2653_v10  ;;  %v2655_v61 = vmul.f32 %v7094_v57, %v9549_v29 }
 0xb34   : > { %v2654_v47 = vmul.f32 %v2639_v22, %v9547_v26 }
 0xb36   : > { %7136 = vmatprep.mubr.f32.mxu1 %v2654_v47 }
 0xb37   : > { %7137 = vmatmul.mubr.f32.gmra.mrb[38].mxu1 %v2655_v61 }
 0xbfe   : > { %v7129_v63 = vpop.f32.mrb[32].mxu1 }
 0xbff   : > { %v2738_v59 = vpop.f32.mrb[33].mxu1  ;;  %v2780_v13 = vsel %vm908_vm1, %v7129_v63, -inf }
 0xc00   : > { %2781 = vmax.xlane.f32.xlu1 %v2780_v13  ;;  %v2777_v8 = vsel %vm908_vm1, %v2738_v59, -inf }
 0xc01   : > { %2778 = vmax.xlane.f32.xlu0 %v2777_v8 }
 0xc02   : > { %v7132_v14 = vpop.f32.mrb[34].mxu1 }
 0xc03   : > { %v2748_v34 = vpop.f32.mrb[35].mxu1  ;;  %v2786_v20 = vsel %vm908_vm1, %v7132_v14, -inf }
 0xc04   : > { %2787 = vmax.xlane.f32.xlu1 %v2786_v20  ;;  %v2783_v3 = vsel %vm908_vm1, %v2748_v34, -inf }
 0xc05   : > { %2784 = vmax.xlane.f32.xlu0 %v2783_v3 }
 0xc06   : > { %v7135_v43 = vpop.f32.mrb[36].mxu1 }
 0xc07   : > { %v2758_v2 = vpop.f32.mrb[37].mxu1  ;;  %v2792_v38 = vsel %vm908_vm1, %v7135_v43, -inf }
 0xc08   : > { %2793 = vmax.xlane.f32.xlu1 %v2792_v38  ;;  %v2789_v41 = vsel %vm908_vm1, %v2758_v2, -inf }
 0xc09   : > { %2790 = vmax.xlane.f32.xlu0 %v2789_v41 }
 0xc0a   : > { %v7138_v30 = vpop.f32.mrb[38].mxu1 }
 0xc0b   : > { %v2768_v32 = vpop.f32.mrb[39].mxu1  ;;  %v2798_v42 = vsel %vm908_vm1, %v7138_v30, -inf }
 0xc0c   : > { %2799 = vmax.xlane.f32.xlu1 %v2798_v42  ;;  %v2795_v40 = vsel %vm908_vm1, %v2768_v32, -inf }
 0xc0d   : > { %2796 = vmax.xlane.f32.xlu0 %v2795_v40 }
 0xc8d   : > { %v2782_v53 = vpop.xlane.xlu1 %2781 }
 0xc8e   : > { %v2802_v17 = vsub.f32 %v7129_v63, %v2782_v53  ;;  %v2779_v33 = vpop.xlane.xlu0 %2778 }
 0xc8f   : > { %v2801_v50 = vsub.f32 %v2738_v59, %v2779_v33  ;;  %v3151_v33 = vld [vmem:[#allocation3 + $0x208] sm:$0xff] }
 0xc90   : > { %v2811_v49 = vmul.f32 1.442695, %v2802_v17  ;;  %v3150_v17 = vld [vmem:[#allocation3 + $0x200] sm:$0xff] }
 0xc91   : > { %v2809_v6 = vmul.f32 1.442695, %v2801_v50  ;;  %v2788_v60 = vpop.xlane.xlu1 %2787  ;;  %v10019_v50 = vpack.c.bf16 %v3151_v33, %v3150_v17  ;;  %v3152_v17 = vld [vmem:[#allocation3 + $0x210] sm:$0xff]  ;;  %v3153_v33 = vld [vmem:[#allocation3 + $0x218] sm:$0xff] }
 0xc92   : > { %8813 = vpow2.f32 %v2811_v49  ;;  %v2804_v51 = vsub.f32 %v7132_v14, %v2788_v60  ;;  %v2785_v12 = vpop.xlane.xlu0 %2784  ;;  %v3012_v49 = vld [vmem:[#allocation6 + $0x180] sm:$0xff]  ;;  %v3014_v60 = vld [vmem:[#allocation6 + $0x190] sm:$0xff] }
 0xc93   : > { %8815 = vpow2.f32 %v2809_v6  ;;  %v2803_v37 = vsub.f32 %v2748_v34, %v2785_v12  ;;  %8201 = vmatprep.subr.bf16.mxu0 %v10019_v50  ;;  %v3013_v6 = vld [vmem:[#allocation6 + $0x188] sm:$0xff]  ;;  %v3015_v12 = vld [vmem:[#allocation6 + $0x198] sm:$0xff] }
 0xc94   : > { %v2815_v1 = vmul.f32 1.442695, %v2804_v51  ;;  %v8168_v51 = vpack.c.bf16 %v3013_v6, %v3012_v49 }
 0xc95   : > { %v2813_v52 = vmul.f32 1.442695, %v2803_v37  ;;  %v2794_v28 = vpop.xlane.xlu1 %2793  ;;  %v8172_v37 = vpack.c.bf16 %v3015_v12, %v3014_v60 }
 0xc96   : > { %8817 = vpow2.f32 %v2815_v1  ;;  %v2806_v21 = vsub.f32 %v7135_v43, %v2794_v28  ;;  %v2791_v9 = vpop.xlane.xlu0 %2790  ;;  %v3016_v1 = vld [vmem:[#allocation6 + $0x1a0] sm:$0xff]  ;;  %8169 = vmatprep.subr.bf16.mxu1 %v8168_v51 }
 0xc97   : > { %8819 = vpow2.f32 %v2813_v52  ;;  %v2805_v62 = vsub.f32 %v2758_v2, %v2791_v9  ;;  %v3017_v52 = vld [vmem:[#allocation6 + $0x1a8] sm:$0xff]  ;;  %8171 = vmatpush3.bf16.msra.mxu1 %v8168_v51  ;;  %v3019_v9 = vld [vmem:[#allocation6 + $0x1b8] sm:$0xff] }
 0xc98   : > { %v2819_v45 = vmul.f32 1.442695, %v2806_v21  ;;  %8173 = vmatprep.subr.bf16.mxu1 %v8172_v37  ;;  %v8176_v28 = vpack.c.bf16 %v3017_v52, %v3016_v1  ;;  %v3018_v21 = vld [vmem:[#allocation6 + $0x1b0] sm:$0xff]  ;;  %v3154_v52 = vld [vmem:[#allocation3 + $0x220] sm:$0xff] }
 0xc99   : > { %v2817_v5 = vmul.f32 1.442695, %v2805_v62  ;;  %v2800_v10 = vpop.xlane.xlu1 %2799  ;;  %v8180_v62 = vpack.c.bf16 %v3019_v9, %v3018_v21 }
 0xc9a   : > { %8821 = vpow2.f32 %v2819_v45  ;;  %v2808_v57 = vsub.f32 %v7138_v30, %v2800_v10  ;;  %v2797_v22 = vpop.xlane.xlu0 %2796  ;;  %v3020_v45 = vld [vmem:[#allocation6 + $0x1c0] sm:$0xff] }
 0xc9b   : > { %8823 = vpow2.f32 %v2817_v5  ;;  %v2807_v47 = vsub.f32 %v2768_v32, %v2797_v22  ;;  %8175 = vmatpush3.bf16.msra.mxu1 %v8172_v37  ;;  %v3021_v5 = vld [vmem:[#allocation6 + $0x1c8] sm:$0xff]  ;;  %v3023_v22 = vld [vmem:[#allocation6 + $0x1d8] sm:$0xff]  ;;  %v8204_v37 = vpack.c.bf16 %v3153_v33, %v3152_v17 }
 0xc9c   : > { %v9987_v61 = vpop.eup %8813  ;;  %v2823_v63 = vmul.f32 1.442695, %v2808_v57  ;;  %8177 = vmatprep.subr.bf16.mxu1 %v8176_v28  ;;  %v8184_v10 = vpack.c.bf16 %v3021_v5, %v3020_v45  ;;  %v3022_v57 = vld [vmem:[#allocation6 + $0x1d0] sm:$0xff]  ;;  %v3157_v5 = vld [vmem:[#allocation3 + $0x238] sm:$0xff] }
 0xc9d   : > { %v9989_v59 = vpop.eup %8815  ;;  %v2821_v13 = vmul.f32 1.442695, %v2807_v47  ;;  %v2828_v8 = vsel %vm908_vm1, %v9987_v61, 0.0  ;;  %v8188_v47 = vpack.c.bf16 %v3023_v22, %v3022_v57  ;;  %v3027_v17 = vld [vmem:[#allocation6 + $0x1f8] sm:$0xff] }
 0xc9e   : > { %8825 = vpow2.f32 %v2823_v63  ;;  %2829 = vadd.xlane.f32.xlu1 %v2828_v8  ;;  %v2825_v14 = vsel %vm908_vm1, %v9989_v59, 0.0  ;;  %v3024_v63 = vld [vmem:[#allocation6 + $0x1e0] sm:$0xff] }
 0xc9f   : > { %8827 = vpow2.f32 %v2821_v13  ;;  %2826 = vadd.xlane.f32.xlu0 %v2825_v14  ;;  %8179 = vmatpush3.bf16.msra.mxu1 %v8176_v28  ;;  %v3025_v13 = vld [vmem:[#allocation6 + $0x1e8] sm:$0xff] }
 0xca0   : > { %v9995_v34 = vpop.eup %8817  ;;  %8181 = vmatprep.subr.bf16.mxu1 %v8180_v62  ;;  %v8192_v8 = vpack.c.bf16 %v3025_v13, %v3024_v63  ;;  %v3155_v28 = vld [vmem:[#allocation3 + $0x228] sm:$0xff] }
 0xca1   : > { %v9997_v20 = vpop.eup %8819  ;;  %v2834_v3 = vsel %vm908_vm1, %v9995_v34, 0.0 }
 0xca2   : > { %2835 = vadd.xlane.f32.xlu1 %v2834_v3  ;;  %v2831_v43 = vsel %vm908_vm1, %v9997_v20, 0.0 }
 0xca3   : > { %2832 = vadd.xlane.f32.xlu0 %v2831_v43  ;;  %8183 = vmatpush3.bf16.msra.mxu1 %v8180_v62 }
 0xca4   : > { %v10003_v2 = vpop.eup %8821  ;;  %8185 = vmatprep.subr.bf16.mxu1 %v8184_v10 }
 0xca5   : > { %v10005_v38 = vpop.eup %8823  ;;  %v2840_v41 = vsel %vm908_vm1, %v10003_v2, 0.0 }
 0xca6   : > { %2841 = vadd.xlane.f32.xlu1 %v2840_v41  ;;  %v2837_v30 = vsel %vm908_vm1, %v10005_v38, 0.0 }
 0xca7   : > { %2838 = vadd.xlane.f32.xlu0 %v2837_v30  ;;  %8187 = vmatpush3.bf16.msra.mxu1 %v8184_v10 }
 0xca8   : > { %v10011_v32 = vpop.eup %8825  ;;  %8189 = vmatprep.subr.bf16.mxu1 %v8188_v47 }
 0xca9   : > { %v10013_v42 = vpop.eup %8827  ;;  %v2846_v40 = vsel %vm908_vm1, %v10011_v32, 0.0 }
 0xcaa   : > { %2847 = vadd.xlane.f32.xlu1 %v2846_v40  ;;  %v2843_v53 = vsel %vm908_vm1, %v10013_v42, 0.0 }
 0xcab   : > { %2844 = vadd.xlane.f32.xlu0 %v2843_v53  ;;  %8191 = vmatpush3.bf16.msra.mxu1 %v8188_v47  ;;  %v3159_v47 = vld [vmem:[#allocation3 + $0x248] sm:$0xff] }
 0xcac   : > { %8193 = vmatprep.subr.bf16.mxu1 %v8192_v8 }
 0xcaf   : > { %8195 = vmatpush3.bf16.msra.mxu1 %v8192_v8 }
 0xd2b   : > { %v2830_v14 = vpop.xlane.xlu1 %2829 }
 0xd2c   : > { %8829 = vrcp.f32 %v2830_v14  ;;  %v2827_v3 = vpop.xlane.xlu0 %2826 }
 0xd2d   : > { %8831 = vrcp.f32 %v2827_v3 }
 0xd2f   : > { %v2836_v43 = vpop.xlane.xlu1 %2835 }
 0xd30   : > { %8833 = vrcp.f32 %v2836_v43  ;;  %v2833_v41 = vpop.xlane.xlu0 %2832  ;;  %v3162_v43 = vld [vmem:[#allocation3 + $0x260] sm:$0xff] }
 0xd31   : > { %8835 = vrcp.f32 %v2833_v41  ;;  %v3163_v41 = vld [vmem:[#allocation3 + $0x268] sm:$0xff] }
 0xd33   : > { %v2842_v30 = vpop.xlane.xlu1 %2841 }
 0xd34   : > { %8837 = vrcp.f32 %v2842_v30  ;;  %v2839_v40 = vpop.xlane.xlu0 %2838  ;;  %v3164_v30 = vld [vmem:[#allocation3 + $0x270] sm:$0xff] }
 0xd35   : > { %8839 = vrcp.f32 %v2839_v40  ;;  %v3165_v40 = vld [vmem:[#allocation3 + $0x278] sm:$0xff] }
 0xd36   : > { %v8830_v53 = vpop.eup %8829 }
 0xd37   : > { %v8832_v49 = vpop.eup %8831  ;;  %v2848_v6 = vpop.xlane.xlu1 %2847  ;;  %v2858_v12 = vmul.f32 %v8830_v53, %v9987_v61  ;;  %v3156_v61 = vld [vmem:[#allocation3 + $0x230] sm:$0xff] }
 0xd38   : > { %8841 = vrcp.f32 %v2848_v6  ;;  %v2845_v60 = vpop.xlane.xlu0 %2844  ;;  %v2857_v51 = vmul.f32 %v8832_v49, %v9989_v59  ;;  %v8208_v59 = vpack.c.bf16 %v3155_v28, %v3154_v52  ;;  %v8212_v22 = vpack.c.bf16 %v3157_v5, %v3156_v61  ;;  %v3026_v53 = vld [vmem:[#allocation6 + $0x1f0] sm:$0xff]  ;;  %v3279_v49 = vld [vmem:[%s10619_s4] sm:$0xff]  ;;  %v3280_v6 = vld [vmem:[%s10619_s4 + $0x8] sm:$0xff] }
 0xd39   : > { %8843 = vrcp.f32 %v2845_v60  ;;  %v8196_v33 = vpack.c.bf16 %v3027_v17, %v3026_v53  ;;  %v10053_v60 = vpack.c.bf16 %v3280_v6, %v3279_v49  ;;  %v3284_v52 = vld [vmem:[%s10619_s4 + $0x28] sm:$0xff]  ;;  %v3289_v61 = vld [vmem:[%s10619_s4 + $0x50] sm:$0xff] }
 0xd3a   : > { %v8834_v1 = vpop.eup %8833  ;;  %7141 = vmatprep.mubr.msk.f32.mxu0 %vm908_vm1, %v2857_v51  ;;  %v3281_v51 = vld [vmem:[%s10619_s4 + $0x10] sm:$0xff] }
 0xd3b   : > { %v8836_v21 = vpop.eup %8835  ;;  %7142 = vmatmul.mubr.msk.f32.vlgmr.msra.gmra.mrb[80].mxu0 %vm908_vm1, %v2858_v12  ;;  %v2860_v62 = vmul.f32 %v8834_v1, %v9995_v34  ;;  %v3158_v34 = vld [vmem:[#allocation3 + $0x240] sm:$0xff]  ;;  %8197 = vmatprep.subr.bf16.mxu1 %v8196_v33  ;;  %v3282_v12 = vld [vmem:[%s10619_s4 + $0x18] sm:$0xff] }
 0xd3c   : > { %8203 = vmatpush3.bf16.msra.mxu0 %v10019_v50  ;;  %v2859_v9 = vmul.f32 %v8836_v21, %v9997_v20  ;;  %v8216_v14 = vpack.c.bf16 %v3159_v47, %v3158_v34  ;;  %8199 = vmatpush3.bf16.msra.mxu1 %v8196_v33  ;;  %v3283_v1 = vld [vmem:[%s10619_s4 + $0x20] sm:$0xff]  ;;  %v3285_v21 = vld [vmem:[%s10619_s4 + $0x30] sm:$0xff]  ;;  %v3294_v47 = vld [vmem:[%s10619_s4 + $0x78] sm:$0xff] }
 0xd3d   : > { %8205 = vmatprep.subr.bf16.mxu0 %v8204_v37  ;;  %v10073_v28 = vpack.c.bf16 %v3284_v52, %v3283_v1  ;;  %v3293_v34 = vld [vmem:[%s10619_s4 + $0x70] sm:$0xff] }
 0xd3e   : > { %v8838_v45 = vpop.eup %8837  ;;  %7144 = vmatprep.mubr.msk.f32.mxu0 %vm908_vm1, %v2859_v9  ;;  %v3286_v9 = vld [vmem:[%s10619_s4 + $0x38] sm:$0xff]  ;;  %v3775_v52 = vld [vmem:[#allocation3 + $0x290] sm:$0xff] }
 0xd3f   : > { %v8840_v10 = vpop.eup %8839  ;;  %7145 = vmatmul.mubr.msk.f32.gmra.mrb[82].mxu0 %vm908_vm1, %v2860_v62  ;;  %v2862_v50 = vmul.f32 %v8838_v45, %v10003_v2  ;;  %v3161_v2 = vld [vmem:[#allocation3 + $0x258] sm:$0xff]  ;;  %v10083_v62 = vpack.c.bf16 %v3286_v9, %v3285_v21  ;;  %v3288_v45 = vld [vmem:[%s10619_s4 + $0x48] sm:$0xff] }
 0xd40   : > { %8207 = vmatpush3.bf16.msra.mxu0 %v8204_v37  ;;  %v2861_v57 = vmul.f32 %v8840_v10, %v10005_v38  ;;  %v3160_v38 = vld [vmem:[#allocation3 + $0x250] sm:$0xff]  ;;  %v10063_v37 = vpack.c.bf16 %v3282_v12, %v3281_v51  ;;  %v3290_v10 = vld [vmem:[%s10619_s4 + $0x58] sm:$0xff] }
 0xd41   : > { %8209 = vmatprep.subr.bf16.mxu0 %v8208_v59  ;;  %v8220_v3 = vpack.c.bf16 %v3161_v2, %v3160_v38  ;;  %v3776_v21 = vld [vmem:[#allocation3 + $0x298] sm:$0xff] }
 0xd42   : > { %v8842_v20 = vpop.eup %8841  ;;  %7147 = vmatprep.mubr.msk.f32.mxu0 %vm908_vm1, %v2861_v57  ;;  %v10101_v57 = vpack.c.bf16 %v3290_v10, %v3289_v61  ;;  %v8300_v61 = vpack.c.bf16 %v3776_v21, %v3775_v52  ;;  %v3786_v52 = vld [vmem:[#allocation3 + $0x2e8] sm:$0xff] }
 0xd43   : > { %v8844_v63 = vpop.eup %8843  ;;  %7148 = vmatmul.mubr.msk.f32.gmra.mrb[84].mxu0 %vm908_vm1, %v2862_v50  ;;  %v2864_v8 = vmul.f32 %v8842_v20, %v10011_v32  ;;  %v8228_v32 = vpack.c.bf16 %v3165_v40, %v3164_v30  ;;  %v3291_v50 = vld [vmem:[%s10619_s4 + $0x60] sm:$0xff] }
 0xd44   : > { %8211 = vmatpush3.bf16.msra.mxu0 %v8208_v59  ;;  %v2863_v13 = vmul.f32 %v8844_v63, %v10013_v42  ;;  %v8224_v42 = vpack.c.bf16 %v3163_v41, %v3162_v43  ;;  %v3287_v59 = vld [vmem:[%s10619_s4 + $0x40] sm:$0xff]  ;;  %v10123_v63 = vpack.c.bf16 %v3294_v47, %v3293_v34 }
 0xd45   : > { %8213 = vmatprep.subr.bf16.mxu0 %v8212_v22  ;;  %v10096_v5 = vpack.c.bf16 %v3288_v45, %v3287_v59 }
 0xd46   : > { %7150 = vmatprep.mubr.msk.f32.mxu0 %vm908_vm1, %v2863_v13  ;;  %v3773_v13 = vld [vmem:[#allocation3 + $0x280] sm:$0xff] }
 0xd47   : > { %7151 = vmatmul.mubr.msk.f32.gmra.mrb[86].mxu0 %vm908_vm1, %v2864_v8  ;;  %v3774_v8 = vld [vmem:[#allocation3 + $0x288] sm:$0xff] }
 0xd48   : > { %8215 = vmatpush3.bf16.msra.mxu0 %v8212_v22  ;;  %7229 = vmatprep.mubr.f32.mxu0 %v9434_v11  ;;  %v3292_v22 = vld [vmem:[%s10619_s4 + $0x68] sm:$0xff] }
 0xd49   : > { %8217 = vmatprep.subr.bf16.mxu0 %v8216_v14  ;;  %v10112_v20 = vpack.c.bf16 %v3292_v22, %v3291_v50  ;;  %v3777_v50 = vld [vmem:[#allocation3 + $0x2a0] sm:$0xff]  ;;  %v3778_v22 = vld [vmem:[#allocation3 + $0x2a8] sm:$0xff] }
 0xd4c   : > { %8219 = vmatpush3.bf16.msra.mxu0 %v8216_v14  ;;  %v8296_v14 = vpack.c.bf16 %v3774_v8, %v3773_v13  ;;  %v8304_v8 = vpack.c.bf16 %v3778_v22, %v3777_v50 }
 0xd4d   : > { %8221 = vmatprep.subr.bf16.mxu0 %v8220_v3 }
 0xd50   : > { %8223 = vmatpush3.bf16.msra.mxu0 %v8220_v3 }
 0xd51   : > { %8225 = vmatprep.subr.bf16.mxu0 %v8224_v42 }
 0xd54   : > { %8227 = vmatpush3.bf16.msra.mxu0 %v8224_v42 }
 0xd55   : > { %8229 = vmatprep.subr.bf16.mxu0 %v8228_v32 }
 0xd58   : > { %8231 = vmatpush3.bf16.msra.mxu0 %v8228_v32 }
 0xd59   : > { %8233 = vmatprep.subr.bf16.mxu0 %v10053_v60 }
 0xd5b   : > { %7230 = vmatmul.mubr.f32.vlgmr.msra.gmra.mrb[88].mxu0 %v9440_v15 }
 0xd5c   : > { %7232 = vmatprep.mubr.f32.mxu0 %v9446_v19  ;;  %8235 = vmatpush3.bf16.msra.mxu0 %v10053_v60 }
 0xd5d   : > { %8237 = vmatprep.subr.bf16.mxu0 %v10063_v37 }
 0xd5f   : > { %7233 = vmatmul.mubr.f32.gmra.mrb[90].mxu0 %v9452_v23 }
 0xd60   : > { %7235 = vmatprep.mubr.f32.mxu0 %v9458_v27  ;;  %8239 = vmatpush3.bf16.msra.mxu0 %v10063_v37 }
 0xd61   : > { %8241 = vmatprep.subr.bf16.mxu0 %v10073_v28 }
 0xd63   : > { %7236 = vmatmul.mubr.f32.gmra.mrb[92].mxu0 %v9464_v31 }
 0xd64   : > { %7238 = vmatprep.mubr.f32.mxu0 %v9470_v35  ;;  %8243 = vmatpush3.bf16.msra.mxu0 %v10073_v28 }
 0xd65   : > { %8245 = vmatprep.subr.bf16.mxu0 %v10083_v62 }
 0xd67   : > { %7239 = vmatmul.mubr.f32.gmra.mrb[94].mxu0 %v9476_v39 }
 0xd68   : > { %8247 = vmatpush3.bf16.msra.mxu0 %v10083_v62 }
 0xd69   : > { %8249 = vmatprep.subr.bf16.mxu0 %v10096_v5 }
 0xd6c   : > { %8251 = vmatpush3.bf16.msra.mxu0 %v10096_v5 }
 0xd6d   : > { %8253 = vmatprep.subr.bf16.mxu0 %v10101_v57 }
 0xd70   : > { %8255 = vmatpush3.bf16.msra.mxu0 %v10101_v57 }
 0xd71   : > { %8257 = vmatprep.subr.bf16.mxu0 %v10112_v20 }
 0xd74   : > { %8259 = vmatpush3.bf16.msra.mxu0 %v10112_v20 }
 0xd75   : > { %8261 = vmatprep.subr.bf16.mxu0 %v10123_v63 }
 0xd78   : > { %8263 = vmatpush3.bf16.msra.mxu0 %v10123_v63 }
 0xd79   : > { %8297 = vmatprep.subr.bf16.mxu0 %v8296_v14 }
 0xe0e   : > { %v7143_v38 = vpop.f32.mrb[80].mxu0 }
 0xe0f   : > { %v2956_v2 = vpop.f32.mrb[81].mxu0  ;;  %v3004_v43 = vmul.f32 %v7143_v38, %v9637_v25 }
 0xe10   : > { %v3003_v3 = vmul.f32 %v2956_v2, %v9634_v24  ;;  %v3779_v2 = vld [vmem:[#allocation3 + $0x2b0] sm:$0xff] }
 0xe12   : > { %v7146_v41 = vpop.f32.mrb[82].mxu0  ;;  %7185 = vmatprep.mubr.f32.mxu1 %v3003_v3  ;;  %v3780_v3 = vld [vmem:[#allocation3 + $0x2b8] sm:$0xff] }
 0xe13   : > { %v2966_v42 = vpop.f32.mrb[83].mxu0  ;;  %7186 = vmatmul.mubr.f32.vlgmr.msra.gmra.mrb[16].mxu1 %v3004_v43  ;;  %v3006_v40 = vmul.f32 %v7146_v41, %v9653_v36 }
 0xe14   : > { %v3005_v30 = vmul.f32 %v2966_v42, %v9650_v44 }
 0xe16   : > { %v7149_v32 = vpop.f32.mrb[84].mxu0  ;;  %7188 = vmatprep.mubr.f32.mxu1 %v3005_v30  ;;  %v8308_v30 = vpack.c.bf16 %v3780_v3, %v3779_v2 }
 0xe17   : > { %v2976_v53 = vpop.f32.mrb[85].mxu0  ;;  %7189 = vmatmul.mubr.f32.gmra.mrb[18].mxu1 %v3006_v40  ;;  %v3008_v33 = vmul.f32 %v7149_v32, %v9670_v56  ;;  %v3782_v32 = vld [vmem:[#allocation3 + $0x2c8] sm:$0xff] }
 0xe18   : > { %v3007_v17 = vmul.f32 %v2976_v53, %v9666_v46 }
 0xe1a   : > { %v7152_v49 = vpop.f32.mrb[86].mxu0  ;;  %7191 = vmatprep.mubr.f32.mxu1 %v3007_v17 }
 0xe1b   : > { %v2986_v6 = vpop.f32.mrb[87].mxu0  ;;  %7192 = vmatmul.mubr.f32.gmra.mrb[20].mxu1 %v3008_v33  ;;  %v3010_v12 = vmul.f32 %v7152_v49, %v9688_v54 }
 0xe1c   : > { %v3009_v51 = vmul.f32 %v2986_v6, %v9684_v48  ;;  %v3783_v6 = vld [vmem:[#allocation3 + $0x2d0] sm:$0xff] }
 0xe1e   : > { %7194 = vmatprep.mubr.f32.mxu1 %v3009_v51  ;;  %v3784_v51 = vld [vmem:[#allocation3 + $0x2d8] sm:$0xff] }
 0xe1f   : > { %7195 = vmatmul.mubr.f32.gmra.mrb[22].mxu1 %v3010_v12  ;;  %v8316_v12 = vpack.c.bf16 %v3784_v51, %v3783_v6 }
 0xe2e   : > { %v7231_v1 = vpop.f32.mrb[88].mxu0 }
 0xe2f   : > { %v3232_v9 = vpop.f32.mrb[89].mxu0  ;;  %v3272_v45 = vmul.f32 %v7231_v1, %v9513_v58  ;;  %v3785_v1 = vld [vmem:[#allocation3 + $0x2e0] sm:$0xff] }
 0xe30   : > { %v3271_v59 = vmul.f32 %v3232_v9, %v9511_v55  ;;  %v8320_v21 = vpack.c.bf16 %v3786_v52, %v3785_v1  ;;  %v3787_v9 = vld [vmem:[#allocation3 + $0x2f0] sm:$0xff] }
 0xe32   : > { %v7234_v10 = vpop.f32.mrb[90].mxu0  ;;  %7273 = vmatprep.mubr.f32.mxu0 %v3271_v59  ;;  %v3788_v59 = vld [vmem:[#allocation3 + $0x2f8] sm:$0xff] }
 0xe33   : > { %v3242_v34 = vpop.f32.mrb[91].mxu0  ;;  %7274 = vmatmul.mubr.f32.vlgmr.msra.gmra.mrb[96].mxu0 %v3272_v45  ;;  %v3274_v13 = vmul.f32 %v7234_v10, %v9525_v7  ;;  %v8324_v45 = vpack.c.bf16 %v3788_v59, %v3787_v9 }
 0xe34   : > { %v3273_v47 = vmul.f32 %v3242_v34, %v9523_v4  ;;  %8299 = vmatpush3.bf16.msra.mxu0 %v8296_v14  ;;  %v3781_v14 = vld [vmem:[#allocation3 + $0x2c0] sm:$0xff] }
 0xe35   : > { %8301 = vmatprep.subr.bf16.mxu0 %v8300_v61  ;;  %v8312_v49 = vpack.c.bf16 %v3782_v32, %v3781_v14 }
 0xe36   : > { %v7237_v38 = vpop.f32.mrb[92].mxu0  ;;  %7276 = vmatprep.mubr.f32.mxu0 %v3273_v47 }
 0xe37   : > { %v3252_v43 = vpop.f32.mrb[93].mxu0  ;;  %7277 = vmatmul.mubr.f32.gmra.mrb[98].mxu0 %v3274_v13  ;;  %v3276_v42 = vmul.f32 %v7237_v38, %v9537_v18 }
 0xe38   : > { %v3275_v41 = vmul.f32 %v3252_v43, %v9535_v16  ;;  %8303 = vmatpush3.bf16.msra.mxu0 %v8300_v61 }
 0xe39   : > { %8305 = vmatprep.subr.bf16.mxu0 %v8304_v8 }
 0xe3a   : > { %v7240_v40 = vpop.f32.mrb[94].mxu0  ;;  %7279 = vmatprep.mubr.f32.mxu0 %v3275_v41 }
 0xe3b   : > { %v3262_v53 = vpop.f32.mrb[95].mxu0  ;;  %7280 = vmatmul.mubr.f32.gmra.mrb[100].mxu0 %v3276_v42  ;;  %v3278_v33 = vmul.f32 %v7240_v40, %v9549_v29 }
 0xe3c   : > { %v3277_v17 = vmul.f32 %v3262_v53, %v9547_v26  ;;  %8307 = vmatpush3.bf16.msra.mxu0 %v8304_v8 }
 0xe3d   : > { %8309 = vmatprep.subr.bf16.mxu0 %v8308_v30 }
 0xe3e   : > { %7282 = vmatprep.mubr.f32.mxu0 %v3277_v17 }
 0xe3f   : > { %7283 = vmatmul.mubr.f32.gmra.mrb[102].mxu0 %v3278_v33 }
 0xe40   : > { %8311 = vmatpush3.bf16.msra.mxu0 %v8308_v30  ;;  %7375 = vmatprep.mubr.f32.mxu0 %v9434_v11 }
 0xe41   : > { %8313 = vmatprep.subr.bf16.mxu0 %v8312_v49 }
 0xe44   : > { %8315 = vmatpush3.bf16.msra.mxu0 %v8312_v49 }
 0xe45   : > { %8317 = vmatprep.subr.bf16.mxu0 %v8316_v12 }
 0xe48   : > { %8319 = vmatpush3.bf16.msra.mxu0 %v8316_v12  ;;  %v3488_v12 = vld [vmem:[%s10620_s5] sm:$0xff] }
 0xe49   : > { %8321 = vmatprep.subr.bf16.mxu0 %v8320_v21  ;;  %7285 = vmatprep.subr.mxu1 %v3488_v12 }
 0xe4a   : > { %7286 = vmatpush3.msra.mxu1 %v3488_v12 }
 0xe4c   : > { %8323 = vmatpush3.bf16.msra.mxu0 %v8320_v21 }
 0xe4d   : > { %8325 = vmatprep.subr.bf16.mxu0 %v8324_v45 }
 0xe50   : > { %8327 = vmatpush3.bf16.msra.mxu0 %v8324_v45 }
 0xe51   : > { %7431 = vmatprep.subr.mxu0 %v3488_v12 }
 0xe53   : > { %7376 = vmatmul.mubr.f32.vlgmr.msra.gmra.mrb[104].mxu0 %v9440_v15 }
 0xe54   : > { %7378 = vmatprep.mubr.f32.mxu0 %v9446_v19  ;;  %7432 = vmatpush3.msra.mxu0 %v3488_v12 }
 0xe57   : > { %7379 = vmatmul.mubr.f32.gmra.mrb[106].mxu0 %v9452_v23 }
 0xe58   : > { %7381 = vmatprep.mubr.f32.mxu0 %v9458_v27 }
 0xe5b   : > { %7382 = vmatmul.mubr.f32.gmra.mrb[108].mxu0 %v9464_v31 }
 0xe5c   : > { %7384 = vmatprep.mubr.f32.mxu0 %v9470_v35 }
 0xe5f   : > { %7385 = vmatmul.mubr.f32.gmra.mrb[110].mxu0 %v9476_v39 }
 0xf06   : > { %v7275_v61 = vpop.f32.mrb[96].mxu0 }
 0xf07   : > { %v3361_v10 = vpop.f32.mrb[97].mxu0  ;;  %v3403_v50 = vsel %vm908_vm1, %v7275_v61, -inf }
 0xf08   : > { %3404 = vmax.xlane.f32.xlu1 %v3403_v50  ;;  %v3400_v22 = vsel %vm908_vm1, %v3361_v10, -inf }
 0xf09   : > { %3401 = vmax.xlane.f32.xlu0 %v3400_v22 }
 0xf0a   : > { %v7278_v34 = vpop.f32.mrb[98].mxu0 }
 0xf0b   : > { %v3371_v47 = vpop.f32.mrb[99].mxu0  ;;  %v3409_v13 = vsel %vm908_vm1, %v7278_v34, -inf }
 0xf0c   : > { %3410 = vmax.xlane.f32.xlu1 %v3409_v13  ;;  %v3406_v8 = vsel %vm908_vm1, %v3371_v47, -inf }
 0xf0d   : > { %3407 = vmax.xlane.f32.xlu0 %v3406_v8 }
 0xf0e   : > { %v7281_v38 = vpop.f32.mrb[100].mxu0 }
 0xf0f   : > { %v3381_v2 = vpop.f32.mrb[101].mxu0  ;;  %v3415_v3 = vsel %vm908_vm1, %v7281_v38, -inf }
 0xf10   : > { %3416 = vmax.xlane.f32.xlu1 %v3415_v3  ;;  %v3412_v43 = vsel %vm908_vm1, %v3381_v2, -inf }
 0xf11   : > { %3413 = vmax.xlane.f32.xlu0 %v3412_v43 }
 0xf12   : > { %v7284_v41 = vpop.f32.mrb[102].mxu0 }
 0xf13   : > { %v3391_v42 = vpop.f32.mrb[103].mxu0  ;;  %v3421_v30 = vsel %vm908_vm1, %v7284_v41, -inf }
 0xf14   : > { %3422 = vmax.xlane.f32.xlu1 %v3421_v30  ;;  %v3418_v40 = vsel %vm908_vm1, %v3391_v42, -inf }
 0xf15   : > { %3419 = vmax.xlane.f32.xlu0 %v3418_v40 }
 0xf26   : > { %v10159_v14 = vpop.f32.mrb[104].mxu0 }
 0xf27   : > { %v10161_v32 = vpop.f32.mrb[105].mxu0 }
 0xf2a   : > { %v10163_v53 = vpop.f32.mrb[106].mxu0 }
 0xf2b   : > { %v10165_v17 = vpop.f32.mrb[107].mxu0 }
 0xf2e   : > { %v10167_v33 = vpop.f32.mrb[108].mxu0 }
 0xf2f   : > { %v10169_v49 = vpop.f32.mrb[109].mxu0 }
 0xf32   : > { %v10171_v6 = vpop.f32.mrb[110].mxu0 }
 0xf33   : > { %v10173_v51 = vpop.f32.mrb[111].mxu0 }
 0xf95   : > { %v3405_v1 = vpop.xlane.xlu1 %3404 }
 0xf96   : > { %v3425_v52 = vsub.f32 %v7275_v61, %v3405_v1  ;;  %v3402_v21 = vpop.xlane.xlu0 %3401 }
 0xf97   : > { %v3424_v9 = vsub.f32 %v3361_v10, %v3402_v21 }
 0xf98   : > { %v3434_v59 = vmul.f32 1.442695, %v3425_v52 }
 0xf99   : > { %v3432_v45 = vmul.f32 1.442695, %v3424_v9  ;;  %v3411_v50 = vpop.xlane.xlu1 %3410 }
 0xf9a   : > { %8845 = vpow2.f32 %v3434_v59  ;;  %v3427_v22 = vsub.f32 %v7278_v34, %v3411_v50  ;;  %v3408_v13 = vpop.xlane.xlu0 %3407 }
 0xf9b   : > { %8847 = vpow2.f32 %v3432_v45  ;;  %v3426_v8 = vsub.f32 %v3371_v47, %v3408_v13 }
 0xf9c   : > { %v3438_v3 = vmul.f32 1.442695, %v3427_v22 }
 0xf9d   : > { %v3436_v43 = vmul.f32 1.442695, %v3426_v8  ;;  %v3417_v30 = vpop.xlane.xlu1 %3416 }
 0xf9e   : > { %8849 = vpow2.f32 %v3438_v3  ;;  %v3429_v40 = vsub.f32 %v7281_v38, %v3417_v30  ;;  %v3414_v0 = vpop.xlane.xlu0 %3413 }
 0xf9f   : > { %8851 = vpow2.f32 %v3436_v43  ;;  %v3428_v12 = vsub.f32 %v3381_v2, %v3414_v0 }
 0xfa0   : > { %v3442_v39 = vmul.f32 1.442695, %v3429_v40  ;;  %v3635_v40 = vld [vmem:[#allocation6 + $0x200] sm:$0xff] }
 0xfa1   : > { %v3440_v61 = vmul.f32 1.442695, %v3428_v12  ;;  %v3423_v1 = vpop.xlane.xlu1 %3422  ;;  %v3636_v12 = vld [vmem:[#allocation6 + $0x208] sm:$0xff] }
 0xfa2   : > { %8853 = vpow2.f32 %v3442_v39  ;;  %v3431_v10 = vsub.f32 %v7284_v41, %v3423_v1  ;;  %v3420_v52 = vpop.xlane.xlu0 %3419 }
 0xfa3   : > { %8855 = vpow2.f32 %v3440_v61  ;;  %v3430_v21 = vsub.f32 %v3391_v42, %v3420_v52  ;;  %v8264_v61 = vpack.c.bf16 %v3636_v12, %v3635_v40 }
 0xfa4   : > { %v8846_v34 = vpop.eup %8845  ;;  %v3446_v9 = vmul.f32 1.442695, %v3431_v10 }
 0xfa5   : > { %v8848_v59 = vpop.eup %8847  ;;  %v3444_v47 = vmul.f32 1.442695, %v3430_v21  ;;  %v3451_v45 = vsel %vm908_vm1, %v8846_v34, 0.0  ;;  %8265 = vmatprep.subr.bf16.mxu1 %v8264_v61 }
 0xfa6   : > { %8857 = vpow2.f32 %v3446_v9  ;;  %3452 = vadd.xlane.f32.xlu1 %v3451_v45  ;;  %v3448_v38 = vsel %vm908_vm1, %v8848_v59, 0.0 }
 0xfa7   : > { %8859 = vpow2.f32 %v3444_v47  ;;  %3449 = vadd.xlane.f32.xlu0 %v3448_v38  ;;  %v3637_v38 = vld [vmem:[#allocation6 + $0x210] sm:$0xff] }
 0xfa8   : > { %v8850_v0 = vpop.eup %8849 }
 0xfa9   : > { %v8852_v2 = vpop.eup %8851  ;;  %v3457_v39 = vsel %vm908_vm1, %v8850_v0, 0.0 }
 0xfaa   : > { %3458 = vadd.xlane.f32.xlu1 %v3457_v39  ;;  %v3454_v41 = vsel %vm908_vm1, %v8852_v2, 0.0  ;;  %v3638_v39 = vld [vmem:[#allocation6 + $0x218] sm:$0xff] }
 0xfab   : > { %3455 = vadd.xlane.f32.xlu0 %v3454_v41  ;;  %v8268_v40 = vpack.c.bf16 %v3638_v39, %v3637_v38 }
 0xfac   : > { %v8854_v42 = vpop.eup %8853 }
 0xfad   : > { %v8856_v50 = vpop.eup %8855  ;;  %v3463_v22 = vsel %vm908_vm1, %v8854_v42, 0.0 }
 0xfae   : > { %3464 = vadd.xlane.f32.xlu1 %v3463_v22  ;;  %v3460_v13 = vsel %vm908_vm1, %v8856_v50, 0.0 }
 0xfaf   : > { %3461 = vadd.xlane.f32.xlu0 %v3460_v13 }
 0xfb0   : > { %v10184_v8 = vpop.eup %8857 }
 0xfb1   : > { %v8860_v3 = vpop.eup %8859  ;;  %v3469_v43 = vsel %vm908_vm1, %v10184_v8, 0.0 }
 0xfb2   : > { %3470 = vadd.xlane.f32.xlu1 %v3469_v43  ;;  %v3466_v30 = vsel %vm908_vm1, %v8860_v3, 0.0 }
 0xfb3   : > { %3467 = vadd.xlane.f32.xlu0 %v3466_v30 }
0x1033   : > { %v3453_v1 = vpop.xlane.xlu1 %3452 }
0x1034   : > { %8861 = vrcp.f32 %v3453_v1  ;;  %v3450_v10 = vpop.xlane.xlu0 %3449  ;;  %v3639_v1 = vld [vmem:[#allocation6 + $0x220] sm:$0xff] }
0x1035   : > { %8863 = vrcp.f32 %v3450_v10  ;;  %v3640_v10 = vld [vmem:[#allocation6 + $0x228] sm:$0xff] }
0x1037   : > { %v3459_v52 = vpop.xlane.xlu1 %3458 }
0x1038   : > { %8865 = vrcp.f32 %v3459_v52  ;;  %v3456_v21 = vpop.xlane.xlu0 %3455 }
0x1039   : > { %8867 = vrcp.f32 %v3456_v21 }
0x103b   : > { %v3465_v9 = vpop.xlane.xlu1 %3464 }
0x103c   : > { %8869 = vrcp.f32 %v3465_v9  ;;  %v3462_v47 = vpop.xlane.xlu0 %3461 }
0x103d   : > { %8871 = vrcp.f32 %v3462_v47  ;;  %v8272_v47 = vpack.c.bf16 %v3640_v10, %v3639_v1 }
0x103e   : > { %v8862_v45 = vpop.eup %8861 }
0x103f   : > { %v8864_v41 = vpop.eup %8863  ;;  %v3471_v22 = vpop.xlane.xlu1 %3470  ;;  %v3481_v30 = vmul.f32 %v8862_v45, %v8846_v34  ;;  %v3642_v34 = vld [vmem:[#allocation6 + $0x238] sm:$0xff] }
0x1040   : > { %8873 = vrcp.f32 %v3471_v22  ;;  %v3468_v13 = vpop.xlane.xlu0 %3467  ;;  %v3480_v43 = vmul.f32 %v8864_v41, %v8848_v59  ;;  %v3641_v59 = vld [vmem:[#allocation6 + $0x230] sm:$0xff] }
0x1041   : > { %8875 = vrcp.f32 %v3468_v13  ;;  %v8276_v41 = vpack.c.bf16 %v3642_v34, %v3641_v59 }
0x1042   : > { %v8866_v12 = vpop.eup %8865  ;;  %7287 = vmatprep.mubr.msk.f32.mxu1 %vm908_vm1, %v3480_v43 }
0x1043   : > { %v8868_v52 = vpop.eup %8867  ;;  %7288 = vmatmul.mubr.msk.f32.vlgmr.msra.gmra.mrb[40].mxu1 %vm908_vm1, %v3481_v30  ;;  %v3483_v9 = vmul.f32 %v8866_v12, %v8850_v0  ;;  %v3644_v0 = vld [vmem:[#allocation6 + $0x248] sm:$0xff] }
0x1044   : > { %v3482_v21 = vmul.f32 %v8868_v52, %v8852_v2  ;;  %8267 = vmatpush3.bf16.msra.mxu1 %v8264_v61  ;;  %v3643_v2 = vld [vmem:[#allocation6 + $0x240] sm:$0xff]  ;;  %v3648_v12 = vld [vmem:[#allocation6 + $0x268] sm:$0xff] }
0x1045   : > { %8269 = vmatprep.subr.bf16.mxu1 %v8268_v40  ;;  %v8280_v30 = vpack.c.bf16 %v3644_v0, %v3643_v2 }
0x1046   : > { %v8870_v35 = vpop.eup %8869  ;;  %7290 = vmatprep.mubr.msk.f32.mxu1 %vm908_vm1, %v3482_v21 }
0x1047   : > { %v8872_v45 = vpop.eup %8871  ;;  %7291 = vmatmul.mubr.msk.f32.gmra.mrb[42].mxu1 %vm908_vm1, %v3483_v9  ;;  %v3485_v39 = vmul.f32 %v8870_v35, %v8854_v42  ;;  %v3646_v35 = vld [vmem:[#allocation6 + $0x258] sm:$0xff] }
0x1048   : > { %v3484_v38 = vmul.f32 %v8872_v45, %v8856_v50  ;;  %8271 = vmatpush3.bf16.msra.mxu1 %v8268_v40  ;;  %v3645_v50 = vld [vmem:[#allocation6 + $0x250] sm:$0xff]  ;;  %v3647_v40 = vld [vmem:[#allocation6 + $0x260] sm:$0xff] }
0x1049   : > { %8273 = vmatprep.subr.bf16.mxu1 %v8272_v47  ;;  %v8284_v42 = vpack.c.bf16 %v3646_v35, %v3645_v50  ;;  %v8288_v1 = vpack.c.bf16 %v3648_v12, %v3647_v40 }
0x104a   : > { %v8874_v22 = vpop.eup %8873  ;;  %7293 = vmatprep.mubr.msk.f32.mxu1 %vm908_vm1, %v3484_v38 }
0x104b   : > { %v8876_v61 = vpop.eup %8875  ;;  %7294 = vmatmul.mubr.msk.f32.gmra.mrb[44].mxu1 %vm908_vm1, %v3485_v39  ;;  %v3487_v43 = vmul.f32 %v8874_v22, %v10184_v8  ;;  %v3649_v8 = vld [vmem:[#allocation6 + $0x270] sm:$0xff] }
0x104c   : > { %v3486_v13 = vmul.f32 %v8876_v61, %v8860_v3  ;;  %8275 = vmatpush3.bf16.msra.mxu1 %v8272_v47  ;;  %v3650_v3 = vld [vmem:[#allocation6 + $0x278] sm:$0xff] }
0x104d   : > { %8277 = vmatprep.subr.bf16.mxu1 %v8276_v41  ;;  %v8292_v10 = vpack.c.bf16 %v3650_v3, %v3649_v8 }
0x104e   : > { %7296 = vmatprep.mubr.msk.f32.mxu1 %vm908_vm1, %v3486_v13 }
0x104f   : > { %7297 = vmatmul.mubr.msk.f32.gmra.mrb[46].mxu1 %vm908_vm1, %v3487_v43  ;;  %v3894_v43 = vmul.f32 %v10161_v32, %v9511_v55 }
0x1050   : > { %8279 = vmatpush3.bf16.msra.mxu1 %v8276_v41 }
0x1051   : > { %8281 = vmatprep.subr.bf16.mxu1 %v8280_v30 }
0x1054   : > { %8283 = vmatpush3.bf16.msra.mxu1 %v8280_v30 }
0x1055   : > { %8285 = vmatprep.subr.bf16.mxu1 %v8284_v42 }
0x1058   : > { %8287 = vmatpush3.bf16.msra.mxu1 %v8284_v42 }
0x1059   : > { %8289 = vmatprep.subr.bf16.mxu1 %v8288_v1 }
0x105c   : > { %8291 = vmatpush3.bf16.msra.mxu1 %v8288_v1 }
0x105d   : > { %8293 = vmatprep.subr.bf16.mxu1 %v8292_v10 }
0x1060   : > { %8295 = vmatpush3.bf16.msra.mxu1 %v8292_v10 }
0x1061   : > { %8329 = vmatprep.subr.bf16.mxu1 %v10053_v60 }
0x1116   : > { %v7289_v52 = vpop.f32.mrb[40].mxu1 }
0x1117   : > { %v3579_v21 = vpop.f32.mrb[41].mxu1  ;;  %v3627_v47 = vmul.f32 %v7289_v52, %v9637_v25 }
0x1118   : > { %v3626_v9 = vmul.f32 %v3579_v21, %v9634_v24 }
0x111a   : > { %v7292_v59 = vpop.f32.mrb[42].mxu1  ;;  %7331 = vmatprep.mubr.f32.mxu1 %v3626_v9 }
0x111b   : > { %v3589_v34 = vpop.f32.mrb[43].mxu1  ;;  %7332 = vmatmul.mubr.f32.vlgmr.msra.gmra.mrb[16].mxu1 %v3627_v47  ;;  %v3629_v38 = vmul.f32 %v7292_v59, %v9653_v36 }
0x111c   : > { %v3628_v45 = vmul.f32 %v3589_v34, %v9650_v44  ;;  %8331 = vmatpush3.bf16.msra.mxu1 %v10053_v60 }
0x111d   : > { %8333 = vmatprep.subr.bf16.mxu1 %v10063_v37 }
0x111e   : > { %v7295_v39 = vpop.f32.mrb[44].mxu1  ;;  %7334 = vmatprep.mubr.f32.mxu1 %v3628_v45 }
0x111f   : > { %v3599_v41 = vpop.f32.mrb[45].mxu1  ;;  %7335 = vmatmul.mubr.f32.gmra.mrb[18].mxu1 %v3629_v38  ;;  %v3631_v2 = vmul.f32 %v7295_v39, %v9670_v56 }
0x1120   : > { %v3630_v22 = vmul.f32 %v3599_v41, %v9666_v46  ;;  %8335 = vmatpush3.bf16.msra.mxu1 %v10063_v37  ;;  %v3895_v37 = vmul.f32 %v10159_v14, %v9513_v58 }
0x1121   : > { %8337 = vmatprep.subr.bf16.mxu1 %v10073_v28 }
0x1122   : > { %v7298_v0 = vpop.f32.mrb[46].mxu1  ;;  %7337 = vmatprep.mubr.f32.mxu1 %v3630_v22 }
0x1123   : > { %v3609_v61 = vpop.f32.mrb[47].mxu1  ;;  %7338 = vmatmul.mubr.f32.gmra.mrb[20].mxu1 %v3631_v2  ;;  %v3633_v13 = vmul.f32 %v7298_v0, %v9688_v54 }
0x1124   : > { %v3632_v60 = vmul.f32 %v3609_v61, %v9684_v48  ;;  %8339 = vmatpush3.bf16.msra.mxu1 %v10073_v28  ;;  %v3896_v28 = vmul.f32 %v10165_v17, %v9523_v4 }
0x1125   : > { %8341 = vmatprep.subr.bf16.mxu1 %v10083_v62 }
0x1126   : > { %7340 = vmatprep.mubr.f32.mxu1 %v3632_v60 }
0x1127   : > { %7341 = vmatmul.mubr.f32.gmra.mrb[22].mxu1 %v3633_v13 }
0x1128   : > { %8343 = vmatpush3.bf16.msra.mxu1 %v10083_v62  ;;  %7419 = vmatprep.mubr.f32.mxu1 %v3894_v43  ;;  %v3897_v62 = vmul.f32 %v10163_v53, %v9525_v7 }
0x1129   : > { %8345 = vmatprep.subr.bf16.mxu1 %v10096_v5 }
0x112c   : > { %8347 = vmatpush3.bf16.msra.mxu1 %v10096_v5  ;;  %v3898_v5 = vmul.f32 %v10169_v49, %v9535_v16 }
0x112d   : > { %8349 = vmatprep.subr.bf16.mxu1 %v10101_v57 }
0x1130   : > { %8351 = vmatpush3.bf16.msra.mxu1 %v10101_v57  ;;  %v3899_v57 = vmul.f32 %v10167_v33, %v9537_v18 }
0x1131   : > { %8353 = vmatprep.subr.bf16.mxu1 %v10112_v20 }
0x1134   : > { %8355 = vmatpush3.bf16.msra.mxu1 %v10112_v20  ;;  %v3900_v20 = vmul.f32 %v10173_v51, %v9547_v26 }
0x1135   : > { %8357 = vmatprep.subr.bf16.mxu1 %v10123_v63 }
0x1138   : > { %8359 = vmatpush3.bf16.msra.mxu1 %v10123_v63  ;;  %v3901_v63 = vmul.f32 %v10171_v6, %v9549_v29 }
0x113b   : > { %7420 = vmatmul.mubr.f32.vlgmr.msra.gmra.mrb[48].mxu1 %v3895_v37 }
0x113c   : > { %7422 = vmatprep.mubr.f32.mxu1 %v3896_v28 }
0x113f   : > { %7423 = vmatmul.mubr.f32.gmra.mrb[50].mxu1 %v3897_v62 }
0x1140   : > { %7425 = vmatprep.mubr.f32.mxu1 %v3898_v5 }
0x1143   : > { %7426 = vmatmul.mubr.f32.gmra.mrb[52].mxu1 %v3899_v57 }
0x1144   : > { %7428 = vmatprep.mubr.f32.mxu1 %v3900_v20 }
0x1147   : > { %7429 = vmatmul.mubr.f32.gmra.mrb[54].mxu1 %v3901_v63 }
0x120e   : > { %v7421_v14 = vpop.f32.mrb[48].mxu1 }
0x120f   : > { %v3984_v32 = vpop.f32.mrb[49].mxu1  ;;  %v4026_v53 = vsel %vm908_vm1, %v7421_v14, -inf }
0x1210   : > { %4027 = vmax.xlane.f32.xlu1 %v4026_v53  ;;  %v4023_v17 = vsel %vm908_vm1, %v3984_v32, -inf }
0x1211   : > { %4024 = vmax.xlane.f32.xlu0 %v4023_v17 }
0x1212   : > { %v7424_v49 = vpop.f32.mrb[50].mxu1 }
0x1213   : > { %v3994_v30 = vpop.f32.mrb[51].mxu1  ;;  %v4032_v33 = vsel %vm908_vm1, %v7424_v49, -inf }
0x1214   : > { %4033 = vmax.xlane.f32.xlu1 %v4032_v33  ;;  %v4029_v51 = vsel %vm908_vm1, %v3994_v30, -inf }
0x1215   : > { %4030 = vmax.xlane.f32.xlu0 %v4029_v51 }
0x1216   : > { %v7427_v50 = vpop.f32.mrb[52].mxu1 }
0x1217   : > { %v4004_v35 = vpop.f32.mrb[53].mxu1  ;;  %v4038_v6 = vsel %vm908_vm1, %v7427_v50, -inf }
0x1218   : > { %4039 = vmax.xlane.f32.xlu1 %v4038_v6  ;;  %v4035_v42 = vsel %vm908_vm1, %v4004_v35, -inf }
0x1219   : > { %4036 = vmax.xlane.f32.xlu0 %v4035_v42 }
0x121a   : > { %v7430_v40 = vpop.f32.mrb[54].mxu1 }
0x121b   : > { %v4014_v12 = vpop.f32.mrb[55].mxu1  ;;  %v4044_v1 = vsel %vm908_vm1, %v7430_v40, -inf }
0x121c   : > { %4045 = vmax.xlane.f32.xlu1 %v4044_v1  ;;  %v4041_v8 = vsel %vm908_vm1, %v4014_v12, -inf  ;;  %v4396_v1 = vld [vmem:[#allocation3 + $0x300] sm:$0xff] }
0x121d   : > { %4042 = vmax.xlane.f32.xlu0 %v4041_v8  ;;  %v4397_v8 = vld [vmem:[#allocation3 + $0x308] sm:$0xff] }
0x129d   : > { %v4028_v3 = vpop.xlane.xlu1 %4027 }
0x129e   : > { %v4048_v10 = vsub.f32 %v7421_v14, %v4028_v3  ;;  %v4025_v52 = vpop.xlane.xlu0 %4024  ;;  %v10278_v3 = vpack.c.bf16 %v4397_v8, %v4396_v1 }
0x129f   : > { %v4047_v21 = vsub.f32 %v3984_v32, %v4025_v52  ;;  %v4259_v52 = vld [vmem:[#allocation6 + $0x288] sm:$0xff] }
0x12a0   : > { %v4057_v9 = vmul.f32 1.442695, %v4048_v10  ;;  %8393 = vmatprep.subr.bf16.mxu0 %v10278_v3  ;;  %v4258_v10 = vld [vmem:[#allocation6 + $0x280] sm:$0xff] }
0x12a1   : > { %v4055_v47 = vmul.f32 1.442695, %v4047_v21  ;;  %v4034_v59 = vpop.xlane.xlu1 %4033  ;;  %v4260_v21 = vld [vmem:[#allocation6 + $0x290] sm:$0xff] }
0x12a2   : > { %8877 = vpow2.f32 %v4057_v9  ;;  %v4050_v34 = vsub.f32 %v7424_v49, %v4034_v59  ;;  %v4031_v45 = vpop.xlane.xlu0 %4030  ;;  %v8360_v9 = vpack.c.bf16 %v4259_v52, %v4258_v10 }
0x12a3   : > { %8879 = vpow2.f32 %v4055_v47  ;;  %v4049_v38 = vsub.f32 %v3994_v30, %v4031_v45  ;;  %v4261_v47 = vld [vmem:[#allocation6 + $0x298] sm:$0xff]  ;;  %v4263_v45 = vld [vmem:[#allocation6 + $0x2a8] sm:$0xff] }
0x12a4   : > { %v4061_v39 = vmul.f32 1.442695, %v4050_v34  ;;  %v8364_v59 = vpack.c.bf16 %v4261_v47, %v4260_v21  ;;  %v4262_v34 = vld [vmem:[#allocation6 + $0x2a0] sm:$0xff]  ;;  %8361 = vmatprep.subr.bf16.mxu1 %v8360_v9 }
0x12a5   : > { %v4059_v41 = vmul.f32 1.442695, %v4049_v38  ;;  %v4040_v22 = vpop.xlane.xlu1 %4039  ;;  %8363 = vmatpush3.bf16.msra.mxu1 %v8360_v9  ;;  %v8368_v38 = vpack.c.bf16 %v4263_v45, %v4262_v34  ;;  %v4400_v47 = vld [vmem:[#allocation3 + $0x320] sm:$0xff] }
0x12a6   : > { %8881 = vpow2.f32 %v4061_v39  ;;  %v4052_v2 = vsub.f32 %v7427_v50, %v4040_v22  ;;  %v4037_v0 = vpop.xlane.xlu0 %4036  ;;  %8365 = vmatprep.subr.bf16.mxu1 %v8364_v59  ;;  %v4264_v39 = vld [vmem:[#allocation6 + $0x2b0] sm:$0xff] }
0x12a7   : > { %8883 = vpow2.f32 %v4059_v41  ;;  %v4051_v61 = vsub.f32 %v4004_v35, %v4037_v0  ;;  %v4265_v41 = vld [vmem:[#allocation6 + $0x2b8] sm:$0xff]  ;;  %v4267_v0 = vld [vmem:[#allocation6 + $0x2c8] sm:$0xff] }
0x12a8   : > { %v4065_v60 = vmul.f32 1.442695, %v4052_v2  ;;  %v8372_v22 = vpack.c.bf16 %v4265_v41, %v4264_v39  ;;  %v4266_v2 = vld [vmem:[#allocation6 + $0x2c0] sm:$0xff]  ;;  %v4403_v41 = vld [vmem:[#allocation3 + $0x338] sm:$0xff] }
0x12a9   : > { %v4063_v13 = vmul.f32 1.442695, %v4051_v61  ;;  %v4046_v43 = vpop.xlane.xlu1 %4045  ;;  %8367 = vmatpush3.bf16.msra.mxu1 %v8364_v59  ;;  %v8376_v61 = vpack.c.bf16 %v4267_v0, %v4266_v2  ;;  %v4401_v59 = vld [vmem:[#allocation3 + $0x328] sm:$0xff] }
0x12aa   : > { %8885 = vpow2.f32 %v4065_v60  ;;  %v4054_v37 = vsub.f32 %v7430_v40, %v4046_v43  ;;  %v4043_v28 = vpop.xlane.xlu0 %4042  ;;  %8369 = vmatprep.subr.bf16.mxu1 %v8368_v38  ;;  %v4268_v60 = vld [vmem:[#allocation6 + $0x2d0] sm:$0xff] }
0x12ab   : > { %8887 = vpow2.f32 %v4063_v13  ;;  %v4053_v62 = vsub.f32 %v4014_v12, %v4043_v28  ;;  %v4269_v13 = vld [vmem:[#allocation6 + $0x2d8] sm:$0xff]  ;;  %v4271_v28 = vld [vmem:[#allocation6 + $0x2e8] sm:$0xff] }
0x12ac   : > { %v10246_v5 = vpop.eup %8877  ;;  %v4069_v57 = vmul.f32 1.442695, %v4054_v37  ;;  %v8380_v43 = vpack.c.bf16 %v4269_v13, %v4268_v60  ;;  %v4270_v37 = vld [vmem:[#allocation6 + $0x2e0] sm:$0xff] }
0x12ad   : > { %v10248_v20 = vpop.eup %8879  ;;  %v4067_v63 = vmul.f32 1.442695, %v4053_v62  ;;  %v4074_v14 = vsel %vm908_vm1, %v10246_v5, 0.0  ;;  %8371 = vmatpush3.bf16.msra.mxu1 %v8368_v38  ;;  %v8384_v62 = vpack.c.bf16 %v4271_v28, %v4270_v37 }
0x12ae   : > { %8889 = vpow2.f32 %v4069_v57  ;;  %4075 = vadd.xlane.f32.xlu1 %v4074_v14  ;;  %v4071_v32 = vsel %vm908_vm1, %v10248_v20, 0.0  ;;  %8373 = vmatprep.subr.bf16.mxu1 %v8372_v22 }
0x12af   : > { %8891 = vpow2.f32 %v4067_v63  ;;  %4072 = vadd.xlane.f32.xlu0 %v4071_v32 }
0x12b0   : > { %v10254_v53 = vpop.eup %8881 }
0x12b1   : > { %v10256_v17 = vpop.eup %8883  ;;  %v4080_v49 = vsel %vm908_vm1, %v10254_v53, 0.0  ;;  %8375 = vmatpush3.bf16.msra.mxu1 %v8372_v22 }
0x12b2   : > { %4081 = vadd.xlane.f32.xlu1 %v4080_v49  ;;  %v4077_v30 = vsel %vm908_vm1, %v10256_v17, 0.0  ;;  %8377 = vmatprep.subr.bf16.mxu1 %v8376_v61 }
0x12b3   : > { %4078 = vadd.xlane.f32.xlu0 %v4077_v30 }
0x12b4   : > { %v10262_v33 = vpop.eup %8885 }
0x12b5   : > { %v10264_v51 = vpop.eup %8887  ;;  %v4086_v50 = vsel %vm908_vm1, %v10262_v33, 0.0  ;;  %8379 = vmatpush3.bf16.msra.mxu1 %v8376_v61  ;;  %v4405_v61 = vld [vmem:[#allocation3 + $0x348] sm:$0xff] }
0x12b6   : > { %4087 = vadd.xlane.f32.xlu1 %v4086_v50  ;;  %v4083_v35 = vsel %vm908_vm1, %v10264_v51, 0.0  ;;  %8381 = vmatprep.subr.bf16.mxu1 %v8380_v43 }
0x12b7   : > { %4084 = vadd.xlane.f32.xlu0 %v4083_v35  ;;  %v4398_v35 = vld [vmem:[#allocation3 + $0x310] sm:$0xff] }
0x12b8   : > { %v10270_v6 = vpop.eup %8889 }
0x12b9   : > { %v10272_v42 = vpop.eup %8891  ;;  %v4092_v40 = vsel %vm908_vm1, %v10270_v6, 0.0  ;;  %8383 = vmatpush3.bf16.msra.mxu1 %v8380_v43 }
0x12ba   : > { %4093 = vadd.xlane.f32.xlu1 %v4092_v40  ;;  %v4089_v12 = vsel %vm908_vm1, %v10272_v42, 0.0  ;;  %8385 = vmatprep.subr.bf16.mxu1 %v8384_v62  ;;  %v4399_v40 = vld [vmem:[#allocation3 + $0x318] sm:$0xff] }
0x12bb   : > { %4090 = vadd.xlane.f32.xlu0 %v4089_v12  ;;  %v8396_v21 = vpack.c.bf16 %v4399_v40, %v4398_v35  ;;  %v4525_v40 = vld [vmem:[%s10619_s4] sm:$0xff] }
0x12bd   : > { %8387 = vmatpush3.bf16.msra.mxu1 %v8384_v62  ;;  %v4408_v62 = vld [vmem:[#allocation3 + $0x360] sm:$0xff] }
0x133b   : > { %v4076_v57 = vpop.xlane.xlu1 %4075 }
0x133c   : > { %8893 = vrcp.f32 %v4076_v57  ;;  %v4073_v63 = vpop.xlane.xlu0 %4072  ;;  %v4409_v57 = vld [vmem:[#allocation3 + $0x368] sm:$0xff] }
0x133d   : > { %8895 = vrcp.f32 %v4073_v63  ;;  %v4410_v63 = vld [vmem:[#allocation3 + $0x370] sm:$0xff] }
0x133f   : > { %v4082_v14 = vpop.xlane.xlu1 %4081 }
0x1340   : > { %8897 = vrcp.f32 %v4082_v14  ;;  %v4079_v32 = vpop.xlane.xlu0 %4078  ;;  %v4411_v14 = vld [vmem:[#allocation3 + $0x378] sm:$0xff] }
0x1341   : > { %8899 = vrcp.f32 %v4079_v32  ;;  %v10650_v32 = vld [vmem:[#allocation15_spill] sm:$0xff] }
0x1343   : > { %v4088_v49 = vpop.xlane.xlu1 %4087 }
0x1344   : > { %8901 = vrcp.f32 %v4088_v49  ;;  %v4085_v30 = vpop.xlane.xlu0 %4084  ;;  %v10651_v49 = vld [vmem:[#allocation16_spill] sm:$0xff] }
0x1345   : > { %8903 = vrcp.f32 %v4085_v30  ;;  %v4272_v30 = vld [vmem:[#allocation6 + $0x2f0] sm:$0xff] }
0x1346   : > { %v8894_v50 = vpop.eup %8893 }
0x1347   : > { %v8896_v12 = vpop.eup %8895  ;;  %v4094_v1 = vpop.xlane.xlu1 %4093  ;;  %v4104_v52 = vmul.f32 %v8894_v50, %v10246_v5  ;;  %v4402_v5 = vld [vmem:[#allocation3 + $0x330] sm:$0xff]  ;;  %v4273_v50 = vld [vmem:[#allocation6 + $0x2f8] sm:$0xff] }
0x1348   : > { %8905 = vrcp.f32 %v4094_v1  ;;  %v4091_v8 = vpop.xlane.xlu0 %4090  ;;  %v4103_v10 = vmul.f32 %v8896_v12, %v10248_v20  ;;  %v8400_v20 = vpack.c.bf16 %v4401_v59, %v4400_v47  ;;  %v8404_v0 = vpack.c.bf16 %v4403_v41, %v4402_v5  ;;  %v4526_v12 = vld [vmem:[%s10619_s4 + $0x8] sm:$0xff]  ;;  %v4531_v59 = vld [vmem:[%s10619_s4 + $0x30] sm:$0xff]  ;;  %v4536_v41 = vld [vmem:[%s10619_s4 + $0x58] sm:$0xff] }
0x1349   : > { %8907 = vrcp.f32 %v4091_v8  ;;  %v8388_v35 = vpack.c.bf16 %v4273_v50, %v4272_v30  ;;  %v10312_v1 = vpack.c.bf16 %v4526_v12, %v4525_v40  ;;  %v4527_v8 = vld [vmem:[%s10619_s4 + $0x10] sm:$0xff] }
0x134a   : > { %v8898_v9 = vpop.eup %8897  ;;  %7433 = vmatprep.mubr.msk.f32.mxu0 %vm908_vm1, %v4103_v10  ;;  %v4528_v10 = vld [vmem:[%s10619_s4 + $0x18] sm:$0xff] }
0x134b   : > { %v8900_v34 = vpop.eup %8899  ;;  %7434 = vmatmul.mubr.msk.f32.vlgmr.msra.gmra.mrb[112].mxu0 %vm908_vm1, %v4104_v52  ;;  %v4106_v38 = vmul.f32 %v8898_v9, %v10254_v53  ;;  %v4404_v53 = vld [vmem:[#allocation3 + $0x340] sm:$0xff]  ;;  %8389 = vmatprep.subr.bf16.mxu1 %v8388_v35  ;;  %v10322_v52 = vpack.c.bf16 %v4528_v10, %v4527_v8  ;;  %v4530_v9 = vld [vmem:[%s10619_s4 + $0x28] sm:$0xff] }
0x134c   : > { %8395 = vmatpush3.bf16.msra.mxu0 %v10278_v3  ;;  %v4105_v45 = vmul.f32 %v8900_v34, %v10256_v17  ;;  %v8408_v37 = vpack.c.bf16 %v4405_v61, %v4404_v53  ;;  %8391 = vmatpush3.bf16.msra.mxu1 %v8388_v35  ;;  %v4532_v34 = vld [vmem:[%s10619_s4 + $0x38] sm:$0xff] }
0x134d   : > { %8397 = vmatprep.subr.bf16.mxu0 %v8396_v21  ;;  %v4540_v53 = vld [vmem:[%s10619_s4 + $0x78] sm:$0xff] }
0x134e   : > { %v8902_v39 = vpop.eup %8901  ;;  %7436 = vmatprep.mubr.msk.f32.mxu0 %vm908_vm1, %v4105_v45  ;;  %v10342_v45 = vpack.c.bf16 %v4532_v34, %v4531_v59 }
0x134f   : > { %v8904_v22 = vpop.eup %8903  ;;  %7437 = vmatmul.mubr.msk.f32.gmra.mrb[114].mxu0 %vm908_vm1, %v4106_v38  ;;  %v4108_v3 = vmul.f32 %v8902_v39, %v10262_v33  ;;  %v4407_v33 = vld [vmem:[#allocation3 + $0x358] sm:$0xff]  ;;  %v4533_v38 = vld [vmem:[%s10619_s4 + $0x40] sm:$0xff]  ;;  %v4535_v39 = vld [vmem:[%s10619_s4 + $0x50] sm:$0xff] }
0x1350   : > { %8399 = vmatpush3.bf16.msra.mxu0 %v8396_v21  ;;  %v4107_v2 = vmul.f32 %v8904_v22, %v10264_v51  ;;  %v4406_v51 = vld [vmem:[#allocation3 + $0x350] sm:$0xff]  ;;  %v4529_v21 = vld [vmem:[%s10619_s4 + $0x20] sm:$0xff]  ;;  %v10360_v22 = vpack.c.bf16 %v4536_v41, %v4535_v39 }
0x1351   : > { %8401 = vmatprep.subr.bf16.mxu0 %v8400_v20  ;;  %v8412_v28 = vpack.c.bf16 %v4407_v33, %v4406_v51  ;;  %v10332_v47 = vpack.c.bf16 %v4530_v9, %v4529_v21  ;;  %v5021_v21 = vld [vmem:[#allocation3 + $0x390] sm:$0xff]  ;;  %v5022_v9 = vld [vmem:[#allocation3 + $0x398] sm:$0xff]  ;;  %v5023_v41 = vld [vmem:[#allocation3 + $0x3a0] sm:$0xff] }
0x1352   : > { %v8906_v17 = vpop.eup %8905  ;;  %7439 = vmatprep.mubr.msk.f32.mxu0 %vm908_vm1, %v4107_v2  ;;  %v4537_v2 = vld [vmem:[%s10619_s4 + $0x60] sm:$0xff] }
0x1353   : > { %v8908_v60 = vpop.eup %8907  ;;  %7440 = vmatmul.mubr.msk.f32.gmra.mrb[116].mxu0 %vm908_vm1, %v4108_v3  ;;  %v4110_v43 = vmul.f32 %v8906_v17, %v10270_v6  ;;  %v8420_v6 = vpack.c.bf16 %v4411_v14, %v4410_v63  ;;  %v4538_v3 = vld [vmem:[%s10619_s4 + $0x68] sm:$0xff]  ;;  %v4539_v17 = vld [vmem:[%s10619_s4 + $0x70] sm:$0xff] }
0x1354   : > { %8403 = vmatpush3.bf16.msra.mxu0 %v8400_v20  ;;  %v4109_v13 = vmul.f32 %v8908_v60, %v10272_v42  ;;  %v8416_v42 = vpack.c.bf16 %v4409_v57, %v4408_v62  ;;  %v4534_v20 = vld [vmem:[%s10619_s4 + $0x48] sm:$0xff]  ;;  %v10382_v61 = vpack.c.bf16 %v4540_v53, %v4539_v17  ;;  %v5019_v60 = vld [vmem:[#allocation3 + $0x380] sm:$0xff] }
0x1355   : > { %8405 = vmatprep.subr.bf16.mxu0 %v8404_v0  ;;  %v10355_v5 = vpack.c.bf16 %v4534_v20, %v4533_v38  ;;  %v8492_v20 = vpack.c.bf16 %v5022_v9, %v5021_v21  ;;  %v5033_v9 = vld [vmem:[#allocation3 + $0x3f0] sm:$0xff] }
0x1356   : > { %7442 = vmatprep.mubr.msk.f32.mxu0 %vm908_vm1, %v4109_v13  ;;  %v5020_v13 = vld [vmem:[#allocation3 + $0x388] sm:$0xff] }
0x1357   : > { %7443 = vmatmul.mubr.msk.f32.gmra.mrb[118].mxu0 %vm908_vm1, %v4110_v43  ;;  %v8488_v43 = vpack.c.bf16 %v5020_v13, %v5019_v60 }
0x1358   : > { %8407 = vmatpush3.bf16.msra.mxu0 %v8404_v0  ;;  %7521 = vmatprep.mubr.f32.mxu0 %v9434_v11  ;;  %v10371_v0 = vpack.c.bf16 %v4538_v3, %v4537_v2  ;;  %v5024_v2 = vld [vmem:[#allocation3 + $0x3a8] sm:$0xff] }
0x1359   : > { %8409 = vmatprep.subr.bf16.mxu0 %v8408_v37  ;;  %v8496_v60 = vpack.c.bf16 %v5024_v2, %v5023_v41 }
0x135c   : > { %8411 = vmatpush3.bf16.msra.mxu0 %v8408_v37 }
0x135d   : > { %8413 = vmatprep.subr.bf16.mxu0 %v8412_v28 }
0x1360   : > { %8415 = vmatpush3.bf16.msra.mxu0 %v8412_v28 }
0x1361   : > { %8417 = vmatprep.subr.bf16.mxu0 %v8416_v42 }
0x1364   : > { %8419 = vmatpush3.bf16.msra.mxu0 %v8416_v42 }
0x1365   : > { %8421 = vmatprep.subr.bf16.mxu0 %v8420_v6 }
0x1368   : > { %8423 = vmatpush3.bf16.msra.mxu0 %v8420_v6 }
0x1369   : > { %8425 = vmatprep.subr.bf16.mxu0 %v10312_v1 }
0x136b   : > { %7522 = vmatmul.mubr.f32.vlgmr.msra.gmra.mrb[120].mxu0 %v9440_v15 }
0x136c   : > { %7524 = vmatprep.mubr.f32.mxu0 %v9446_v19  ;;  %8427 = vmatpush3.bf16.msra.mxu0 %v10312_v1 }
0x136d   : > { %8429 = vmatprep.subr.bf16.mxu0 %v10322_v52 }
0x136f   : > { %7525 = vmatmul.mubr.f32.gmra.mrb[122].mxu0 %v9452_v23 }
0x1370   : > { %7527 = vmatprep.mubr.f32.mxu0 %v9458_v27  ;;  %8431 = vmatpush3.bf16.msra.mxu0 %v10322_v52 }
0x1371   : > { %8433 = vmatprep.subr.bf16.mxu0 %v10332_v47 }
0x1373   : > { %7528 = vmatmul.mubr.f32.gmra.mrb[124].mxu0 %v9464_v31 }
0x1374   : > { %7530 = vmatprep.mubr.f32.mxu0 %v10650_v32  ;;  %8435 = vmatpush3.bf16.msra.mxu0 %v10332_v47 }
0x1375   : > { %8437 = vmatprep.subr.bf16.mxu0 %v10342_v45 }
0x1377   : > { %7531 = vmatmul.mubr.f32.gmra.mrb[126].mxu0 %v10651_v49 }
0x1378   : > { %8439 = vmatpush3.bf16.msra.mxu0 %v10342_v45 }
0x1379   : > { %8441 = vmatprep.subr.bf16.mxu0 %v10355_v5 }
0x137c   : > { %8443 = vmatpush3.bf16.msra.mxu0 %v10355_v5 }
0x137d   : > { %8445 = vmatprep.subr.bf16.mxu0 %v10360_v22 }
0x1380   : > { %8447 = vmatpush3.bf16.msra.mxu0 %v10360_v22 }
0x1381   : > { %8449 = vmatprep.subr.bf16.mxu0 %v10371_v0 }
0x1384   : > { %8451 = vmatpush3.bf16.msra.mxu0 %v10371_v0 }
0x1385   : > { %8453 = vmatprep.subr.bf16.mxu0 %v10382_v61 }
0x1388   : > { %8455 = vmatpush3.bf16.msra.mxu0 %v10382_v61 }
0x1389   : > { %8489 = vmatprep.subr.bf16.mxu0 %v8488_v43 }
0x141e   : > { %v7435_v37 = vpop.f32.mrb[112].mxu0 }
0x141f   : > { %v4202_v51 = vpop.f32.mrb[113].mxu0  ;;  %v4250_v28 = vmul.f32 %v7435_v37, %v9637_v25  ;;  %v5025_v37 = vld [vmem:[#allocation3 + $0x3b0] sm:$0xff] }
0x1420   : > { %v4249_v33 = vmul.f32 %v4202_v51, %v9634_v24  ;;  %v5026_v51 = vld [vmem:[#allocation3 + $0x3b8] sm:$0xff] }
0x1422   : > { %v7438_v62 = vpop.f32.mrb[114].mxu0  ;;  %7477 = vmatprep.mubr.f32.mxu1 %v4249_v33 }
0x1423   : > { %v4212_v57 = vpop.f32.mrb[115].mxu0  ;;  %7478 = vmatmul.mubr.f32.vlgmr.msra.gmra.mrb[16].mxu1 %v4250_v28  ;;  %v4252_v63 = vmul.f32 %v7438_v62, %v9653_v36 }
0x1424   : > { %v4251_v42 = vmul.f32 %v4212_v57, %v9650_v44  ;;  %v8500_v57 = vpack.c.bf16 %v5026_v51, %v5025_v37 }
0x1426   : > { %v7441_v14 = vpop.f32.mrb[116].mxu0  ;;  %7480 = vmatprep.mubr.f32.mxu1 %v4251_v42 }
0x1427   : > { %v4222_v6 = vpop.f32.mrb[117].mxu0  ;;  %7481 = vmatmul.mubr.f32.gmra.mrb[18].mxu1 %v4252_v63  ;;  %v4254_v50 = vmul.f32 %v7441_v14, %v9670_v56  ;;  %v5028_v63 = vld [vmem:[#allocation3 + $0x3c8] sm:$0xff] }
0x1428   : > { %v4253_v30 = vmul.f32 %v4222_v6, %v9666_v46 }
0x142a   : > { %v7444_v35 = vpop.f32.mrb[118].mxu0  ;;  %7483 = vmatprep.mubr.f32.mxu1 %v4253_v30 }
0x142b   : > { %v4232_v40 = vpop.f32.mrb[119].mxu0  ;;  %7484 = vmatmul.mubr.f32.gmra.mrb[20].mxu1 %v4254_v50  ;;  %v4256_v8 = vmul.f32 %v7444_v35, %v9688_v54  ;;  %v5029_v35 = vld [vmem:[#allocation3 + $0x3d0] sm:$0xff] }
0x142c   : > { %v4255_v12 = vmul.f32 %v4232_v40, %v9684_v48  ;;  %v5030_v40 = vld [vmem:[#allocation3 + $0x3d8] sm:$0xff] }
0x142e   : > { %7486 = vmatprep.mubr.f32.mxu1 %v4255_v12  ;;  %v8508_v12 = vpack.c.bf16 %v5030_v40, %v5029_v35 }
0x142f   : > { %7487 = vmatmul.mubr.f32.gmra.mrb[22].mxu1 %v4256_v8  ;;  %v5031_v8 = vld [vmem:[#allocation3 + $0x3e0] sm:$0xff] }
0x143e   : > { %v7523_v10 = vpop.f32.mrb[120].mxu0 }
0x143f   : > { %v4478_v59 = vpop.f32.mrb[121].mxu0  ;;  %v4518_v38 = vmul.f32 %v7523_v10, %v9513_v58  ;;  %v5032_v10 = vld [vmem:[#allocation3 + $0x3e8] sm:$0xff] }
0x1440   : > { %v4517_v34 = vmul.f32 %v4478_v59, %v9511_v55  ;;  %v8512_v21 = vpack.c.bf16 %v5032_v10, %v5031_v8  ;;  %v5034_v59 = vld [vmem:[#allocation3 + $0x3f8] sm:$0xff] }
0x1442   : > { %v7526_v39 = vpop.f32.mrb[122].mxu0  ;;  %7565 = vmatprep.mubr.f32.mxu0 %v4517_v34  ;;  %v8516_v34 = vpack.c.bf16 %v5034_v59, %v5033_v9 }
0x1443   : > { %v4488_v3 = vpop.f32.mrb[123].mxu0  ;;  %7566 = vmatmul.mubr.f32.vlgmr.msra.gmra.mrb[128].mxu0 %v4518_v38  ;;  %v4520_v53 = vmul.f32 %v7526_v39, %v9525_v7 }
0x1444   : > { %v4519_v17 = vmul.f32 %v4488_v3, %v9523_v4  ;;  %8491 = vmatpush3.bf16.msra.mxu0 %v8488_v43  ;;  %v5027_v43 = vld [vmem:[#allocation3 + $0x3c0] sm:$0xff] }
0x1445   : > { %8493 = vmatprep.subr.bf16.mxu0 %v8492_v20  ;;  %v8504_v50 = vpack.c.bf16 %v5028_v63, %v5027_v43 }
0x1446   : > { %v7529_v13 = vpop.f32.mrb[124].mxu0  ;;  %7568 = vmatprep.mubr.f32.mxu0 %v4519_v17 }
0x1447   : > { %v4498_v33 = vpop.f32.mrb[125].mxu0  ;;  %7569 = vmatmul.mubr.f32.gmra.mrb[130].mxu0 %v4520_v53  ;;  %v4522_v62 = vmul.f32 %v7529_v13, %v9537_v18 }
0x1448   : > { %v4521_v28 = vmul.f32 %v4498_v33, %v9535_v16  ;;  %8495 = vmatpush3.bf16.msra.mxu0 %v8492_v20 }
0x1449   : > { %8497 = vmatprep.subr.bf16.mxu0 %v8496_v60 }
0x144a   : > { %v7532_v42 = vpop.f32.mrb[126].mxu0  ;;  %7571 = vmatprep.mubr.f32.mxu0 %v4521_v28 }
0x144b   : > { %v4508_v14 = vpop.f32.mrb[127].mxu0  ;;  %7572 = vmatmul.mubr.f32.gmra.mrb[132].mxu0 %v4522_v62  ;;  %v4524_v30 = vmul.f32 %v7532_v42, %v9549_v29  ;;  %v4734_v42 = vld [vmem:[%s10620_s5] sm:$0xff] }
0x144c   : > { %v4523_v6 = vmul.f32 %v4508_v14, %v9547_v26  ;;  %8499 = vmatpush3.bf16.msra.mxu0 %v8496_v60  ;;  %7577 = vmatprep.subr.mxu1 %v4734_v42 }
0x144d   : > { %8501 = vmatprep.subr.bf16.mxu0 %v8500_v57  ;;  %7578 = vmatpush3.msra.mxu1 %v4734_v42 }
0x144e   : > { %7574 = vmatprep.mubr.f32.mxu0 %v4523_v6 }
0x144f   : > { %7575 = vmatmul.mubr.f32.gmra.mrb[134].mxu0 %v4524_v30 }
0x1450   : > { %8503 = vmatpush3.bf16.msra.mxu0 %v8500_v57  ;;  %7667 = vmatprep.mubr.f32.mxu0 %v9434_v11 }
0x1451   : > { %8505 = vmatprep.subr.bf16.mxu0 %v8504_v50 }
0x1454   : > { %8507 = vmatpush3.bf16.msra.mxu0 %v8504_v50 }
0x1455   : > { %8509 = vmatprep.subr.bf16.mxu0 %v8508_v12 }
0x1458   : > { %8511 = vmatpush3.bf16.msra.mxu0 %v8508_v12 }
0x1459   : > { %8513 = vmatprep.subr.bf16.mxu0 %v8512_v21 }
0x145c   : > { %8515 = vmatpush3.bf16.msra.mxu0 %v8512_v21 }
0x145d   : > { %8517 = vmatprep.subr.bf16.mxu0 %v8516_v34 }
0x1460   : > { %8519 = vmatpush3.bf16.msra.mxu0 %v8516_v34 }
0x1461   : > { %7723 = vmatprep.subr.mxu0 %v4734_v42 }
0x1463   : > { %7668 = vmatmul.mubr.f32.vlgmr.msra.gmra.mrb[136].mxu0 %v9440_v15 }
0x1464   : > { %7670 = vmatprep.mubr.f32.mxu0 %v9446_v19  ;;  %7724 = vmatpush3.msra.mxu0 %v4734_v42 }
0x1467   : > { %7671 = vmatmul.mubr.f32.gmra.mrb[138].mxu0 %v9452_v23 }
0x1468   : > { %7673 = vmatprep.mubr.f32.mxu0 %v9458_v27 }
0x146b   : > { %7674 = vmatmul.mubr.f32.gmra.mrb[140].mxu0 %v9464_v31 }
0x146c   : > { %7676 = vmatprep.mubr.f32.mxu0 %v10650_v32 }
0x146f   : > { %7677 = vmatmul.mubr.f32.gmra.mrb[142].mxu0 %v10651_v49 }
0x1516   : > { %v7567_v11 = vpop.f32.mrb[128].mxu0 }
0x1517   : > { %v4607_v38 = vpop.f32.mrb[129].mxu0  ;;  %v4649_v20 = vsel %vm908_vm1, %v7567_v11, -inf }
0x1518   : > { %4650 = vmax.xlane.f32.xlu1 %v4649_v20  ;;  %v4646_v39 = vsel %vm908_vm1, %v4607_v38, -inf }
0x1519   : > { %4647 = vmax.xlane.f32.xlu0 %v4646_v39 }
0x151a   : > { %v7570_v15 = vpop.f32.mrb[130].mxu0 }
0x151b   : > { %v4617_v19 = vpop.f32.mrb[131].mxu0  ;;  %v4655_v23 = vsel %vm908_vm1, %v7570_v15, -inf }
0x151c   : > { %4656 = vmax.xlane.f32.xlu1 %v4655_v23  ;;  %v4652_v27 = vsel %vm908_vm1, %v4617_v19, -inf }
0x151d   : > { %4653 = vmax.xlane.f32.xlu0 %v4652_v27 }
0x151e   : > { %v7573_v31 = vpop.f32.mrb[132].mxu0 }
0x151f   : > { %v4627_v32 = vpop.f32.mrb[133].mxu0  ;;  %v4661_v49 = vsel %vm908_vm1, %v7573_v31, -inf }
0x1520   : > { %4662 = vmax.xlane.f32.xlu1 %v4661_v49  ;;  %v4658_v41 = vsel %vm908_vm1, %v4627_v32, -inf }
0x1521   : > { %4659 = vmax.xlane.f32.xlu0 %v4658_v41 }
0x1522   : > { %v7576_v2 = vpop.f32.mrb[134].mxu0 }
0x1523   : > { %v4637_v3 = vpop.f32.mrb[135].mxu0  ;;  %v4667_v17 = vsel %vm908_vm1, %v7576_v2, -inf }
0x1524   : > { %4668 = vmax.xlane.f32.xlu1 %v4667_v17  ;;  %v4664_v53 = vsel %vm908_vm1, %v4637_v3, -inf }
0x1525   : > { %4665 = vmax.xlane.f32.xlu0 %v4664_v53 }
0x1536   : > { %v10418_v60 = vpop.f32.mrb[136].mxu0 }
0x1537   : > { %v10420_v13 = vpop.f32.mrb[137].mxu0 }
0x153a   : > { %v10422_v37 = vpop.f32.mrb[138].mxu0 }
0x153b   : > { %v10424_v51 = vpop.f32.mrb[139].mxu0 }
0x153e   : > { %v10426_v33 = vpop.f32.mrb[140].mxu0 }
0x153f   : > { %v10428_v28 = vpop.f32.mrb[141].mxu0 }
0x1542   : > { %v10430_v62 = vpop.f32.mrb[142].mxu0 }
0x1543   : > { %v10432_v57 = vpop.f32.mrb[143].mxu0 }
0x15a5   : > { %v4651_v43 = vpop.xlane.xlu1 %4650 }
0x15a6   : > { %v4671_v63 = vsub.f32 %v7567_v11, %v4651_v43  ;;  %v4648_v14 = vpop.xlane.xlu0 %4647 }
0x15a7   : > { %v4670_v6 = vsub.f32 %v4607_v38, %v4648_v14 }
0x15a8   : > { %v4680_v30 = vmul.f32 1.442695, %v4671_v63 }
0x15a9   : > { %v4678_v50 = vmul.f32 1.442695, %v4670_v6  ;;  %v4657_v35 = vpop.xlane.xlu1 %4656 }
0x15aa   : > { %8909 = vpow2.f32 %v4680_v30  ;;  %v4673_v40 = vsub.f32 %v7570_v15, %v4657_v35  ;;  %v4654_v12 = vpop.xlane.xlu0 %4653 }
0x15ab   : > { %8911 = vpow2.f32 %v4678_v50  ;;  %v4672_v8 = vsub.f32 %v4617_v19, %v4654_v12  ;;  %v4881_v12 = vld [vmem:[#allocation6 + $0x300] sm:$0xff] }
0x15ac   : > { %v4684_v10 = vmul.f32 1.442695, %v4673_v40 }
0x15ad   : > { %v4682_v21 = vmul.f32 1.442695, %v4672_v8  ;;  %v4663_v9 = vpop.xlane.xlu1 %4662  ;;  %v4882_v8 = vld [vmem:[#allocation6 + $0x308] sm:$0xff] }
0x15ae   : > { %8913 = vpow2.f32 %v4684_v10  ;;  %v4675_v59 = vsub.f32 %v7573_v31, %v4663_v9  ;;  %v4660_v34 = vpop.xlane.xlu0 %4659  ;;  %v8456_v10 = vpack.c.bf16 %v4882_v8, %v4881_v12 }
0x15af   : > { %8915 = vpow2.f32 %v4682_v21  ;;  %v4674_v20 = vsub.f32 %v4627_v32, %v4660_v34 }
0x15b0   : > { %v4688_v39 = vmul.f32 1.442695, %v4675_v59  ;;  %8457 = vmatprep.subr.bf16.mxu1 %v8456_v10 }
0x15b1   : > { %v4686_v11 = vmul.f32 1.442695, %v4674_v20  ;;  %v4669_v23 = vpop.xlane.xlu1 %4668 }
0x15b2   : > { %8917 = vpow2.f32 %v4688_v39  ;;  %v4677_v38 = vsub.f32 %v7576_v2, %v4669_v23  ;;  %v4666_v27 = vpop.xlane.xlu0 %4665  ;;  %v4883_v23 = vld [vmem:[#allocation6 + $0x310] sm:$0xff] }
0x15b3   : > { %8919 = vpow2.f32 %v4686_v11  ;;  %v4676_v49 = vsub.f32 %v4637_v3, %v4666_v27 }
0x15b4   : > { %v8910_v15 = vpop.eup %8909  ;;  %v4692_v41 = vmul.f32 1.442695, %v4677_v38  ;;  %v4884_v38 = vld [vmem:[#allocation6 + $0x318] sm:$0xff] }
0x15b5   : > { %v8912_v17 = vpop.eup %8911  ;;  %v4690_v19 = vmul.f32 1.442695, %v4676_v49  ;;  %v4697_v53 = vsel %vm908_vm1, %v8910_v15, 0.0 }
0x15b6   : > { %8921 = vpow2.f32 %v4692_v41  ;;  %4698 = vadd.xlane.f32.xlu1 %v4697_v53  ;;  %v4694_v31 = vsel %vm908_vm1, %v8912_v17, 0.0 }
0x15b7   : > { %8923 = vpow2.f32 %v4690_v19  ;;  %4695 = vadd.xlane.f32.xlu0 %v4694_v31  ;;  %v8460_v31 = vpack.c.bf16 %v4884_v38, %v4883_v23 }
0x15b8   : > { %v8914_v32 = vpop.eup %8913 }
0x15b9   : > { %v8916_v42 = vpop.eup %8915  ;;  %v4703_v43 = vsel %vm908_vm1, %v8914_v32, 0.0 }
0x15ba   : > { %4704 = vadd.xlane.f32.xlu1 %v4703_v43  ;;  %v4700_v2 = vsel %vm908_vm1, %v8916_v42, 0.0 }
0x15bb   : > { %4701 = vadd.xlane.f32.xlu0 %v4700_v2  ;;  %v4885_v2 = vld [vmem:[#allocation6 + $0x320] sm:$0xff] }
0x15bc   : > { %v8918_v3 = vpop.eup %8917 }
0x15bd   : > { %v8920_v63 = vpop.eup %8919  ;;  %v4709_v14 = vsel %vm908_vm1, %v8918_v3, 0.0 }
0x15be   : > { %4710 = vadd.xlane.f32.xlu1 %v4709_v14  ;;  %v4706_v6 = vsel %vm908_vm1, %v8920_v63, 0.0  ;;  %v4886_v14 = vld [vmem:[#allocation6 + $0x328] sm:$0xff] }
0x15bf   : > { %4707 = vadd.xlane.f32.xlu0 %v4706_v6  ;;  %v8464_v12 = vpack.c.bf16 %v4886_v14, %v4885_v2 }
0x15c0   : > { %v10443_v30 = vpop.eup %8921 }
0x15c1   : > { %v8924_v50 = vpop.eup %8923  ;;  %v4715_v35 = vsel %vm908_vm1, %v10443_v30, 0.0 }
0x15c2   : > { %4716 = vadd.xlane.f32.xlu1 %v4715_v35  ;;  %v4712_v40 = vsel %vm908_vm1, %v8924_v50, 0.0 }
0x15c3   : > { %4713 = vadd.xlane.f32.xlu0 %v4712_v40 }
0x1643   : > { %v4699_v21 = vpop.xlane.xlu1 %4698 }
0x1644   : > { %8925 = vrcp.f32 %v4699_v21  ;;  %v4696_v9 = vpop.xlane.xlu0 %4695 }
0x1645   : > { %8927 = vrcp.f32 %v4696_v9 }
0x1647   : > { %v4705_v59 = vpop.xlane.xlu1 %4704 }
0x1648   : > { %8929 = vrcp.f32 %v4705_v59  ;;  %v4702_v34 = vpop.xlane.xlu0 %4701 }
0x1649   : > { %8931 = vrcp.f32 %v4702_v34 }
0x164b   : > { %v4711_v20 = vpop.xlane.xlu1 %4710 }
0x164c   : > { %8933 = vrcp.f32 %v4711_v20  ;;  %v4708_v39 = vpop.xlane.xlu0 %4707 }
0x164d   : > { %8935 = vrcp.f32 %v4708_v39 }
0x164e   : > { %v8926_v11 = vpop.eup %8925 }
0x164f   : > { %v8928_v27 = vpop.eup %8927  ;;  %v4717_v49 = vpop.xlane.xlu1 %4716  ;;  %v4727_v53 = vmul.f32 %v8926_v11, %v8910_v15  ;;  %v4888_v15 = vld [vmem:[#allocation6 + $0x338] sm:$0xff] }
0x1650   : > { %8937 = vrcp.f32 %v4717_v49  ;;  %v4714_v41 = vpop.xlane.xlu0 %4713  ;;  %v4726_v19 = vmul.f32 %v8928_v27, %v8912_v17  ;;  %v4887_v17 = vld [vmem:[#allocation6 + $0x330] sm:$0xff]  ;;  %v4893_v27 = vld [vmem:[#allocation6 + $0x360] sm:$0xff]  ;;  %v4894_v49 = vld [vmem:[#allocation6 + $0x368] sm:$0xff] }
0x1651   : > { %8939 = vrcp.f32 %v4714_v41  ;;  %v8468_v34 = vpack.c.bf16 %v4888_v15, %v4887_v17  ;;  %v8480_v41 = vpack.c.bf16 %v4894_v49, %v4893_v27 }
0x1652   : > { %v8930_v43 = vpop.eup %8929  ;;  %7579 = vmatprep.mubr.msk.f32.mxu1 %vm908_vm1, %v4726_v19 }
0x1653   : > { %v8932_v6 = vpop.eup %8931  ;;  %7580 = vmatmul.mubr.msk.f32.vlgmr.msra.gmra.mrb[56].mxu1 %vm908_vm1, %v4727_v53  ;;  %v4729_v40 = vmul.f32 %v8930_v43, %v8914_v32  ;;  %v4890_v32 = vld [vmem:[#allocation6 + $0x348] sm:$0xff] }
0x1654   : > { %v4728_v35 = vmul.f32 %v8932_v6, %v8916_v42  ;;  %8459 = vmatpush3.bf16.msra.mxu1 %v8456_v10  ;;  %v4889_v42 = vld [vmem:[#allocation6 + $0x340] sm:$0xff] }
0x1655   : > { %8461 = vmatprep.subr.bf16.mxu1 %v8460_v31  ;;  %v8472_v23 = vpack.c.bf16 %v4890_v32, %v4889_v42 }
0x1656   : > { %v8934_v8 = vpop.eup %8933  ;;  %7582 = vmatprep.mubr.msk.f32.mxu1 %vm908_vm1, %v4728_v35 }
0x1657   : > { %v8936_v21 = vpop.eup %8935  ;;  %7583 = vmatmul.mubr.msk.f32.gmra.mrb[58].mxu1 %vm908_vm1, %v4729_v40  ;;  %v4731_v59 = vmul.f32 %v8934_v8, %v8918_v3  ;;  %v4892_v3 = vld [vmem:[#allocation6 + $0x358] sm:$0xff] }
0x1658   : > { %v4730_v9 = vmul.f32 %v8936_v21, %v8920_v63  ;;  %8463 = vmatpush3.bf16.msra.mxu1 %v8460_v31  ;;  %v4891_v63 = vld [vmem:[#allocation6 + $0x350] sm:$0xff] }
0x1659   : > { %8465 = vmatprep.subr.bf16.mxu1 %v8464_v12  ;;  %v8476_v38 = vpack.c.bf16 %v4892_v3, %v4891_v63 }
0x165a   : > { %v8938_v20 = vpop.eup %8937  ;;  %7585 = vmatprep.mubr.msk.f32.mxu1 %vm908_vm1, %v4730_v9 }
0x165b   : > { %v8940_v10 = vpop.eup %8939  ;;  %7586 = vmatmul.mubr.msk.f32.gmra.mrb[60].mxu1 %vm908_vm1, %v4731_v59  ;;  %v4733_v11 = vmul.f32 %v8938_v20, %v10443_v30  ;;  %v4895_v30 = vld [vmem:[#allocation6 + $0x370] sm:$0xff] }
0x165c   : > { %v4732_v39 = vmul.f32 %v8940_v10, %v8924_v50  ;;  %8467 = vmatpush3.bf16.msra.mxu1 %v8464_v12  ;;  %v4896_v50 = vld [vmem:[#allocation6 + $0x378] sm:$0xff] }
0x165d   : > { %8469 = vmatprep.subr.bf16.mxu1 %v8468_v34  ;;  %v8484_v19 = vpack.c.bf16 %v4896_v50, %v4895_v30 }
0x165e   : > { %7588 = vmatprep.mubr.msk.f32.mxu1 %vm908_vm1, %v4732_v39 }
0x165f   : > { %7589 = vmatmul.mubr.msk.f32.gmra.mrb[62].mxu1 %vm908_vm1, %v4733_v11 }
0x1660   : > { %8471 = vmatpush3.bf16.msra.mxu1 %v8468_v34  ;;  %v5140_v34 = vmul.f32 %v10420_v13, %v9511_v55  ;;  %v5141_v55 = vmul.f32 %v10418_v60, %v9513_v58  ;;  %v5147_v58 = vmul.f32 %v10430_v62, %v9549_v29 }
0x1661   : > { %8473 = vmatprep.subr.bf16.mxu1 %v8472_v23 }
0x1664   : > { %8475 = vmatpush3.bf16.msra.mxu1 %v8472_v23 }
0x1665   : > { %8477 = vmatprep.subr.bf16.mxu1 %v8476_v38 }
0x1668   : > { %8479 = vmatpush3.bf16.msra.mxu1 %v8476_v38 }
0x1669   : > { %8481 = vmatprep.subr.bf16.mxu1 %v8480_v41 }
0x166c   : > { %8483 = vmatpush3.bf16.msra.mxu1 %v8480_v41 }
0x166d   : > { %8485 = vmatprep.subr.bf16.mxu1 %v8484_v19 }
0x1670   : > { %8487 = vmatpush3.bf16.msra.mxu1 %v8484_v19 }
0x1671   : > { %8521 = vmatprep.subr.bf16.mxu1 %v10312_v1 }
0x1726   : > { %v7581_v53 = vpop.f32.mrb[56].mxu1 }
0x1727   : > { %v4825_v31 = vpop.f32.mrb[57].mxu1  ;;  %v4873_v2 = vmul.f32 %v7581_v53, %v9637_v25 }
0x1728   : > { %v4872_v43 = vmul.f32 %v4825_v31, %v9634_v24 }
0x172a   : > { %v7584_v14 = vpop.f32.mrb[58].mxu1  ;;  %7623 = vmatprep.mubr.f32.mxu1 %v4872_v43 }
0x172b   : > { %v4835_v6 = vpop.f32.mrb[59].mxu1  ;;  %7624 = vmatmul.mubr.f32.vlgmr.msra.gmra.mrb[16].mxu1 %v4873_v2  ;;  %v4875_v40 = vmul.f32 %v7584_v14, %v9653_v36 }
0x172c   : > { %v4874_v35 = vmul.f32 %v4835_v6, %v9650_v44  ;;  %8523 = vmatpush3.bf16.msra.mxu1 %v10312_v1 }
0x172d   : > { %8525 = vmatprep.subr.bf16.mxu1 %v10322_v52 }
0x172e   : > { %v7587_v12 = vpop.f32.mrb[60].mxu1  ;;  %7626 = vmatprep.mubr.f32.mxu1 %v4874_v35 }
0x172f   : > { %v4845_v8 = vpop.f32.mrb[61].mxu1  ;;  %7627 = vmatmul.mubr.f32.gmra.mrb[18].mxu1 %v4875_v40  ;;  %v4877_v15 = vmul.f32 %v7587_v12, %v9670_v56 }
0x1730   : > { %v4876_v17 = vmul.f32 %v4845_v8, %v9666_v46  ;;  %8527 = vmatpush3.bf16.msra.mxu1 %v10322_v52  ;;  %v5142_v52 = vmul.f32 %v10424_v51, %v9523_v4 }
0x1731   : > { %8529 = vmatprep.subr.bf16.mxu1 %v10332_v47 }
0x1732   : > { %v7590_v21 = vpop.f32.mrb[62].mxu1  ;;  %7629 = vmatprep.mubr.f32.mxu1 %v4876_v17 }
0x1733   : > { %v4855_v9 = vpop.f32.mrb[63].mxu1  ;;  %7630 = vmatmul.mubr.f32.gmra.mrb[20].mxu1 %v4877_v15  ;;  %v4879_v59 = vmul.f32 %v7590_v21, %v9688_v54 }
0x1734   : > { %v4878_v1 = vmul.f32 %v4855_v9, %v9684_v48  ;;  %8531 = vmatpush3.bf16.msra.mxu1 %v10332_v47  ;;  %v5143_v47 = vmul.f32 %v10422_v37, %v9525_v7 }
0x1735   : > { %8533 = vmatprep.subr.bf16.mxu1 %v10342_v45 }
0x1736   : > { %7632 = vmatprep.mubr.f32.mxu1 %v4878_v1 }
0x1737   : > { %7633 = vmatmul.mubr.f32.gmra.mrb[22].mxu1 %v4879_v59 }
0x1738   : > { %8535 = vmatpush3.bf16.msra.mxu1 %v10342_v45  ;;  %7711 = vmatprep.mubr.f32.mxu1 %v5140_v34  ;;  %v5144_v45 = vmul.f32 %v10428_v28, %v9535_v16 }
0x1739   : > { %8537 = vmatprep.subr.bf16.mxu1 %v10355_v5 }
0x173c   : > { %8539 = vmatpush3.bf16.msra.mxu1 %v10355_v5  ;;  %v5145_v5 = vmul.f32 %v10426_v33, %v9537_v18 }
0x173d   : > { %8541 = vmatprep.subr.bf16.mxu1 %v10360_v22 }
0x1740   : > { %8543 = vmatpush3.bf16.msra.mxu1 %v10360_v22  ;;  %v5146_v22 = vmul.f32 %v10432_v57, %v9547_v26 }
0x1741   : > { %8545 = vmatprep.subr.bf16.mxu1 %v10371_v0 }
0x1744   : > { %8547 = vmatpush3.bf16.msra.mxu1 %v10371_v0 }
0x1745   : > { %8549 = vmatprep.subr.bf16.mxu1 %v10382_v61 }
0x1748   : > { %8551 = vmatpush3.bf16.msra.mxu1 %v10382_v61 }
0x174b   : > { %7712 = vmatmul.mubr.f32.vlgmr.msra.gmra.mrb[64].mxu1 %v5141_v55 }
0x174c   : > { %7714 = vmatprep.mubr.f32.mxu1 %v5142_v52 }
0x174f   : > { %7715 = vmatmul.mubr.f32.gmra.mrb[66].mxu1 %v5143_v47 }
0x1750   : > { %7717 = vmatprep.mubr.f32.mxu1 %v5144_v45 }
0x1753   : > { %7718 = vmatmul.mubr.f32.gmra.mrb[68].mxu1 %v5145_v5 }
0x1754   : > { %7720 = vmatprep.mubr.f32.mxu1 %v5146_v22 }
0x1757   : > { %7721 = vmatmul.mubr.f32.gmra.mrb[70].mxu1 %v5147_v58 }
0x181e   : > { %v7713_v4 = vpop.f32.mrb[64].mxu1 }
0x181f   : > { %v5230_v0 = vpop.f32.mrb[65].mxu1  ;;  %v5272_v7 = vsel %vm908_vm1, %v7713_v4, -inf }
0x1820   : > { %5273 = vmax.xlane.f32.xlu1 %v5272_v7  ;;  %v5269_v16 = vsel %vm908_vm1, %v5230_v0, -inf  ;;  %v5506_v7 = vld [vmem:[#allocation6 + $0x390] sm:$0xff] }
0x1821   : > { %5270 = vmax.xlane.f32.xlu0 %v5269_v16 }
0x1822   : > { %v7716_v61 = vpop.f32.mrb[66].mxu1 }
0x1823   : > { %v5240_v60 = vpop.f32.mrb[67].mxu1  ;;  %v5278_v18 = vsel %vm908_vm1, %v7716_v61, -inf }
0x1824   : > { %5279 = vmax.xlane.f32.xlu1 %v5278_v18  ;;  %v5275_v26 = vsel %vm908_vm1, %v5240_v60, -inf  ;;  %v5508_v18 = vld [vmem:[#allocation6 + $0x3a0] sm:$0xff] }
0x1825   : > { %5276 = vmax.xlane.f32.xlu0 %v5275_v26  ;;  %v5509_v26 = vld [vmem:[#allocation6 + $0x3a8] sm:$0xff] }
0x1826   : > { %v7719_v13 = vpop.f32.mrb[68].mxu1 }
0x1827   : > { %v5250_v37 = vpop.f32.mrb[69].mxu1  ;;  %v5284_v29 = vsel %vm908_vm1, %v7719_v13, -inf }
0x1828   : > { %5285 = vmax.xlane.f32.xlu1 %v5284_v29  ;;  %v5281_v51 = vsel %vm908_vm1, %v5250_v37, -inf  ;;  %v5511_v29 = vld [vmem:[#allocation6 + $0x3b8] sm:$0xff] }
0x1829   : > { %5282 = vmax.xlane.f32.xlu0 %v5281_v51 }
0x182a   : > { %v7722_v33 = vpop.f32.mrb[70].mxu1 }
0x182b   : > { %v5260_v28 = vpop.f32.mrb[71].mxu1  ;;  %v5290_v62 = vsel %vm908_vm1, %v7722_v33, -inf }
0x182c   : > { %5291 = vmax.xlane.f32.xlu1 %v5290_v62  ;;  %v5287_v57 = vsel %vm908_vm1, %v5260_v28, -inf }
0x182d   : > { %5288 = vmax.xlane.f32.xlu0 %v5287_v57  ;;  %v5514_v57 = vld [vmem:[#allocation6 + $0x3d0] sm:$0xff] }
0x18ad   : > { %v5274_v20 = vpop.xlane.xlu1 %5273 }
0x18ae   : > { %v5294_v42 = vsub.f32 %v7713_v4, %v5274_v20  ;;  %v5271_v32 = vpop.xlane.xlu0 %5270  ;;  %v5504_v4 = vld [vmem:[#allocation6 + $0x380] sm:$0xff]  ;;  %v5515_v20 = vld [vmem:[#allocation6 + $0x3d8] sm:$0xff] }
0x18af   : > { %v5293_v10 = vsub.f32 %v5230_v0, %v5271_v32  ;;  %v5505_v0 = vld [vmem:[#allocation6 + $0x388] sm:$0xff]  ;;  %v5516_v32 = vld [vmem:[#allocation6 + $0x3e0] sm:$0xff] }
0x18b0   : > { %v5303_v39 = vmul.f32 1.442695, %v5294_v42  ;;  %v8552_v16 = vpack.c.bf16 %v5505_v0, %v5504_v4  ;;  %v8572_v42 = vpack.c.bf16 %v5515_v20, %v5514_v57  ;;  %v5918_v57 = vld [vmem:[%s10623_s8] ss:$0 sm:$0xff] }
0x18b1   : > { %v5301_v11 = vmul.f32 1.442695, %v5293_v10  ;;  %v5280_v23 = vpop.xlane.xlu1 %5279  ;;  %v5517_v10 = vld [vmem:[#allocation6 + $0x3e8] sm:$0xff] }
0x18b2   : > { %8941 = vpow2.f32 %v5303_v39  ;;  %v5296_v63 = vsub.f32 %v7716_v61, %v5280_v23  ;;  %v5277_v3 = vpop.xlane.xlu0 %5276  ;;  %v5507_v61 = vld [vmem:[#allocation6 + $0x398] sm:$0xff]  ;;  %8553 = vmatprep.subr.bf16.mxu1 %v8552_v16  ;;  %v8576_v39 = vpack.c.bf16 %v5517_v10, %v5516_v32 }
0x18b3   : > { %8943 = vpow2.f32 %v5301_v11  ;;  %v5295_v38 = vsub.f32 %v5240_v60, %v5277_v3  ;;  %v8556_v60 = vpack.c.bf16 %v5507_v61, %v5506_v7  ;;  %8555 = vmatpush3.bf16.msra.mxu1 %v8552_v16 }
0x18b4   : > { %v5307_v27 = vmul.f32 1.442695, %v5296_v63 }
0x18b5   : > { %v5305_v49 = vmul.f32 1.442695, %v5295_v38  ;;  %v5286_v41 = vpop.xlane.xlu1 %5285  ;;  %8557 = vmatprep.subr.bf16.mxu1 %v8556_v60 }
0x18b6   : > { %8945 = vpow2.f32 %v5307_v27  ;;  %v5298_v30 = vsub.f32 %v7719_v13, %v5286_v41  ;;  %v5283_v50 = vpop.xlane.xlu0 %5282  ;;  %v8560_v13 = vpack.c.bf16 %v5509_v26, %v5508_v18 }
0x18b7   : > { %8947 = vpow2.f32 %v5305_v49  ;;  %v5297_v19 = vsub.f32 %v5250_v37, %v5283_v50  ;;  %v5510_v37 = vld [vmem:[#allocation6 + $0x3b0] sm:$0xff]  ;;  %8559 = vmatpush3.bf16.msra.mxu1 %v8556_v60 }
0x18b8   : > { %v5311_v53 = vmul.f32 1.442695, %v5298_v30  ;;  %8561 = vmatprep.subr.bf16.mxu1 %v8560_v13  ;;  %v8564_v51 = vpack.c.bf16 %v5511_v29, %v5510_v37 }
0x18b9   : > { %v5309_v31 = vmul.f32 1.442695, %v5297_v19  ;;  %v5292_v43 = vpop.xlane.xlu1 %5291 }
0x18ba   : > { %8949 = vpow2.f32 %v5311_v53  ;;  %v5300_v2 = vsub.f32 %v7722_v33, %v5292_v43  ;;  %v5289_v14 = vpop.xlane.xlu0 %5288  ;;  %v5512_v33 = vld [vmem:[#allocation6 + $0x3c0] sm:$0xff] }
0x18bb   : > { %8951 = vpow2.f32 %v5309_v31  ;;  %v5299_v6 = vsub.f32 %v5260_v28, %v5289_v14  ;;  %v5513_v28 = vld [vmem:[#allocation6 + $0x3c8] sm:$0xff]  ;;  %8563 = vmatpush3.bf16.msra.mxu1 %v8560_v13 }
0x18bc   : > { %v10505_v35 = vpop.eup %8941  ;;  %v5315_v40 = vmul.f32 1.442695, %v5300_v2  ;;  %8565 = vmatprep.subr.bf16.mxu1 %v8564_v51  ;;  %v8568_v62 = vpack.c.bf16 %v5513_v28, %v5512_v33 }
0x18bd   : > { %v10507_v12 = vpop.eup %8943  ;;  %v5313_v8 = vmul.f32 1.442695, %v5299_v6  ;;  %v5320_v17 = vsel %vm908_vm1, %v10505_v35, 0.0 }
0x18be   : > { %8953 = vpow2.f32 %v5315_v40  ;;  %5321 = vadd.xlane.f32.xlu1 %v5320_v17  ;;  %v5317_v15 = vsel %vm908_vm1, %v10507_v12, 0.0 }
0x18bf   : > { %8955 = vpow2.f32 %v5313_v8  ;;  %5318 = vadd.xlane.f32.xlu0 %v5317_v15  ;;  %8567 = vmatpush3.bf16.msra.mxu1 %v8564_v51 }
0x18c0   : > { %v10513_v21 = vpop.eup %8945  ;;  %8569 = vmatprep.subr.bf16.mxu1 %v8568_v62 }
0x18c1   : > { %v10515_v9 = vpop.eup %8947  ;;  %v5326_v1 = vsel %vm908_vm1, %v10513_v21, 0.0 }
0x18c2   : > { %5327 = vadd.xlane.f32.xlu1 %v5326_v1  ;;  %v5323_v59 = vsel %vm908_vm1, %v10515_v9, 0.0  ;;  %v5519_v1 = vld [vmem:[#allocation6 + $0x3f8] sm:$0xff] }
0x18c3   : > { %5324 = vadd.xlane.f32.xlu0 %v5323_v59  ;;  %8571 = vmatpush3.bf16.msra.mxu1 %v8568_v62  ;;  %v5641_v62 = vld [vmem:[%s10622_s7] sm:$0xff] }
0x18c4   : > { %v10521_v34 = vpop.eup %8949  ;;  %8573 = vmatprep.subr.bf16.mxu1 %v8572_v42 }
0x18c5   : > { %v10523_v55 = vpop.eup %8951  ;;  %v5332_v52 = vsel %vm908_vm1, %v10521_v34, 0.0 }
0x18c6   : > { %5333 = vadd.xlane.f32.xlu1 %v5332_v52  ;;  %v5329_v47 = vsel %vm908_vm1, %v10523_v55, 0.0 }
0x18c7   : > { %5330 = vadd.xlane.f32.xlu0 %v5329_v47  ;;  %8575 = vmatpush3.bf16.msra.mxu1 %v8572_v42 }
0x18c8   : > { %v10529_v45 = vpop.eup %8953  ;;  %8577 = vmatprep.subr.bf16.mxu1 %v8576_v39 }
0x18c9   : > { %v10531_v5 = vpop.eup %8955  ;;  %v5338_v22 = vsel %vm908_vm1, %v10529_v45, 0.0 }
0x18ca   : > { %5339 = vadd.xlane.f32.xlu1 %v5338_v22  ;;  %v5335_v58 = vsel %vm908_vm1, %v10531_v5, 0.0 }
0x18cb   : > { %5336 = vadd.xlane.f32.xlu0 %v5335_v58  ;;  %8579 = vmatpush3.bf16.msra.mxu1 %v8576_v39 }
0x194b   : > { %v5322_v11 = vpop.xlane.xlu1 %5321 }
0x194c   : > { %8957 = vrcp.f32 %v5322_v11  ;;  %v5319_v23 = vpop.xlane.xlu0 %5318 }
0x194d   : > { %8959 = vrcp.f32 %v5319_v23 }
0x194f   : > { %v5328_v63 = vpop.xlane.xlu1 %5327 }
0x1950   : > { %8961 = vrcp.f32 %v5328_v63  ;;  %v5325_v3 = vpop.xlane.xlu0 %5324 }
0x1951   : > { %8963 = vrcp.f32 %v5325_v3 }
0x1953   : > { %v5334_v38 = vpop.xlane.xlu1 %5333 }
0x1954   : > { %8965 = vrcp.f32 %v5334_v38  ;;  %v5331_v27 = vpop.xlane.xlu0 %5330 }
0x1955   : > { %8967 = vrcp.f32 %v5331_v27 }
0x1956   : > { %v8958_v49 = vpop.eup %8957 }
0x1957   : > { %v8960_v41 = vpop.eup %8959  ;;  %v5340_v30 = vpop.xlane.xlu1 %5339  ;;  %v5350_v53 = vmul.f32 %v8958_v49, %v10505_v35 }
0x1958   : > { %8969 = vrcp.f32 %v5340_v30  ;;  %v5337_v50 = vpop.xlane.xlu0 %5336  ;;  %v5349_v19 = vmul.f32 %v8960_v41, %v10507_v12 }
0x1959   : > { %8971 = vrcp.f32 %v5337_v50 }
0x195a   : > { %v8962_v31 = vpop.eup %8961  ;;  %7725 = vmatprep.mubr.msk.f32.mxu0 %vm908_vm1, %v5349_v19 }
0x195b   : > { %v8964_v43 = vpop.eup %8963  ;;  %7726 = vmatmul.mubr.msk.f32.vlgmr.msra.gmra.mrb[144].mxu0 %vm908_vm1, %v5350_v53  ;;  %v5352_v14 = vmul.f32 %v8962_v31, %v10513_v21 }
0x195c   : > { %v5351_v2 = vmul.f32 %v8964_v43, %v10515_v9  ;;  %v5518_v9 = vld [vmem:[#allocation6 + $0x3f0] sm:$0xff] }
0x195d   : > { %v8580_v59 = vpack.c.bf16 %v5519_v1, %v5518_v9 }
0x195e   : > { %v8966_v6 = vpop.eup %8965  ;;  %7728 = vmatprep.mubr.msk.f32.mxu0 %vm908_vm1, %v5351_v2 }
0x195f   : > { %v8968_v40 = vpop.eup %8967  ;;  %7729 = vmatmul.mubr.msk.f32.gmra.mrb[146].mxu0 %vm908_vm1, %v5352_v14  ;;  %v5354_v35 = vmul.f32 %v8966_v6, %v10521_v34  ;;  %8581 = vmatprep.subr.bf16.mxu1 %v8580_v59 }
0x1960   : > { %v5353_v12 = vmul.f32 %v8968_v40, %v10523_v55  ;;  %8583 = vmatpush3.bf16.msra.mxu1 %v8580_v59 }
0x1962   : > { %v8970_v8 = vpop.eup %8969  ;;  %7731 = vmatprep.mubr.msk.f32.mxu0 %vm908_vm1, %v5353_v12 }
0x1963   : > { %v8972_v17 = vpop.eup %8971  ;;  %7732 = vmatmul.mubr.msk.f32.gmra.mrb[148].mxu0 %vm908_vm1, %v5354_v35  ;;  %v5356_v21 = vmul.f32 %v8970_v8, %v10529_v45 }
0x1964   : > { %v5355_v15 = vmul.f32 %v8972_v17, %v10531_v5 }
0x1966   : > { %7734 = vmatprep.mubr.msk.f32.mxu0 %vm908_vm1, %v5355_v15 }
0x1967   : > { %7735 = vmatmul.mubr.msk.f32.gmra.mrb[150].mxu0 %vm908_vm1, %v5356_v21 }
0x1a2e   : > { %v7727_v34 = vpop.f32.mrb[144].mxu0 }
0x1a2f   : > { %v5448_v55 = vpop.f32.mrb[145].mxu0  ;;  %v5496_v47 = vmul.f32 %v7727_v34, %v9637_v25 }
0x1a30   : > { %v5495_v52 = vmul.f32 %v5448_v55, %v9634_v24 }
0x1a32   : > { %v7730_v22 = vpop.f32.mrb[146].mxu0  ;;  %7769 = vmatprep.mubr.f32.mxu1 %v5495_v52 }
0x1a33   : > { %v5458_v5 = vpop.f32.mrb[147].mxu0  ;;  %7770 = vmatmul.mubr.f32.vlgmr.msra.gmra.mrb[16].mxu1 %v5496_v47  ;;  %v5498_v58 = vmul.f32 %v7730_v22, %v9653_v36  ;;  %v10652_v36 = vmov 0.0  }
0x1a34   : > { %v5497_v45 = vmul.f32 %v5458_v5, %v9650_v44  ;;  %v9106_v44 = vmov 0.0|0.0   ;;  %7797 = vmatprep.mubr.msk.f32.mxu0 %vm9107_vm2, %v10652_v36 }
0x1a35   : > { %8584 = vmatprep.subr.bf16.mxu0 %v9106_v44 }
0x1a36   : > { %v7733_v4 = vpop.f32.mrb[148].mxu0  ;;  %7772 = vmatprep.mubr.f32.mxu1 %v5497_v45 }
0x1a37   : > { %v5468_v0 = vpop.f32.mrb[149].mxu0  ;;  %7773 = vmatmul.mubr.f32.gmra.mrb[18].mxu1 %v5498_v58  ;;  %v5500_v16 = vmul.f32 %v7733_v4, %v9670_v56 }
0x1a38   : > { %v5499_v7 = vmul.f32 %v5468_v0, %v9666_v46 }
0x1a3a   : > { %v7736_v61 = vpop.f32.mrb[150].mxu0  ;;  %7775 = vmatprep.mubr.f32.mxu1 %v5499_v7 }
0x1a3b   : > { %v5478_v24 = vpop.f32.mrb[151].mxu0  ;;  %7776 = vmatmul.mubr.f32.gmra.mrb[20].mxu1 %v5500_v16  ;;  %v5502_v60 = vmul.f32 %v7736_v61, %v9688_v54 }
0x1a3c   : > { %v5501_v25 = vmul.f32 %v5478_v24, %v9684_v48 }
0x1a3e   : > { %7778 = vmatprep.mubr.f32.mxu1 %v5501_v25 }
0x1a3f   : > { %7779 = vmatmul.mubr.f32.gmra.mrb[22].mxu1 %v5502_v60 }
0x1b06   : > { %v7771_v18 = vpop.f32.mrb[16].mxu1 }
0x1b07   : > { %v5586_v26 = vpop.f32.mrb[17].mxu1 }
0x1b08   : > { %v8585_v46 = vpack.c.bf16 %v7771_v18, %v5586_v26 }
0x1b0a   : > { %v7774_v13 = vpop.f32.mrb[18].mxu1  ;;  %8586 = vmatpush3.bf16.msra.mxu0 %v8585_v46 }
0x1b0b   : > { %v5596_v56 = vpop.f32.mrb[19].mxu1  ;;  %8587 = vmatprep.subr.bf16.mxu0 %v9106_v44 }
0x1b0c   : > { %v8588_v37 = vpack.c.bf16 %v7774_v13, %v5596_v56 }
0x1b0e   : > { %v7777_v29 = vpop.f32.mrb[20].mxu1  ;;  %8589 = vmatpush3.bf16.msra.mxu0 %v8588_v37 }
0x1b0f   : > { %v5606_v48 = vpop.f32.mrb[21].mxu1  ;;  %8590 = vmatprep.subr.bf16.mxu0 %v9106_v44 }
0x1b10   : > { %v8591_v54 = vpack.c.bf16 %v7777_v29, %v5606_v48 }
0x1b12   : > { %v7780_v51 = vpop.f32.mrb[22].mxu1  ;;  %8592 = vmatpush3.bf16.msra.mxu0 %v8591_v54 }
0x1b13   : > { %v5616_v33 = vpop.f32.mrb[23].mxu1  ;;  %8593 = vmatprep.subr.bf16.mxu0 %v9106_v44 }
0x1b14   : > { %v8594_v28 = vpack.c.bf16 %v7780_v51, %v5616_v33 }
0x1b16   : > { %8595 = vmatpush3.bf16.msra.mxu0 %v8594_v28 }
0x1b19   : > { %7798 = vmatmul.mubr.msk.f32.vlgmr.msra.gmra.mrb[152].mxu0 %vm5657_vm3, %v5641_v62 }
0x1bec   : > { %v5727_v20 = vpop.f32.mrb[152].mxu0 }
0x1bed   : > { %v5728_v42 = vadd.f32 %v5918_v57, %v5727_v20  ;;  %v7799_v32 = vpop.f32.mrb[153].mxu0 }
0x1bef   : > { %5731 = vst [vmem:[%s356_s25] sm:$0xff] %v5728_v42 }
0x1bf0   : > { %9042 = shalt.err (!%p9039_p11)
}
0x1bf1   : > { %s9043_s28 = scalar_lea.hbm %s10573_s15, 128  ;;  %s9047_s16 = scalar_lea.hbm %s10624_s9, 256 }
0x1bf2   : > { %p9044_p13 = scmp.ne.s32.totalorder %s10573_s15, %s9043_s28  ;;  %p9048_p6 = scmp.lt.u32.totalorder %s10573_s15, %s10624_s9 }
0x1bf3   : > { %p9049_p9 = scmp.lt.u32.totalorder %s9047_s16, %s9043_s28  ;;  %p9051_p10 = scmp.lt.u32.totalorder %s9043_s28, %s10573_s15 }
0x1bf4   : > { %p9045_p5 = pnand %p9044_p13, %p10653_p1 }
0x1bf5   : > { %p9050_p12 = por %p9049_p9, %p9048_p6 }
0x1bf6   : > { %p9046_p0 = pneg %p9045_p5 }
0x1bf7   : > { %p9052_p2 = por %p9051_p10, %p9050_p12 }
0x1bf9   : > { %p9053_p3 = pnand %p9052_p2, %p9046_p0 }
0x1bfb   : > { %9056 = shalt.err (!%p9053_p3)
}
0x1bfc   : > { %8660 = dma.vmem_to_hbm [thread:$0]  (%p10653_p1), %s10575_s23, 128, %s10573_s15, %s5733_s18  }
0x1bfd PF: > { %p8677_p4 = scmp.ge.s32.totalorder %s9099_s12, 2  ;;  %s5758_s25 = sand.u32 1, %s9087_s30  }
0x1bfe   : > { %p10654_p7 = scmp.ne.s32.totalorder %s10640_s20, 0  ;;  %s5759_s27 = scalar_lea.sflag [#allocation5], %s5758_s25 }
0x1c00   : > { %p8670_p8 = pnand %p8677_p4, %p10654_p7 }
0x1c02   : > { %9082 = dma.done.wait (!%p8670_p8), %s5759_s27, 128  }
0x1c03   : > { %9084 = vsyncadd (!%p8670_p8), %s5759_s27, 4294967168  ;;  %s10655_s12 = sld [smem:[#allocation13_spill]]  ;;  %s10656_s11 = sld [smem:[#allocation12_spill]] }
0x1c04   : > { %s10657_s21 = sld [smem:[#allocation14_spill]]  ;;  %s10658_s30 = smov %s9091_s10 }
0x1c09   : > { %p21_p11 = scmp.ge.s32.totalorder %s10655_s12, 4   ;;  %s10659_s10 = smov %s10656_s11 }
0x1c0a   : > { %s10660_s11 = smov %s10657_s21 }
0x1c0b   :  { %23 = sbr.rel (!%p21_p11) target bundleno = 5 (0x5), region = 114 }
0x1c12   :  { %5764 = vsyncpa [#allocation4], 1 }
0x1c13   :  { %5766 = vsyncpa [#allocation4 + $0x1], 1 }
0x1c14   :  { %5767 = vsyncpa [#allocation7], 1 }
0x1c15   :  { %5768 = vsyncpa [#allocation5], 1 }
0x1c16   :  { %5770 = vsyncpa [#allocation5 + $0x1], 1 }

</bundles_post_ra>
